<compile_context>
chip_gen: v6e
topology: v6e:2x2x1
jax: 0.10.0
libtpu: 0.0.40
codegen_flags: <defaults>
</compile_context>

<pallas_src>
import jax
import jax.numpy as jnp
from jax import lax
from jax.experimental import pallas as pl
from jax.experimental.pallas import tpu as pltpu

FEAT = 1024               # per-sub-discriminator feature width -> concat = 2048
PATCH_H, PATCH_W = 8, 8   # local crop size taken from mask_bounds


# ----------------------------------------------------------------------------
# Kernel
# ----------------------------------------------------------------------------
def _disc_kernel(xl_ref, xg_ref, wl_ref, bl_ref, wg_ref, bg_ref,
                 wfl_ref, wfg_ref, bf_ref, o_ref, acc_ref, lsum_ref):
    """Grid axis 0 tiles the global-feature contraction dim Dg ('arbitrary')."""
    k = pl.program_id(0)

    @pl.when(k == 0)
    def _():
        # Fold b_global straight into the f32 accumulator init.
        acc_ref[...] = jnp.broadcast_to(bg_ref[...], acc_ref.shape)
        # Local branch up front so it overlaps with the in-flight w_global
        # DMAs instead of sitting serially after the last weight tile.
        # TODO(synk): real local_d is an external injected module; this
        # stand-in only reproduces its (B, 1024) output contract.
        hl = jnp.maximum(
            jnp.dot(xl_ref[...], wl_ref[...],
                    preferred_element_type=jnp.float32) + bl_ref[...],
            0.0)
        # Local half of fc(concat(hl, hg)) as a lane reduction -> (B, 1).
        lsum_ref[...] = jnp.sum(hl * wfl_ref[...], axis=-1, keepdims=True)

    # Streamed global matmul tile (stand-in global_d Linear part), K-tiled:
    #   acc += xg[:, k*TK:(k+1)*TK] @ w_global[k*TK:(k+1)*TK, :]
    # Activations are resident (xg_ref holds all K tiles, indexed by k); only
    # the (TK, FEAT) bf16 weight tile is DMA'd per step (double-buffered by
    # the BlockSpec pipeline).  bf16 in, f32 MXU accumulation.
    acc_ref[...] += jnp.dot(xg_ref[k], wg_ref[...],
                            preferred_element_type=jnp.float32)

    # Finalize on the last K step: ReLU + global half of the fc lane reduction.
    @pl.when(k == pl.num_programs(0) - 1)
    def _():
        hg = jnp.maximum(acc_ref[...], 0.0)                       # (B, FEAT) f32
        # torch.cat((hl, hg), dim=1) @ w_fc.T + b_fc  ==  lsum + hg.wfg + b_fc
        o_ref[...] = (jnp.sum(hg * wfg_ref[...], axis=-1, keepdims=True)
                      + lsum_ref[...] + bf_ref[0, 0])


# ----------------------------------------------------------------------------
# Tiling configuration
# ----------------------------------------------------------------------------
def _round_up(x, m):
    return ((x + m - 1) // m) * m


def _choose_tile_config():
    """Per-generation K-tile cap for the streamed w_global and scoped-VMEM limit.

    Conservative default (TK=2048 -> 4 MiB bf16 tile, 8 MiB double-buffered)
    fits the default scoped VMEM on every generation incl. v5e (16 MiB).  On
    chips with more physical VMEM we raise TK to amortize per-grid-step
    overhead and bump the scoped VMEM limit accordingly.
    """
    tk_max, vmem_limit = 2048, None
    try:
        kind = jax.devices()[0].device_kind.lower()
    except Exception:
        kind = ""
    if "v5" in kind:
        # v5e: weight stream is already fully HBM-bound; larger tiles would
        # only force a scoped-VMEM bump for no measurable gain.
        return tk_max, vmem_limit
    try:
        cap = int(pltpu.get_tpu_info().vmem_capacity_bytes)
    except Exception:
        return tk_max, vmem_limit
    if cap >= (96 << 20):        # v6e-class: 128 MiB physical VMEM
        return 4096, 64 << 20
    if cap >= (48 << 20):        # v7x-class: 64 MiB physical per TensorCore
        return 4096, 40 << 20
    return tk_max, vmem_limit


def _choose_tk(dg, tk_max):
    """Lane-aligned K tile (<= tk_max) and the padded Dg it evenly divides."""
    ns = pl.cdiv(dg, tk_max)                 # number of K grid steps
    tk = _round_up(pl.cdiv(dg, ns), 128)     # multiple of 128, <= tk_max
    return tk, ns * tk


# ----------------------------------------------------------------------------
# Params
# ----------------------------------------------------------------------------
def init_params(key, C, H, W):
    dl = C * PATCH_H * PATCH_W
    dg = C * H * W
    ks = jax.random.split(key, 6)
    scale = 0.02
    return {
        "w_local": scale * jax.random.normal(ks[0], (dl, FEAT), jnp.float32),
        "b_local": scale * jax.random.normal(ks[1], (1, FEAT), jnp.float32),
        "w_global": scale * jax.random.normal(ks[2], (dg, FEAT), jnp.float32),
        "b_global": scale * jax.random.normal(ks[3], (1, FEAT), jnp.float32),
        # PyTorch nn.Linear(2048, 1) weight layout: [out_features, in_features]
        "w_fc": scale * jax.random.normal(ks[4], (1, 2 * FEAT), jnp.float32),
        "b_fc": scale * jax.random.normal(ks[5], (1,), jnp.float32),
    }


def prepare_params(params, C, H, W):
    """One-time packing: persistent bf16 weights, padded contraction dim, split fc.

    Doing the f32->bf16 cast and padding here (not per forward call) keeps the
    hot path free of extra HBM passes over the dominant (Dg, 1024) weight.
    """
    dg = C * H * W
    tk_max, vmem_limit = _choose_tile_config()
    tk, dg_pad = _choose_tk(dg, tk_max)

    wg = params["w_global"].astype(jnp.bfloat16)
    if dg_pad != dg:
        wg = jnp.pad(wg, ((0, dg_pad - dg), (0, 0)))   # zero rows: exact math

    prepped = {
        "w_local": params["w_local"].astype(jnp.bfloat16),
        "b_local": params["b_local"],
        "w_global": wg,
        "b_global": params["b_global"],
        # Split fc weight so concat + Linear becomes two lane reductions.
        "w_fc_local": params["w_fc"][:, :FEAT],
        "w_fc_global": params["w_fc"][:, FEAT:],
        "b_fc": params["b_fc"].reshape(1, 1),
        # Static tiling config.
        "tk": int(tk),
        "dg": int(dg),
        "dg_pad": int(dg_pad),
        "vmem_limit": vmem_limit,
    }
    return jax.device_put(
        {k: v for k, v in prepped.items() if hasattr(v, "dtype")}
    ) | {k: v for k, v in prepped.items() if not hasattr(v, "dtype")}


# ----------------------------------------------------------------------------
# Forward
# ----------------------------------------------------------------------------
def discriminator_forward(X, mask_bounds, p):
    """X: [B, C, H, W] float32 (NCHW). mask_bounds: static (y0, x0) of the patch."""
    B, C, H, W = X.shape
    y0, x0 = mask_bounds
    dg, dg_pad, tk = p["dg"], p["dg_pad"], p["tk"]
    nk = dg_pad // tk

    # Glue: crop the local region (same static bounds for the whole batch) and
    # flatten exactly like torch .view(B, -1) on contiguous NCHW.
    # TODO(synk): if mask_bounds becomes traced/per-sample, move the crop into
    # the kernel via scalar prefetch instead of lax.dynamic_slice.
    X_local = lax.dynamic_slice(X, (0, 0, y0, x0), (B, C, PATCH_H, PATCH_W))
    xl = X_local.reshape(B, C * PATCH_H * PATCH_W).astype(jnp.bfloat16)   # [B, Dl]
    xg = X.reshape(B, C * H * W).astype(jnp.bfloat16)                     # [B, Dg]
    if dg_pad != dg:
        xg = jnp.pad(xg, ((0, 0), (0, dg_pad - dg)))
    # (nk, B, TK): tiny, kept fully resident in VMEM and indexed by the grid
    # step inside the kernel -> no per-step activation DMA / semaphore wait.
    xg = xg.reshape(B, nk, tk).transpose(1, 0, 2)
    dl = xl.shape[1]

    # NOTE: the grid-invariant operands below (xl, w_local, biases, fc halves)
    # could be single-buffered (pipeline_mode=pl.Buffered(1)) to halve their
    # VMEM footprint; left at the default buffering for lowering portability —
    # their footprint is small relative to the streamed w_global tiles.
    grid_spec = pltpu.PrefetchScalarGridSpec(
        num_scalar_prefetch=0,
        grid=(nk,),
        in_specs=[
            pl.BlockSpec((B, dl), lambda k: (0, 0)),            # xl (resident)
            pl.BlockSpec((nk, B, tk), lambda k: (0, 0, 0)),     # xg (resident, k-indexed in kernel)
            pl.BlockSpec((dl, FEAT), lambda k: (0, 0)),         # w_local (resident)
            pl.BlockSpec((1, FEAT), lambda k: (0, 0)),          # b_local
            pl.BlockSpec((tk, FEAT), lambda k: (k, 0)),         # w_global (streamed, K-tiled)
            pl.BlockSpec((1, FEAT), lambda k: (0, 0)),          # b_global
            pl.BlockSpec((1, FEAT), lambda k: (0, 0)),          # fc weight, local half
            pl.BlockSpec((1, FEAT), lambda k: (0, 0)),          # fc weight, global half
            pl.BlockSpec(memory_space=pltpu.MemorySpace.SMEM),  # b_fc scalar
        ],
        out_specs=pl.BlockSpec((B, 1), lambda k: (0, 0)),
        scratch_shapes=[
            pltpu.VMEM((B, FEAT), jnp.float32),   # global-branch f32 accumulator
            pltpu.VMEM((B, 1), jnp.float32),      # local-branch fc partial (k==0)
        ],
    )

    cp_kwargs = dict(dimension_semantics=("arbitrary",))
    if p["vmem_limit"] is not None:
        cp_kwargs["vmem_limit_bytes"] = int(p["vmem_limit"])

    out = pl.pallas_call(
        _disc_kernel,
        out_shape=jax.ShapeDtypeStruct((B, 1), jnp.float32),
        grid_spec=grid_spec,
        compiler_params=pltpu.CompilerParams(**cp_kwargs),
    )(xl, xg,
      p["w_local"], p["b_local"],
      p["w_global"], p["b_global"],
      p["w_fc_local"], p["w_fc_global"], p["b_fc"])
    return out


# ----------------------------------------------------------------------------
# Self-test
# ----------------------------------------------------------------------------
if __name__ == "__main__":
    key = jax.random.PRNGKey(0)
    k_x, k_p = jax.random.split(key)

    B, C, H, W = 2, 4, 16, 16
    X = jax.random.normal(k_x, (B, C, H, W), jnp.float32)
    mask_bounds = (4, 4)   # top-left corner of the 8x8 local patch

    params = init_params(k_p, C, H, W)
    prepped = prepare_params(params, C, H, W)   # one-time bf16 cast / pad / split

    out = discriminator_forward(X, mask_bounds, prepped)
    out = jax.block_until_ready(out)
    assert out.shape == (B, 1), out.shape

    # Pure-JAX reference with matching bf16-in / f32-accumulate precision.
    xl = lax.dynamic_slice(X, (0, 0, 4, 4), (B, C, PATCH_H, PATCH_W)).reshape(B, -1)
    xg = X.reshape(B, -1)
    hl = jnp.maximum(
        jnp.dot(xl.astype(jnp.bfloat16), params["w_local"].astype(jnp.bfloat16),
                preferred_element_type=jnp.float32) + params["b_local"], 0.0)
    hg = jnp.maximum(
        jnp.dot(xg.astype(jnp.bfloat16), params["w_global"].astype(jnp.bfloat16),
                preferred_element_type=jnp.float32) + params["b_global"], 0.0)
    concated = jnp.concatenate((hl, hg), axis=1)
    ref = concated @ params["w_fc"].T + params["b_fc"]
    assert jnp.allclose(out, ref, atol=1e-3, rtol=1e-3), (out, ref)

    print("KERNEL_OK")
</pallas_src>

<mosaic_0001>
module attributes {stable_mosaic.version = 11 : i64} {
  func.func @_disc_kernel(%arg0: i32, %arg1: memref<2x256xbf16, #tpu.memory_space<vmem>>, %arg2: memref<1x2x1024xbf16, #tpu.memory_space<vmem>>, %arg3: memref<256x1024xbf16, #tpu.memory_space<vmem>>, %arg4: memref<1x1024xf32, #tpu.memory_space<vmem>>, %arg5: memref<1024x1024xbf16, #tpu.memory_space<vmem>>, %arg6: memref<1x1024xf32, #tpu.memory_space<vmem>>, %arg7: memref<1x1024xf32, #tpu.memory_space<vmem>>, %arg8: memref<1x1024xf32, #tpu.memory_space<vmem>>, %arg9: memref<1x1xf32, #tpu.memory_space<smem>>, %arg10: memref<2x1xf32, #tpu.memory_space<vmem>>, %arg11: memref<2x1024xf32, #tpu.memory_space<vmem>>, %arg12: memref<2x1xf32, #tpu.memory_space<vmem>>) attributes {dimension_semantics = [#tpu.dimension_semantics<arbitrary>], iteration_bounds = array<i64: 1>, scalar_prefetch = 0 : i64, scratch_operands = 2 : i64, tpu.core_type = #tpu.core_type<tc>, window_params = [{pipeline_mode = #tpu.pipeline_mode<synchronous>, transform_indices = @transform_0, window_bounds = array<i64: 2, 256>}, {pipeline_mode = #tpu.pipeline_mode<synchronous>, transform_indices = @transform_1, window_bounds = array<i64: 1, 2, 1024>}, {pipeline_mode = #tpu.pipeline_mode<synchronous>, transform_indices = @transform_2, window_bounds = array<i64: 256, 1024>}, {pipeline_mode = #tpu.pipeline_mode<synchronous>, transform_indices = @transform_3, window_bounds = array<i64: 1, 1024>}, {transform_indices = @transform_4, window_bounds = array<i64: 1024, 1024>}, {pipeline_mode = #tpu.pipeline_mode<synchronous>, transform_indices = @transform_5, window_bounds = array<i64: 1, 1024>}, {pipeline_mode = #tpu.pipeline_mode<synchronous>, transform_indices = @transform_6, window_bounds = array<i64: 1, 1024>}, {pipeline_mode = #tpu.pipeline_mode<synchronous>, transform_indices = @transform_7, window_bounds = array<i64: 1, 1024>}, {transform_indices = @transform_8, window_bounds = array<i64: 1, 1>}, {pipeline_mode = #tpu.pipeline_mode<synchronous>, transform_indices = @transform_9, window_bounds = array<i64: 2, 1>}]} {
    %c0_i32 = arith.constant 0 : i32
    %0 = arith.cmpi eq, %arg0, %c0_i32 : i32
    %1 = arith.extui %0 : i1 to i32
    %c0_i32_0 = arith.constant 0 : i32
    %2 = arith.cmpi ne, %1, %c0_i32_0 : i32
    scf.if %2 {
      %c0_10 = arith.constant 0 : index
      %c0_11 = arith.constant 0 : index
      %14 = vector.load %arg6[%c0_10, %c0_11] : memref<1x1024xf32, #tpu.memory_space<vmem>>, vector<1x1024xf32>
      %15 = vector.shape_cast %14 : vector<1x1024xf32> to vector<1x1024xf32>
      %16 = vector.broadcast %15 : vector<1x1024xf32> to vector<2x1024xf32>
      %c0_12 = arith.constant 0 : index
      %c0_13 = arith.constant 0 : index
      %17 = vector.load %arg11[%c0_12, %c0_13] : memref<2x1024xf32, #tpu.memory_space<vmem>>, vector<2x1024xf32>
      tpu.vector_store %arg11[%c0_12, %c0_13], %16 {strides = array<i32>} : memref<2x1024xf32, #tpu.memory_space<vmem>>, vector<2x1024xf32>,
      %c0_14 = arith.constant 0 : index
      %c0_15 = arith.constant 0 : index
      %18 = vector.load %arg1[%c0_14, %c0_15] : memref<2x256xbf16, #tpu.memory_space<vmem>>, vector<2x256xbf16>
      %c0_16 = arith.constant 0 : index
      %c0_17 = arith.constant 0 : index
      %19 = vector.load %arg3[%c0_16, %c0_17] : memref<256x1024xbf16, #tpu.memory_space<vmem>>, vector<256x1024xbf16>
      %cst_18 = arith.constant dense<0.000000e+00> : vector<2x1024xf32>
      %20 = tpu.matmul %18, %19, %cst_18 {dimension_numbers = #tpu.dot_dimension_numbers<[1], [0], [0], [1], [0, 0, 1, 1], [], []>} : vector<2x256xbf16>, vector<256x1024xbf16>, vector<2x1024xf32> -> vector<2x1024xf32>
      %c0_19 = arith.constant 0 : index
      %c0_20 = arith.constant 0 : index
      %21 = vector.load %arg4[%c0_19, %c0_20] : memref<1x1024xf32, #tpu.memory_space<vmem>>, vector<1x1024xf32>
      %22 = vector.broadcast %21 : vector<1x1024xf32> to vector<2x1024xf32>
      %23 = arith.addf %20, %22 : vector<2x1024xf32>
      %cst_21 = arith.constant 0.000000e+00 : f32
      %24 = vector.broadcast %cst_21 : f32 to vector<2x1024xf32>
      %25 = arith.maximumf %23, %24 : vector<2x1024xf32>
      %c0_22 = arith.constant 0 : index
      %c0_23 = arith.constant 0 : index
      %26 = vector.load %arg7[%c0_22, %c0_23] : memref<1x1024xf32, #tpu.memory_space<vmem>>, vector<1x1024xf32>
      %27 = vector.broadcast %26 : vector<1x1024xf32> to vector<2x1024xf32>
      %28 = arith.mulf %25, %27 : vector<2x1024xf32>
      %cst_24 = arith.constant dense<0.000000e+00> : vector<2xf32>
      %29 = vector.multi_reduction <add>, %28, %cst_24 [1] : vector<2x1024xf32> to vector<2xf32>
      %30 = vector.shape_cast %29 : vector<2xf32> to vector<2x1xf32>
      %c0_25 = arith.constant 0 : index
      %c0_26 = arith.constant 0 : index
      %31 = vector.load %arg12[%c0_25, %c0_26] : memref<2x1xf32, #tpu.memory_space<vmem>>, vector<2x1xf32>
      tpu.vector_store %arg12[%c0_25, %c0_26], %30 {strides = array<i32>} : memref<2x1xf32, #tpu.memory_space<vmem>>, vector<2x1xf32>,
    } else {
    }
    %c0 = arith.constant 0 : index
    %c0_1 = arith.constant 0 : index
    %3 = vector.load %arg11[%c0, %c0_1] : memref<2x1024xf32, #tpu.memory_space<vmem>>, vector<2x1024xf32>
    %4 = arith.index_cast %arg0 : i32 to index
    %c0_2 = arith.constant 0 : index
    %c0_3 = arith.constant 0 : index
    %5 = vector.load %arg2[%4, %c0_2, %c0_3] : memref<1x2x1024xbf16, #tpu.memory_space<vmem>>, vector<1x2x1024xbf16>
    %6 = vector.shape_cast %5 : vector<1x2x1024xbf16> to vector<2x1024xbf16>
    %c0_4 = arith.constant 0 : index
    %c0_5 = arith.constant 0 : index
    %7 = vector.load %arg5[%c0_4, %c0_5] : memref<1024x1024xbf16, #tpu.memory_space<vmem>>, vector<1024x1024xbf16>
    %cst = arith.constant dense<0.000000e+00> : vector<2x1024xf32>
    %8 = tpu.matmul %6, %7, %cst {dimension_numbers = #tpu.dot_dimension_numbers<[1], [0], [0], [1], [0, 0, 1, 1], [], []>} : vector<2x1024xbf16>, vector<1024x1024xbf16>, vector<2x1024xf32> -> vector<2x1024xf32>
    %9 = arith.addf %3, %8 : vector<2x1024xf32>
    %c0_6 = arith.constant 0 : index
    %c0_7 = arith.constant 0 : index
    %10 = vector.load %arg11[%c0_6, %c0_7] : memref<2x1024xf32, #tpu.memory_space<vmem>>, vector<2x1024xf32>
    tpu.vector_store %arg11[%c0_6, %c0_7], %9 {strides = array<i32>} : memref<2x1024xf32, #tpu.memory_space<vmem>>, vector<2x1024xf32>,
    %c0_i32_8 = arith.constant 0 : i32
    %11 = arith.cmpi eq, %arg0, %c0_i32_8 : i32
    %12 = arith.extui %11 : i1 to i32
    %c0_i32_9 = arith.constant 0 : i32
    %13 = arith.cmpi ne, %12, %c0_i32_9 : i32
    scf.if %13 {
      %c0_10 = arith.constant 0 : index
      %c0_11 = arith.constant 0 : index
      %14 = vector.load %arg11[%c0_10, %c0_11] : memref<2x1024xf32, #tpu.memory_space<vmem>>, vector<2x1024xf32>
      %cst_12 = arith.constant 0.000000e+00 : f32
      %15 = vector.broadcast %cst_12 : f32 to vector<2x1024xf32>
      %16 = arith.maximumf %14, %15 : vector<2x1024xf32>
      %c0_13 = arith.constant 0 : index
      %c0_14 = arith.constant 0 : index
      %17 = vector.load %arg8[%c0_13, %c0_14] : memref<1x1024xf32, #tpu.memory_space<vmem>>, vector<1x1024xf32>
      %18 = vector.broadcast %17 : vector<1x1024xf32> to vector<2x1024xf32>
      %19 = arith.mulf %16, %18 : vector<2x1024xf32>
      %cst_15 = arith.constant dense<0.000000e+00> : vector<2xf32>
      %20 = vector.multi_reduction <add>, %19, %cst_15 [1] : vector<2x1024xf32> to vector<2xf32>
      %21 = vector.shape_cast %20 : vector<2xf32> to vector<2x1xf32>
      %c0_16 = arith.constant 0 : index
      %c0_17 = arith.constant 0 : index
      %22 = vector.load %arg12[%c0_16, %c0_17] : memref<2x1xf32, #tpu.memory_space<vmem>>, vector<2x1xf32>
      %23 = arith.addf %21, %22 : vector<2x1xf32>
      %c0_18 = arith.constant 0 : index
      %c0_19 = arith.constant 0 : index
      %24 = memref.load %arg9[%c0_18, %c0_19] : memref<1x1xf32, #tpu.memory_space<smem>>
      %25 = vector.broadcast %24 : f32 to vector<2x1xf32>
      %26 = arith.addf %23, %25 : vector<2x1xf32>
      %c0_20 = arith.constant 0 : index
      %c0_21 = arith.constant 0 : index
      %27 = vector.load %arg10[%c0_20, %c0_21] : memref<2x1xf32, #tpu.memory_space<vmem>>, vector<2x1xf32>
      tpu.vector_store %arg10[%c0_20, %c0_21], %26 {strides = array<i32>} : memref<2x1xf32, #tpu.memory_space<vmem>>, vector<2x1xf32>,
    } else {
    }
    return
  }
  func.func @transform_0(%arg0: i32) -> (i32, i32) {
    %c0_i32 = arith.constant 0 : i32
    %c0_i32_0 = arith.constant 0 : i32
    %c0_i32_1 = arith.constant 0 : i32
    return %c0_i32, %c0_i32_0 : i32, i32
  }
  func.func @transform_1(%arg0: i32) -> (i32, i32, i32) {
    %c0_i32 = arith.constant 0 : i32
    %c0_i32_0 = arith.constant 0 : i32
    %c0_i32_1 = arith.constant 0 : i32
    %c0_i32_2 = arith.constant 0 : i32
    return %c0_i32, %c0_i32_0, %c0_i32_1 : i32, i32, i32
  }
  func.func @transform_2(%arg0: i32) -> (i32, i32) {
    %c0_i32 = arith.constant 0 : i32
    %c0_i32_0 = arith.constant 0 : i32
    %c0_i32_1 = arith.constant 0 : i32
    return %c0_i32, %c0_i32_0 : i32, i32
  }
  func.func @transform_3(%arg0: i32) -> (i32, i32) {
    %c0_i32 = arith.constant 0 : i32
    %c0_i32_0 = arith.constant 0 : i32
    %c0_i32_1 = arith.constant 0 : i32
    return %c0_i32, %c0_i32_0 : i32, i32
  }
  func.func @transform_4(%arg0: i32) -> (i32, i32) {
    %c0_i32 = arith.constant 0 : i32
    %c0_i32_0 = arith.constant 0 : i32
    return %arg0, %c0_i32 : i32, i32
  }
  func.func @transform_5(%arg0: i32) -> (i32, i32) {
    %c0_i32 = arith.constant 0 : i32
    %c0_i32_0 = arith.constant 0 : i32
    %c0_i32_1 = arith.constant 0 : i32
    return %c0_i32, %c0_i32_0 : i32, i32
  }
  func.func @transform_6(%arg0: i32) -> (i32, i32) {
    %c0_i32 = arith.constant 0 : i32
    %c0_i32_0 = arith.constant 0 : i32
    %c0_i32_1 = arith.constant 0 : i32
    return %c0_i32, %c0_i32_0 : i32, i32
  }
  func.func @transform_7(%arg0: i32) -> (i32, i32) {
    %c0_i32 = arith.constant 0 : i32
    %c0_i32_0 = arith.constant 0 : i32
    %c0_i32_1 = arith.constant 0 : i32
    return %c0_i32, %c0_i32_0 : i32, i32
  }
  func.func @transform_8(%arg0: i32) -> (i32, i32) {
    %c0_i32 = arith.constant 0 : i32
    %c0_i32_0 = arith.constant 0 : i32
    %c0_i32_1 = arith.constant 0 : i32
    return %c0_i32, %c0_i32_0 : i32, i32
  }
  func.func @transform_9(%arg0: i32) -> (i32, i32) {
    %c0_i32 = arith.constant 0 : i32
    %c0_i32_0 = arith.constant 0 : i32
    %c0_i32_1 = arith.constant 0 : i32
    return %c0_i32, %c0_i32_0 : i32, i32
  }
}

</mosaic_0001>

<bundles_post_ra>
// kernel: tpu_custom_call.1
= control target key start
LH: loop header
LB: loop body
LE: loop exit
PB: predicated region body
PF: predicated region fallthrough
CT: control target
= control target key end

     0   :  { %15 = vsyncpa [#allocation6], 0  ;;  %s6473_s0 = inlined_call_operand.hbm [shape: bf16[2,256], index: 0, kind: input, shape index: {}]   ;;  %s6474_s1 = inlined_call_operand.hbm [shape: bf16[1,2,1024], index: 1, kind: input, shape index: {}]   ;;  %s6475_s2 = inlined_call_operand.hbm [shape: bf16[256,1024], index: 2, kind: input, shape index: {}]   ;;  %s6476_s3 = inlined_call_operand.hbm [shape: f32[1,1024], index: 3, kind: input, shape index: {}]   ;;  %s6477_s4 = inlined_call_operand.hbm [shape: bf16[1024,1024], index: 4, kind: input, shape index: {}]   ;;  %s6478_s5 = inlined_call_operand.hbm [shape: f32[1,1024], index: 5, kind: input, shape index: {}]   ;;  %s6479_s6 = inlined_call_operand.hbm [shape: f32[1,1024], index: 6, kind: input, shape index: {}]   ;;  %s6480_s7 = inlined_call_operand.hbm [shape: f32[1,1024], index: 7, kind: input, shape index: {}]   ;;  %s6481_s8 = inlined_call_operand.<no memory space> [shape: f32[1,1], index: 8, kind: input, shape index: {}]   ;;  %s6482_s9 = inlined_call_operand.vmem [shape: f32[2,1], index: 9, kind: output, shape index: {}]  }
   0x1   :  { %16 = vsyncpa [#allocation8], 0 }
   0x2   :  { %17 = vsyncpa [#allocation11], 0 }
   0x3   :  { %18 = vsyncpa [#allocation14], 0 }
   0x4   :  { %19 = vsyncpa [#allocation17], 0  ;;  %s6104_s30 = smov [#allocation7]   ;;  %s6105_s11 = smov [#allocation10]  }
   0x5   :  { %s36_s10 = sshll.u32 %s6104_s30, 4  ;;  %s58_s12 = sshll.u32 %s6105_s11, 4  ;;  %s37_s10 = int_to_ptr.vmem [resolvable:$true] %s36_s10  ;;  %s59_s12 = int_to_ptr.vmem [resolvable:$true] %s58_s12 }
   0x6   :  { %s5942_s13 = scalar_lea.vmem %s37_s10, 128  ;;  %p5947_p1 = scmp.lt.s32.totalorder %s37_s10, %s37_s10 }
   0x7   :  { %p5943_p0 = scmp.ne.s32.totalorder %s37_s10, %s5942_s13  ;;  %p5948_p2 = scmp.lt.s32.totalorder %s5942_s13, %s5942_s13 }
   0x9   :  { %p5949_p3 = por %p5948_p2, %p5947_p1 }
   0xb   :  { %p5950_p4 = pnand %p5949_p3, %p5943_p0 }
   0xd   :  { %5953 = shalt.err (!%p5950_p4)
}
   0xe   :  { %39 = dma.hbm_to_vmem [thread:$0]  %s6474_s1, 128, %s37_s10, [#allocation8]  }
   0xf   :  { %s5962_s16 = scalar_lea.vmem %s59_s12, 128  ;;  %p5967_p6 = scmp.lt.s32.totalorder %s59_s12, %s59_s12 }
  0x10   :  { %p5963_p5 = scmp.ne.s32.totalorder %s59_s12, %s5962_s16  ;;  %p5968_p7 = scmp.lt.s32.totalorder %s5962_s16, %s5962_s16 }
  0x12   :  { %p5969_p8 = por %p5968_p7, %p5967_p6 }
  0x14   :  { %p5970_p9 = pnand %p5969_p8, %p5963_p5 }
  0x16   :  { %5973 = shalt.err (!%p5970_p9)
}
  0x17   :  { %61 = dma.hbm_to_vmem [thread:$0]  %s6476_s3, 128, %s59_s12, [#allocation11]  }
  0x18   :  { %s6106_s19 = smov [#allocation13]   ;;  %s6107_s21 = smov [#allocation5]  }
  0x19   :  { %s80_s20 = sshll.u32 %s6106_s19, 4  ;;  %s26_s22 = sshll.u32 %s6107_s21, 4  ;;  %s81_s20 = int_to_ptr.vmem [resolvable:$true] %s80_s20  ;;  %s27_s22 = int_to_ptr.vmem [resolvable:$true] %s26_s22 }
  0x1a   :  { %s5982_s23 = scalar_lea.vmem %s81_s20, 128  ;;  %p5987_p11 = scmp.lt.s32.totalorder %s81_s20, %s81_s20 }
  0x1b   :  { %p5983_p10 = scmp.ne.s32.totalorder %s81_s20, %s5982_s23  ;;  %p5988_p12 = scmp.lt.s32.totalorder %s5982_s23, %s5982_s23 }
  0x1d   :  { %p5989_p13 = por %p5988_p12, %p5987_p11 }
  0x1f   :  { %p5990_p0 = pnand %p5989_p13, %p5983_p10 }
  0x21   :  { %5993 = shalt.err (!%p5990_p0)
}
  0x22   :  { %83 = dma.hbm_to_vmem [thread:$0]  %s6478_s5, 128, %s81_s20, [#allocation14]  }
  0x23   :  { %s6002_s25 = scalar_lea.vmem %s27_s22, 32  ;;  %p6007_p2 = scmp.lt.s32.totalorder %s27_s22, %s27_s22 }
  0x24   :  { %p6003_p1 = scmp.ne.s32.totalorder %s27_s22, %s6002_s25  ;;  %p6008_p3 = scmp.lt.s32.totalorder %s6002_s25, %s6002_s25 }
  0x26   :  { %p6009_p4 = por %p6008_p3, %p6007_p2 }
  0x28   :  { %p6010_p5 = pnand %p6009_p4, %p6003_p1 }
  0x2a   :  { %6013 = shalt.err (!%p6010_p5)
}
  0x2b   :  { %29 = dma.hbm_to_vmem [thread:$0]  %s6473_s0, 32, %s27_s22, [#allocation6]  }
  0x2c   :  { %s6108_s27 = smov [#allocation9]  }
  0x2d   :  { %s45_s28 = sshll.u32 %s6108_s27, 4  ;;  %s46_s28 = int_to_ptr.vmem [resolvable:$true] %s45_s28 }
  0x2e   :  { %s6022_s29 = scalar_lea.vmem %s46_s28, 16384  ;;  %p6027_p7 = scmp.lt.s32.totalorder %s46_s28, %s46_s28 }
  0x2f   :  { %p6023_p6 = scmp.ne.s32.totalorder %s46_s28, %s6022_s29  ;;  %p6028_p8 = scmp.lt.s32.totalorder %s6022_s29, %s6022_s29 }
  0x31   :  { %p6029_p9 = por %p6028_p8, %p6027_p7 }
  0x33   :  { %p6030_p10 = pnand %p6029_p9, %p6023_p6 }
  0x35   :  { %6033 = shalt.err (!%p6030_p10)
}
  0x36   :  { %s6109_s5 = smov 512   ;;  %s6110_s30 = smov 32  }
  0x37   :  { %51 = dma.hbm_to_vmem [thread:$0]  %s6475_s2, 16384, %s46_s28, [#allocation8], %s6109_s5, %s6109_s5, %s6110_s30  }
  0x38   :  { %s6111_s12 = smov [#allocation12]   ;;  %s6112_s0 = smov [#allocation15]  }
  0x39   :  { %s67_s13 = sshll.u32 %s6111_s12, 4  ;;  %s90_s14 = sshll.u32 %s6112_s0, 4  ;;  %s68_s13 = int_to_ptr.vmem [resolvable:$true] %s67_s13  ;;  %s91_s14 = int_to_ptr.vmem [resolvable:$true] %s90_s14 }
  0x3a   :  { %s6042_s15 = scalar_lea.vmem %s68_s13, 65536  ;;  %p6047_p12 = scmp.lt.s32.totalorder %s68_s13, %s68_s13 }
  0x3b   :  { %p6043_p11 = scmp.ne.s32.totalorder %s68_s13, %s6042_s15  ;;  %p6048_p13 = scmp.lt.s32.totalorder %s6042_s15, %s6042_s15 }
  0x3d   :  { %p6049_p0 = por %p6048_p13, %p6047_p12 }
  0x3f   :  { %p6050_p1 = pnand %p6049_p0, %p6043_p11 }
  0x41   :  { %6053 = shalt.err (!%p6050_p1)
}
  0x42   :  { %73 = dma.hbm_to_vmem [thread:$0]  %s6477_s4, 65536, %s68_s13, [#allocation11], %s6109_s5, %s6109_s5, %s6110_s30  }
  0x43   :  { %s6062_s18 = scalar_lea.vmem %s91_s14, 128  ;;  %p6067_p3 = scmp.lt.s32.totalorder %s91_s14, %s91_s14 }
  0x44   :  { %p6063_p2 = scmp.ne.s32.totalorder %s91_s14, %s6062_s18  ;;  %p6068_p4 = scmp.lt.s32.totalorder %s6062_s18, %s6062_s18 }
  0x46   :  { %p6069_p5 = por %p6068_p4, %p6067_p3 }
  0x48   :  { %p6070_p6 = pnand %p6069_p5, %p6063_p2 }
  0x4a   :  { %6073 = shalt.err (!%p6070_p6)
}
  0x4b   :  { %93 = dma.hbm_to_vmem [thread:$0]  %s6479_s6, 128, %s91_s14, [#allocation14]  }
  0x4c   :  { %s6113_s20 = smov [#allocation16]  }
  0x4d   :  { %s100_s21 = sshll.u32 %s6113_s20, 4  ;;  %s101_s21 = int_to_ptr.vmem [resolvable:$true] %s100_s21 }
  0x4e   :  { %s6082_s22 = scalar_lea.vmem %s101_s21, 128  ;;  %p6087_p8 = scmp.lt.s32.totalorder %s101_s21, %s101_s21 }
  0x4f   :  { %p6083_p7 = scmp.ne.s32.totalorder %s101_s21, %s6082_s22  ;;  %p6088_p9 = scmp.lt.s32.totalorder %s6082_s22, %s6082_s22 }
  0x51   :  { %p6089_p10 = por %p6088_p9, %p6087_p8 }
  0x53   :  { %p6090_p11 = pnand %p6089_p10, %p6083_p7 }
  0x55   :  { %6093 = shalt.err (!%p6090_p11)
}
  0x56   :  { %103 = dma.hbm_to_vmem [thread:$0]  %s6480_s7, 128, %s101_s21, [#allocation17]  }
  0x57   :  { %6094 = dma.done.wait [#allocation6], 32  }
  0x58   :  { %6095 = vsyncadd [#allocation6], 4294967264 }
  0x59   :  { %6096 = dma.done.wait [#allocation8], 16512  }
  0x5a   :  { %6097 = vsyncadd [#allocation8], 4294950784 }
  0x5b   :  { %6098 = dma.done.wait [#allocation11], 65664  }
  0x5c   :  { %6099 = vsyncadd [#allocation11], 4294901632 }
  0x5d   :  { %6100 = dma.done.wait [#allocation14], 256  }
  0x5e   :  { %6101 = vsyncadd [#allocation14], 4294967040 }
  0x5f   :  { %6102 = dma.done.wait [#allocation17], 128  }
  0x60   :  { %6103 = vsyncadd [#allocation17], 4294967168  ;;  %v263_v0 = vld [vmem:[#allocation9 + $0x1c0] sm:$0xff]  ;;  %v264_v2 = vld [vmem:[#allocation9 + $0x1c8] sm:$0xff]  ;;  %v136_v35 = vlaneseq  ;;  %v6114_v36 = vmov 1966171168  }
  0x61   :  { %v267_v1 = vld [vmem:[#allocation9 + $0x1e0] sm:$0xff]  ;;  %v268_v4 = vld [vmem:[#allocation9 + $0x1e8] sm:$0xff]  ;;  %v387_v37 = vunpack.c.l.s4 %v6114_v36  ;;  %v6195_v59 = vld.sshfl [vmem:[#allocation5] sm:$0x11 pattern:$0x75316420] }
  0x62   :  { %v5338_v3 = vcombine.high %v263_v0, %v267_v1  ;;  %v5337_v5 = vcombine.low %v263_v0, %v267_v1  ;;  %v255_v6 = vld [vmem:[#allocation9 + $0x180] sm:$0xff]  ;;  %v5340_v8 = vcombine.high %v264_v2, %v268_v4  ;;  %v5339_v9 = vcombine.low %v264_v2, %v268_v4  ;;  %v256_v11 = vld [vmem:[#allocation9 + $0x188] sm:$0xff] }
  0x63   :  { %v259_v7 = vld [vmem:[#allocation9 + $0x1a0] sm:$0xff]  ;;  %v260_v12 = vld [vmem:[#allocation9 + $0x1a8] sm:$0xff]  ;;  %v6190_v46 = vshrl.u32 %v136_v35, 7  ;;  %v388_v47 = vunpack.c.0.s8 %v387_v37  ;;  %v385_v63 = vcombine.high %v6195_v59, %v6195_v59  ;;  %vm1264_vm0 = vcmask 1041408  }
  0x64   :  { %v5330_v10 = vcombine.high %v255_v6, %v259_v7  ;;  %v247_v13 = vld [vmem:[#allocation9 + $0x140] sm:$0xff]  ;;  %1042 = vmatprep.subr.bf16.mxu0 %v5338_v3  ;;  %v5332_v14 = vcombine.high %v256_v11, %v260_v12  ;;  %v248_v16 = vld [vmem:[#allocation9 + $0x148] sm:$0xff]  ;;  %1083 = vmatprep.subr.bf16.mxu1 %v5340_v8  ;;  %v5329_v18 = vcombine.low %v255_v6, %v259_v7  ;;  %vm1282_vm1 = vcmask 1024  }
  0x65   :  { %v251_v15 = vld [vmem:[#allocation9 + $0x160] sm:$0xff]  ;;  %v252_v17 = vld [vmem:[#allocation9 + $0x168] sm:$0xff]  ;;  %1043 = vmatpush1.bf16.msra.mxu0 %v5337_v5  ;;  %1084 = vmatpush1.bf16.msra.mxu1 %v5339_v9  ;;  %v5331_v19 = vcombine.low %v256_v11, %v260_v12  ;;  %v6193_v56 = vsub.s32 %v388_v47, %v6190_v46 }
  0x66   :  { %1044 = vmatprep.subr.bf16.mxu0 %v5330_v10  ;;  %v5322_v20 = vcombine.high %v247_v13, %v251_v15  ;;  %1085 = vmatprep.subr.bf16.mxu1 %v5332_v14  ;;  %v5324_v21 = vcombine.high %v248_v16, %v252_v17  ;;  %v239_v22 = vld [vmem:[#allocation9 + $0x100] sm:$0xff]  ;;  %v240_v24 = vld [vmem:[#allocation9 + $0x108] sm:$0xff]  ;;  %v5321_v26 = vcombine.low %v247_v13, %v251_v15 }
  0x67   :  { %v243_v23 = vld [vmem:[#allocation9 + $0x120] sm:$0xff]  ;;  %v244_v25 = vld [vmem:[#allocation9 + $0x128] sm:$0xff]  ;;  %v5323_v27 = vcombine.low %v248_v16, %v252_v17  ;;  %v6200_v3 = vrot.slane %v385_v63, %v6193_v56 }
  0x68   :  { %v5314_v28 = vcombine.high %v239_v22, %v243_v23  ;;  %v5316_v29 = vcombine.high %v240_v24, %v244_v25  ;;  %v231_v30 = vld [vmem:[#allocation9 + $0xc0] sm:$0xff]  ;;  %v232_v32 = vld [vmem:[#allocation9 + $0xc8] sm:$0xff]  ;;  %v5313_v34 = vcombine.low %v239_v22, %v243_v23  ;;  %v5315_v38 = vcombine.low %v240_v24, %v244_v25 }
  0x69   :  { %1045 = vmatpush1.bf16.msra.mxu0 %v5329_v18  ;;  %1086 = vmatpush1.bf16.msra.mxu1 %v5331_v19  ;;  %v235_v31 = vld [vmem:[#allocation9 + $0xe0] sm:$0xff]  ;;  %v236_v33 = vld [vmem:[#allocation9 + $0xe8] sm:$0xff] }
  0x6a   :  { %1046 = vmatprep.subr.bf16.mxu0 %v5322_v20  ;;  %1087 = vmatprep.subr.bf16.mxu1 %v5324_v21  ;;  %v5306_v39 = vcombine.high %v231_v30, %v235_v31  ;;  %v5308_v40 = vcombine.high %v232_v32, %v236_v33  ;;  %v223_v41 = vld [vmem:[#allocation9 + $0x80] sm:$0xff]  ;;  %v224_v43 = vld [vmem:[#allocation9 + $0x88] sm:$0xff]  ;;  %v5305_v45 = vcombine.low %v231_v30, %v235_v31 }
  0x6b   :  { %v227_v42 = vld [vmem:[#allocation9 + $0xa0] sm:$0xff]  ;;  %v228_v44 = vld [vmem:[#allocation9 + $0xa8] sm:$0xff]  ;;  %v5307_v48 = vcombine.low %v232_v32, %v236_v33  ;;  %1074 = vmatprep.mubr.bf16.mxu0 %v6200_v3  ;;  %1115 = vmatprep.mubr.bf16.mxu1 %v6200_v3 }
  0x6c   :  { %v5298_v49 = vcombine.high %v223_v41, %v227_v42  ;;  %v5300_v50 = vcombine.high %v224_v43, %v228_v44  ;;  %v215_v51 = vld [vmem:[#allocation9 + $0x40] sm:$0xff]  ;;  %v216_v53 = vld [vmem:[#allocation9 + $0x48] sm:$0xff]  ;;  %v5297_v55 = vcombine.low %v223_v41, %v227_v42  ;;  %v5299_v57 = vcombine.low %v224_v43, %v228_v44 }
  0x6d   :  { %1047 = vmatpush1.bf16.msra.mxu0 %v5321_v26  ;;  %1088 = vmatpush1.bf16.msra.mxu1 %v5323_v27  ;;  %v219_v52 = vld [vmem:[#allocation9 + $0x60] sm:$0xff]  ;;  %v220_v54 = vld [vmem:[#allocation9 + $0x68] sm:$0xff] }
  0x6e   :  { %1048 = vmatprep.subr.bf16.mxu0 %v5314_v28  ;;  %1089 = vmatprep.subr.bf16.mxu1 %v5316_v29  ;;  %v5290_v58 = vcombine.high %v215_v51, %v219_v52  ;;  %v5292_v60 = vcombine.high %v216_v53, %v220_v54  ;;  %v207_v61 = vld [vmem:[#allocation9] sm:$0xff]  ;;  %v208_v0 = vld [vmem:[#allocation9 + $0x8] sm:$0xff]  ;;  %v5289_v2 = vcombine.low %v215_v51, %v219_v52 }
  0x6f   :  { %v211_v62 = vld [vmem:[#allocation9 + $0x20] sm:$0xff]  ;;  %v212_v1 = vld [vmem:[#allocation9 + $0x28] sm:$0xff]  ;;  %v5291_v4 = vcombine.low %v216_v53, %v220_v54 }
  0x70   :  { %v5282_v5 = vcombine.high %v207_v61, %v211_v62  ;;  %v5284_v6 = vcombine.high %v208_v0, %v212_v1  ;;  %v327_v7 = vld [vmem:[#allocation9 + $0x3c0] sm:$0xff]  ;;  %v328_v9 = vld [vmem:[#allocation9 + $0x3c8] sm:$0xff]  ;;  %v5281_v11 = vcombine.low %v207_v61, %v211_v62  ;;  %v5283_v12 = vcombine.low %v208_v0, %v212_v1 }
  0x71   :  { %1049 = vmatpush1.bf16.msra.mxu0 %v5313_v34  ;;  %1090 = vmatpush1.bf16.msra.mxu1 %v5315_v38  ;;  %v331_v8 = vld [vmem:[#allocation9 + $0x3e0] sm:$0xff]  ;;  %v332_v10 = vld [vmem:[#allocation9 + $0x3e8] sm:$0xff] }
  0x72   :  { %1050 = vmatprep.subr.bf16.mxu0 %v5306_v39  ;;  %1091 = vmatprep.subr.bf16.mxu1 %v5308_v40  ;;  %v5402_v13 = vcombine.high %v327_v7, %v331_v8  ;;  %v5404_v14 = vcombine.high %v328_v9, %v332_v10  ;;  %v319_v15 = vld [vmem:[#allocation9 + $0x380] sm:$0xff]  ;;  %v320_v17 = vld [vmem:[#allocation9 + $0x388] sm:$0xff]  ;;  %v5401_v19 = vcombine.low %v327_v7, %v331_v8 }
  0x73   :  { %v323_v16 = vld [vmem:[#allocation9 + $0x3a0] sm:$0xff]  ;;  %v324_v18 = vld [vmem:[#allocation9 + $0x3a8] sm:$0xff]  ;;  %v5403_v20 = vcombine.low %v328_v9, %v332_v10 }
  0x74   :  { %v5394_v21 = vcombine.high %v319_v15, %v323_v16  ;;  %v5396_v22 = vcombine.high %v320_v17, %v324_v18  ;;  %v311_v23 = vld [vmem:[#allocation9 + $0x340] sm:$0xff]  ;;  %v312_v25 = vld [vmem:[#allocation9 + $0x348] sm:$0xff]  ;;  %v5393_v27 = vcombine.low %v319_v15, %v323_v16  ;;  %v5395_v28 = vcombine.low %v320_v17, %v324_v18 }
  0x75   :  { %1051 = vmatpush1.bf16.msra.mxu0 %v5305_v45  ;;  %1092 = vmatpush1.bf16.msra.mxu1 %v5307_v48  ;;  %v315_v24 = vld [vmem:[#allocation9 + $0x360] sm:$0xff]  ;;  %v316_v26 = vld [vmem:[#allocation9 + $0x368] sm:$0xff] }
  0x76   :  { %1052 = vmatprep.subr.bf16.mxu0 %v5298_v49  ;;  %1093 = vmatprep.subr.bf16.mxu1 %v5300_v50  ;;  %v5386_v29 = vcombine.high %v311_v23, %v315_v24  ;;  %v5388_v30 = vcombine.high %v312_v25, %v316_v26  ;;  %v303_v31 = vld [vmem:[#allocation9 + $0x300] sm:$0xff]  ;;  %v304_v33 = vld [vmem:[#allocation9 + $0x308] sm:$0xff]  ;;  %v5385_v35 = vcombine.low %v311_v23, %v315_v24  ;;  %v262_v23 = vld [vmem:[#allocation9 + $0x1b8] sm:$0xff] }
  0x77   :  { %v307_v32 = vld [vmem:[#allocation9 + $0x320] sm:$0xff]  ;;  %v308_v34 = vld [vmem:[#allocation9 + $0x328] sm:$0xff]  ;;  %v5387_v36 = vcombine.low %v312_v25, %v316_v26 }
  0x78   :  { %v5378_v37 = vcombine.high %v303_v31, %v307_v32  ;;  %v5380_v38 = vcombine.high %v304_v33, %v308_v34  ;;  %v295_v39 = vld [vmem:[#allocation9 + $0x2c0] sm:$0xff]  ;;  %v296_v41 = vld [vmem:[#allocation9 + $0x2c8] sm:$0xff]  ;;  %v5377_v43 = vcombine.low %v303_v31, %v307_v32  ;;  %v5379_v44 = vcombine.low %v304_v33, %v308_v34  ;;  %v254_v31 = vld [vmem:[#allocation9 + $0x178] sm:$0xff] }
  0x79   :  { %1053 = vmatpush1.bf16.msra.mxu0 %v5297_v55  ;;  %1094 = vmatpush1.bf16.msra.mxu1 %v5299_v57  ;;  %v299_v40 = vld [vmem:[#allocation9 + $0x2e0] sm:$0xff]  ;;  %v300_v42 = vld [vmem:[#allocation9 + $0x2e8] sm:$0xff] }
  0x7a   :  { %1054 = vmatprep.subr.bf16.mxu0 %v5290_v58  ;;  %1095 = vmatprep.subr.bf16.mxu1 %v5292_v60  ;;  %v5370_v45 = vcombine.high %v295_v39, %v299_v40  ;;  %v5372_v47 = vcombine.high %v296_v41, %v300_v42  ;;  %v287_v48 = vld [vmem:[#allocation9 + $0x280] sm:$0xff]  ;;  %v288_v50 = vld [vmem:[#allocation9 + $0x288] sm:$0xff]  ;;  %v5369_v52 = vcombine.low %v295_v39, %v299_v40 }
  0x7b   :  { %v291_v49 = vld [vmem:[#allocation9 + $0x2a0] sm:$0xff]  ;;  %v292_v51 = vld [vmem:[#allocation9 + $0x2a8] sm:$0xff]  ;;  %v5371_v53 = vcombine.low %v296_v41, %v300_v42 }
  0x7c   :  { %v5362_v54 = vcombine.high %v287_v48, %v291_v49  ;;  %v5364_v55 = vcombine.high %v288_v50, %v292_v51  ;;  %v279_v57 = vld [vmem:[#allocation9 + $0x240] sm:$0xff]  ;;  %v280_v60 = vld [vmem:[#allocation9 + $0x248] sm:$0xff]  ;;  %v5361_v62 = vcombine.low %v287_v48, %v291_v49  ;;  %v5363_v63 = vcombine.low %v288_v50, %v292_v51  ;;  %v225_v51 = vld [vmem:[#allocation9 + $0x90] sm:$0xff] }
  0x7d   :  { %1055 = vmatpush1.bf16.msra.mxu0 %v5289_v2  ;;  %1096 = vmatpush1.bf16.msra.mxu1 %v5291_v4  ;;  %v283_v58 = vld [vmem:[#allocation9 + $0x260] sm:$0xff]  ;;  %v284_v61 = vld [vmem:[#allocation9 + $0x268] sm:$0xff] }
  0x7e   :  { %1056 = vmatprep.subr.bf16.mxu0 %v5282_v5  ;;  %1097 = vmatprep.subr.bf16.mxu1 %v5284_v6  ;;  %v5354_v0 = vcombine.high %v279_v57, %v283_v58  ;;  %v5356_v1 = vcombine.high %v280_v60, %v284_v61  ;;  %v271_v2 = vld [vmem:[#allocation9 + $0x200] sm:$0xff]  ;;  %v272_v5 = vld [vmem:[#allocation9 + $0x208] sm:$0xff]  ;;  %v5353_v7 = vcombine.low %v279_v57, %v283_v58 }
  0x7f   :  { %v275_v4 = vld [vmem:[#allocation9 + $0x220] sm:$0xff]  ;;  %v276_v6 = vld [vmem:[#allocation9 + $0x228] sm:$0xff]  ;;  %v5355_v8 = vcombine.low %v280_v60, %v284_v61  ;;  %v217_v61 = vld [vmem:[#allocation9 + $0x50] sm:$0xff] }
  0x80   :  { %v5346_v9 = vcombine.high %v271_v2, %v275_v4  ;;  %v5348_v10 = vcombine.high %v272_v5, %v276_v6  ;;  %v5345_v15 = vcombine.low %v271_v2, %v275_v4  ;;  %v5347_v16 = vcombine.low %v272_v5, %v276_v6  ;;  %v209_v6 = vld [vmem:[#allocation9 + $0x10] sm:$0xff] }
  0x81   :  { %1057 = vmatpush1.bf16.msra.mxu0 %v5281_v11  ;;  %1098 = vmatpush1.bf16.msra.mxu1 %v5283_v12  ;;  %v265_v11 = vld [vmem:[#allocation9 + $0x1d0] sm:$0xff] }
  0x82   :  { %1058 = vmatprep.subr.bf16.mxu0 %v5402_v13  ;;  %1099 = vmatprep.subr.bf16.mxu1 %v5404_v14  ;;  %v269_v12 = vld [vmem:[#allocation9 + $0x1f0] sm:$0xff]  ;;  %v266_v13 = vld [vmem:[#allocation9 + $0x1d8] sm:$0xff] }
  0x83   :  { %v270_v14 = vld [vmem:[#allocation9 + $0x1f8] sm:$0xff]  ;;  %v5342_v17 = vcombine.high %v265_v11, %v269_v12  ;;  %v5341_v24 = vcombine.low %v265_v11, %v269_v12 }
  0x84   :  { %v5344_v18 = vcombine.high %v266_v13, %v270_v14  ;;  %v5343_v25 = vcombine.low %v266_v13, %v270_v14  ;;  %v329_v14 = vld [vmem:[#allocation9 + $0x3d0] sm:$0xff] }
  0x85   :  { %1059 = vmatpush2.bf16.msra.mxu0 %v5401_v19  ;;  %1100 = vmatpush2.bf16.msra.mxu1 %v5403_v20  ;;  %v257_v19 = vld [vmem:[#allocation9 + $0x190] sm:$0xff] }
  0x86   :  { %1060 = vmatprep.subr.bf16.mxu0 %v5394_v21  ;;  %1101 = vmatprep.subr.bf16.mxu1 %v5396_v22  ;;  %v261_v20 = vld [vmem:[#allocation9 + $0x1b0] sm:$0xff]  ;;  %v6206_v21 = vrot.slane %v6195_v59, %v6193_v56  ;;  %v258_v22 = vld [vmem:[#allocation9 + $0x198] sm:$0xff] }
  0x87   :  { %v5334_v26 = vcombine.high %v257_v19, %v261_v20  ;;  %v5333_v59 = vcombine.low %v257_v19, %v261_v20  ;;  %v5335_v32 = vcombine.low %v258_v22, %v262_v23 }
  0x89   :  { %1061 = vmatpush2.bf16.msra.mxu0 %v5393_v27  ;;  %1102 = vmatpush2.bf16.msra.mxu1 %v5395_v28  ;;  %v5336_v27 = vcombine.high %v258_v22, %v262_v23  ;;  %v249_v28 = vld [vmem:[#allocation9 + $0x150] sm:$0xff] }
  0x8a   :  { %1062 = vmatprep.subr.bf16.mxu0 %v5386_v29  ;;  %1103 = vmatprep.subr.bf16.mxu1 %v5388_v30  ;;  %v253_v29 = vld [vmem:[#allocation9 + $0x170] sm:$0xff]  ;;  %v250_v30 = vld [vmem:[#allocation9 + $0x158] sm:$0xff] }
  0x8b   :  { %v5326_v33 = vcombine.high %v249_v28, %v253_v29  ;;  %v5328_v34 = vcombine.high %v250_v30, %v254_v31  ;;  %v5325_v39 = vcombine.low %v249_v28, %v253_v29  ;;  %v5327_v40 = vcombine.low %v250_v30, %v254_v31  ;;  %v321_v23 = vld [vmem:[#allocation9 + $0x390] sm:$0xff] }
  0x8c   :  { %v313_v31 = vld [vmem:[#allocation9 + $0x350] sm:$0xff] }
  0x8d   :  { %1063 = vmatpush2.bf16.msra.mxu0 %v5385_v35  ;;  %1104 = vmatpush2.bf16.msra.mxu1 %v5387_v36  ;;  %v241_v35 = vld [vmem:[#allocation9 + $0x110] sm:$0xff] }
  0x8e   :  { %1064 = vmatprep.subr.bf16.mxu0 %v5378_v37  ;;  %1105 = vmatprep.subr.bf16.mxu1 %v5380_v38  ;;  %v245_v36 = vld [vmem:[#allocation9 + $0x130] sm:$0xff]  ;;  %v242_v37 = vld [vmem:[#allocation9 + $0x118] sm:$0xff] }
  0x8f   :  { %v246_v38 = vld [vmem:[#allocation9 + $0x138] sm:$0xff]  ;;  %v5318_v41 = vcombine.high %v241_v35, %v245_v36  ;;  %v5317_v48 = vcombine.low %v241_v35, %v245_v36 }
  0x90   :  { %v5320_v42 = vcombine.high %v242_v37, %v246_v38  ;;  %v5319_v49 = vcombine.low %v242_v37, %v246_v38  ;;  %v305_v38 = vld [vmem:[#allocation9 + $0x310] sm:$0xff] }
  0x91   :  { %1065 = vmatpush2.bf16.msra.mxu0 %v5377_v43  ;;  %1106 = vmatpush2.bf16.msra.mxu1 %v5379_v44  ;;  %v233_v43 = vld [vmem:[#allocation9 + $0xd0] sm:$0xff] }
  0x92   :  { %1066 = vmatprep.subr.bf16.mxu0 %v5370_v45  ;;  %1107 = vmatprep.subr.bf16.mxu1 %v5372_v47  ;;  %v237_v44 = vld [vmem:[#allocation9 + $0xf0] sm:$0xff]  ;;  %v234_v45 = vld [vmem:[#allocation9 + $0xd8] sm:$0xff] }
  0x93   :  { %v238_v47 = vld [vmem:[#allocation9 + $0xf8] sm:$0xff]  ;;  %v5310_v50 = vcombine.high %v233_v43, %v237_v44 }
  0x94   :  { %v5311_v57 = vcombine.low %v234_v45, %v238_v47 }
  0x95   :  { %1067 = vmatpush2.bf16.msra.mxu0 %v5369_v52  ;;  %1108 = vmatpush2.bf16.msra.mxu1 %v5371_v53  ;;  %v229_v52 = vld [vmem:[#allocation9 + $0xb0] sm:$0xff]  ;;  %v226_v53 = vld [vmem:[#allocation9 + $0x98] sm:$0xff] }
  0x96   :  { %1068 = vmatprep.subr.bf16.mxu0 %v5362_v54  ;;  %1109 = vmatprep.subr.bf16.mxu1 %v5364_v55  ;;  %v230_v54 = vld [vmem:[#allocation9 + $0xb8] sm:$0xff]  ;;  %v5309_v55 = vcombine.low %v233_v43, %v237_v44  ;;  %v5302_v58 = vcombine.high %v225_v51, %v229_v52 }
  0x97   :  { %v5304_v60 = vcombine.high %v226_v53, %v230_v54  ;;  %v5303_v2 = vcombine.low %v226_v53, %v230_v54  ;;  %v289_v54 = vld [vmem:[#allocation9 + $0x290] sm:$0xff] }
  0x99   :  { %1069 = vmatpush2.bf16.msra.mxu0 %v5361_v62  ;;  %1110 = vmatpush2.bf16.msra.mxu1 %v5363_v63  ;;  %v221_v62 = vld [vmem:[#allocation9 + $0x70] sm:$0xff]  ;;  %v218_v63 = vld [vmem:[#allocation9 + $0x58] sm:$0xff] }
  0x9a   :  { %1070 = vmatprep.subr.bf16.mxu0 %v5354_v0  ;;  %1111 = vmatprep.subr.bf16.mxu1 %v5356_v1  ;;  %v222_v0 = vld [vmem:[#allocation9 + $0x78] sm:$0xff]  ;;  %v5301_v1 = vcombine.low %v225_v51, %v229_v52  ;;  %v5294_v4 = vcombine.high %v217_v61, %v221_v62 }
  0x9b   :  { %v5296_v5 = vcombine.high %v218_v63, %v222_v0  ;;  %v5295_v11 = vcombine.low %v218_v63, %v222_v0  ;;  %v281_v0 = vld [vmem:[#allocation9 + $0x250] sm:$0xff] }
  0x9d   :  { %1071 = vmatpush2.bf16.msra.mxu0 %v5353_v7  ;;  %1112 = vmatpush2.bf16.msra.mxu1 %v5355_v8  ;;  %v213_v7 = vld [vmem:[#allocation9 + $0x30] sm:$0xff]  ;;  %v210_v8 = vld [vmem:[#allocation9 + $0x18] sm:$0xff] }
  0x9e   :  { %1072 = vmatprep.subr.bf16.mxu0 %v5346_v9  ;;  %1113 = vmatprep.subr.bf16.mxu1 %v5348_v10  ;;  %v214_v9 = vld [vmem:[#allocation9 + $0x38] sm:$0xff]  ;;  %v5293_v10 = vcombine.low %v217_v61, %v221_v62  ;;  %v5286_v12 = vcombine.high %v209_v6, %v213_v7 }
  0x9f   :  { %v5288_v13 = vcombine.high %v210_v8, %v214_v9  ;;  %v5287_v19 = vcombine.low %v210_v8, %v214_v9 }
  0xa1   :  { %1073 = vmatpush2.bf16.msra.mxu0 %v5345_v15  ;;  %1114 = vmatpush2.bf16.msra.mxu1 %v5347_v16  ;;  %v333_v15 = vld [vmem:[#allocation9 + $0x3f0] sm:$0xff]  ;;  %v330_v16 = vld [vmem:[#allocation9 + $0x3d8] sm:$0xff] }
  0xa2   :  { %1124 = vmatprep.subr.bf16.mxu0 %v5342_v17  ;;  %1165 = vmatprep.subr.bf16.mxu1 %v5344_v18  ;;  %v334_v17 = vld [vmem:[#allocation9 + $0x3f8] sm:$0xff]  ;;  %v5285_v18 = vcombine.low %v209_v6, %v213_v7  ;;  %v5406_v20 = vcombine.high %v329_v14, %v333_v15 }
  0xa3   :  { %v5408_v22 = vcombine.high %v330_v16, %v334_v17  ;;  %v5407_v28 = vcombine.low %v330_v16, %v334_v17  ;;  %v6212_v6 = vld [vmem:[#allocation7] sm:$0xff] }
  0xa4   :  { %1075 = vmatmul.mubr.bf16.vlgmr.msra.gmra.mxu0 %v6206_v21  ;;  %1116 = vmatmul.mubr.bf16.vlgmr.msra.gmra.mxu1 %v6206_v21 }
  0xa5   :  { %1125 = vmatpush1.bf16.msra.mxu0 %v5341_v24  ;;  %1166 = vmatpush1.bf16.msra.mxu1 %v5343_v25  ;;  %v325_v24 = vld [vmem:[#allocation9 + $0x3b0] sm:$0xff]  ;;  %v322_v25 = vld [vmem:[#allocation9 + $0x398] sm:$0xff] }
  0xa6   :  { %1126 = vmatprep.subr.bf16.mxu0 %v5334_v26  ;;  %1167 = vmatprep.subr.bf16.mxu1 %v5336_v27  ;;  %v326_v26 = vld [vmem:[#allocation9 + $0x3b8] sm:$0xff]  ;;  %v5405_v27 = vcombine.low %v329_v14, %v333_v15  ;;  %v5398_v29 = vcombine.high %v321_v23, %v325_v24  ;;  %v6216_v14 = vrot.slane %v6212_v6, %v6193_v56 }
  0xa7   :  { %1156 = vmatprep.mubr.bf16.mxu0 %v6200_v3  ;;  %1197 = vmatprep.mubr.bf16.mxu1 %v6200_v3  ;;  %v5312_v3 = vcombine.high %v234_v45, %v238_v47  ;;  %v5400_v30 = vcombine.high %v322_v25, %v326_v26  ;;  %v5399_v35 = vcombine.low %v322_v25, %v326_v26  ;;  %v297_v47 = vld [vmem:[#allocation9 + $0x2d0] sm:$0xff] }
  0xa9   :  { %1127 = vmatpush1.bf16.msra.mxu0 %v5333_v59  ;;  %1168 = vmatpush1.bf16.msra.mxu1 %v5335_v32  ;;  %v317_v59 = vld [vmem:[#allocation9 + $0x370] sm:$0xff]  ;;  %v314_v32 = vld [vmem:[#allocation9 + $0x358] sm:$0xff] }
  0xaa   :  { %1128 = vmatprep.subr.bf16.mxu0 %v5326_v33  ;;  %1169 = vmatprep.subr.bf16.mxu1 %v5328_v34  ;;  %v318_v33 = vld [vmem:[#allocation9 + $0x378] sm:$0xff]  ;;  %v5397_v34 = vcombine.low %v321_v23, %v325_v24  ;;  %v5390_v36 = vcombine.high %v313_v31, %v317_v59  ;;  %v1477_v23 = vld [vmem:[#allocation12 + $0x5e0] sm:$0xff]  ;;  %v1817_v24 = vcombine.high %v6216_v14, %v6216_v14 }
  0xab   :  { %v5392_v37 = vcombine.high %v314_v32, %v318_v33  ;;  %v5391_v43 = vcombine.low %v314_v32, %v318_v33 }
  0xac   :  { %v6221_v32 = vrot.slane %v1817_v24, %v6193_v56 }
  0xad   :  { %1129 = vmatpush1.bf16.msra.mxu0 %v5325_v39  ;;  %1170 = vmatpush1.bf16.msra.mxu1 %v5327_v40  ;;  %v309_v39 = vld [vmem:[#allocation9 + $0x330] sm:$0xff]  ;;  %v306_v40 = vld [vmem:[#allocation9 + $0x318] sm:$0xff] }
  0xae   :  { %1130 = vmatprep.subr.bf16.mxu0 %v5318_v41  ;;  %1171 = vmatprep.subr.bf16.mxu1 %v5320_v42  ;;  %v310_v41 = vld [vmem:[#allocation9 + $0x338] sm:$0xff]  ;;  %v5389_v42 = vcombine.low %v313_v31, %v317_v59  ;;  %v5382_v44 = vcombine.high %v305_v38, %v309_v39  ;;  %v1465_v31 = vld [vmem:[#allocation12 + $0x580] sm:$0xff] }
  0xaf   :  { %v5384_v45 = vcombine.high %v306_v40, %v310_v41  ;;  %v5383_v51 = vcombine.low %v306_v40, %v310_v41  ;;  %v1469_v59 = vld [vmem:[#allocation12 + $0x5a0] sm:$0xff]  ;;  %v6226_v41 = vcombine.high %v6221_v32, %v6221_v32 }
  0xb0   :  { %v1461_v40 = vld [vmem:[#allocation12 + $0x560] sm:$0xff] }
  0xb1   :  { %1131 = vmatpush1.bf16.msra.mxu0 %v5317_v48  ;;  %1172 = vmatpush1.bf16.msra.mxu1 %v5319_v49  ;;  %v301_v48 = vld [vmem:[#allocation9 + $0x2f0] sm:$0xff]  ;;  %v298_v49 = vld [vmem:[#allocation9 + $0x2d8] sm:$0xff] }
  0xb2   :  { %1132 = vmatprep.subr.bf16.mxu0 %v5310_v50  ;;  %1173 = vmatprep.subr.bf16.mxu1 %v5312_v3  ;;  %v302_v50 = vld [vmem:[#allocation9 + $0x2f8] sm:$0xff]  ;;  %v5381_v3 = vcombine.low %v305_v38, %v309_v39  ;;  %v5374_v52 = vcombine.high %v297_v47, %v301_v48  ;;  %v1333_v38 = vld [vmem:[#allocation12 + $0x160] sm:$0xff] }
  0xb3   :  { %v5376_v53 = vcombine.high %v298_v49, %v302_v50  ;;  %v5375_v61 = vcombine.low %v298_v49, %v302_v50  ;;  %v1457_v39 = vld [vmem:[#allocation12 + $0x540] sm:$0xff] }
  0xb4   :  { %v1449_v49 = vld [vmem:[#allocation12 + $0x500] sm:$0xff] }
  0xb5   :  { %1133 = vmatpush1.bf16.msra.mxu0 %v5309_v55  ;;  %1174 = vmatpush1.bf16.msra.mxu1 %v5311_v57  ;;  %v293_v55 = vld [vmem:[#allocation9 + $0x2b0] sm:$0xff]  ;;  %v290_v57 = vld [vmem:[#allocation9 + $0x298] sm:$0xff]  ;;  %v1453_v50 = vld [vmem:[#allocation12 + $0x520] sm:$0xff] }
  0xb6   :  { %1134 = vmatprep.subr.bf16.mxu0 %v5302_v58  ;;  %1175 = vmatprep.subr.bf16.mxu1 %v5304_v60  ;;  %v294_v58 = vld [vmem:[#allocation9 + $0x2b8] sm:$0xff]  ;;  %v5373_v60 = vcombine.low %v297_v47, %v301_v48  ;;  %v5366_v62 = vcombine.high %v289_v54, %v293_v55  ;;  %v1321_v47 = vld [vmem:[#allocation12 + $0x100] sm:$0xff] }
  0xb7   :  { %v5368_v63 = vcombine.high %v290_v57, %v294_v58  ;;  %v5367_v7 = vcombine.low %v290_v57, %v294_v58  ;;  %v1325_v48 = vld [vmem:[#allocation12 + $0x120] sm:$0xff] }
  0xb8   :  { %v1445_v57 = vld [vmem:[#allocation12 + $0x4e0] sm:$0xff]  ;;  %v5441_v58 = vcombine.low %v1321_v47, %v1325_v48 }
  0xb9   :  { %1135 = vmatpush1.bf16.msra.mxu0 %v5301_v1  ;;  %1176 = vmatpush1.bf16.msra.mxu1 %v5303_v2  ;;  %v285_v1 = vld [vmem:[#allocation9 + $0x270] sm:$0xff]  ;;  %v282_v2 = vld [vmem:[#allocation9 + $0x258] sm:$0xff] }
  0xba   :  { %1136 = vmatprep.subr.bf16.mxu0 %v5294_v4  ;;  %1177 = vmatprep.subr.bf16.mxu1 %v5296_v5  ;;  %v286_v4 = vld [vmem:[#allocation9 + $0x278] sm:$0xff]  ;;  %v5365_v5 = vcombine.low %v289_v54, %v293_v55  ;;  %v5358_v8 = vcombine.high %v281_v0, %v285_v1  ;;  %v5357_v15 = vcombine.low %v281_v0, %v285_v1  ;;  %v1317_v54 = vld [vmem:[#allocation12 + $0xe0] sm:$0xff] }
  0xbb   :  { %v5360_v9 = vcombine.high %v282_v2, %v286_v4  ;;  %v5359_v16 = vcombine.low %v282_v2, %v286_v4  ;;  %v1441_v55 = vld [vmem:[#allocation12 + $0x4c0] sm:$0xff] }
  0xbc   :  { %v1309_v0 = vld [vmem:[#allocation12 + $0xa0] sm:$0xff] }
  0xbd   :  { %1137 = vmatpush1.bf16.msra.mxu0 %v5293_v10  ;;  %1178 = vmatpush1.bf16.msra.mxu1 %v5295_v11  ;;  %v273_v10 = vld [vmem:[#allocation9 + $0x210] sm:$0xff]  ;;  %v1433_v1 = vld [vmem:[#allocation12 + $0x480] sm:$0xff] }
  0xbe   :  { %1138 = vmatprep.subr.bf16.mxu0 %v5286_v12  ;;  %1179 = vmatprep.subr.bf16.mxu1 %v5288_v13  ;;  %v277_v11 = vld [vmem:[#allocation9 + $0x230] sm:$0xff]  ;;  %v274_v12 = vld [vmem:[#allocation9 + $0x218] sm:$0xff]  ;;  %v1437_v2 = vld [vmem:[#allocation12 + $0x4a0] sm:$0xff] }
  0xbf   :  { %v278_v13 = vld [vmem:[#allocation9 + $0x238] sm:$0xff]  ;;  %v5350_v17 = vcombine.high %v273_v10, %v277_v11  ;;  %v5349_v25 = vcombine.low %v273_v10, %v277_v11  ;;  %v1301_v10 = vld [vmem:[#allocation12 + $0x60] sm:$0xff] }
  0xc0   :  { %v5351_v26 = vcombine.low %v274_v12, %v278_v13  ;;  %v1425_v11 = vld [vmem:[#allocation12 + $0x440] sm:$0xff] }
  0xc1   :  { %1139 = vmatpush1.bf16.msra.mxu0 %v5285_v18  ;;  %1180 = vmatpush1.bf16.msra.mxu1 %v5287_v19  ;;  %v5352_v18 = vcombine.high %v274_v12, %v278_v13  ;;  %v1345_v19 = vld [vmem:[#allocation12 + $0x1c0] sm:$0xff] }
  0xc2   :  { %1140 = vmatprep.subr.bf16.mxu0 %v5406_v20  ;;  %1181 = vmatprep.subr.bf16.mxu1 %v5408_v22  ;;  %v1349_v20 = vld [vmem:[#allocation12 + $0x1e0] sm:$0xff] }
  0xc3   :  { %v1473_v22 = vld [vmem:[#allocation12 + $0x5c0] sm:$0xff]  ;;  %v5465_v33 = vcombine.low %v1345_v19, %v1349_v20 }
  0xc4   :  { %v1429_v12 = vld [vmem:[#allocation12 + $0x460] sm:$0xff] }
  0xc5   :  { %1141 = vmatpush2.bf16.msra.mxu0 %v5405_v27  ;;  %1182 = vmatpush2.bf16.msra.mxu1 %v5407_v28  ;;  %v5466_v27 = vcombine.high %v1345_v19, %v1349_v20  ;;  %v5594_v28 = vcombine.high %v1473_v22, %v1477_v23  ;;  %v1293_v19 = vld [vmem:[#allocation12 + $0x20] sm:$0xff]  ;;  %v5545_v24 = vcombine.low %v1425_v11, %v1429_v12 }
  0xc6   :  { %1142 = vmatprep.subr.bf16.mxu0 %v5398_v29  ;;  %1183 = vmatprep.subr.bf16.mxu1 %v5400_v30  ;;  %v1337_v29 = vld [vmem:[#allocation12 + $0x180] sm:$0xff] }
  0xc7   :  { %v1341_v30 = vld [vmem:[#allocation12 + $0x1a0] sm:$0xff] }
  0xc8   :  { %v1417_v20 = vld [vmem:[#allocation12 + $0x400] sm:$0xff] }
  0xc9   :  { %1143 = vmatpush2.bf16.msra.mxu0 %v5397_v34  ;;  %1184 = vmatpush2.bf16.msra.mxu1 %v5399_v35  ;;  %v5593_v34 = vcombine.low %v1473_v22, %v1477_v23  ;;  %v5458_v35 = vcombine.high %v1337_v29, %v1341_v30  ;;  %v1421_v22 = vld [vmem:[#allocation12 + $0x420] sm:$0xff] }
  0xca   :  { %1144 = vmatprep.subr.bf16.mxu0 %v5390_v36  ;;  %1185 = vmatprep.subr.bf16.mxu1 %v5392_v37  ;;  %v5586_v36 = vcombine.high %v1465_v31, %v1469_v59  ;;  %v1329_v37 = vld [vmem:[#allocation12 + $0x140] sm:$0xff] }
  0xcd   :  { %1145 = vmatpush2.bf16.msra.mxu0 %v5389_v42  ;;  %1186 = vmatpush2.bf16.msra.mxu1 %v5391_v43  ;;  %v5457_v42 = vcombine.low %v1337_v29, %v1341_v30  ;;  %v5585_v43 = vcombine.low %v1465_v31, %v1469_v59  ;;  %v1537_v29 = vld [vmem:[#allocation12 + $0x7c0] sm:$0xff]  ;;  %v5537_v59 = vcombine.low %v1417_v20, %v1421_v22 }
  0xce   :  { %1146 = vmatprep.subr.bf16.mxu0 %v5382_v44  ;;  %1187 = vmatprep.subr.bf16.mxu1 %v5384_v45  ;;  %v5450_v44 = vcombine.high %v1329_v37, %v1333_v38  ;;  %v5578_v45 = vcombine.high %v1457_v39, %v1461_v40  ;;  %v1541_v30 = vld [vmem:[#allocation12 + $0x7e0] sm:$0xff] }
  0xd1   :  { %1147 = vmatpush2.bf16.msra.mxu0 %v5381_v3  ;;  %1188 = vmatpush2.bf16.msra.mxu1 %v5383_v51  ;;  %v5449_v3 = vcombine.low %v1329_v37, %v1333_v38  ;;  %v5442_v51 = vcombine.high %v1321_v47, %v1325_v48  ;;  %v1529_v37 = vld [vmem:[#allocation12 + $0x780] sm:$0xff] }
  0xd2   :  { %1148 = vmatprep.subr.bf16.mxu0 %v5374_v52  ;;  %1189 = vmatprep.subr.bf16.mxu1 %v5376_v53  ;;  %v5570_v52 = vcombine.high %v1449_v49, %v1453_v50  ;;  %v1313_v53 = vld [vmem:[#allocation12 + $0xc0] sm:$0xff] }
  0xd3   :  { %v5433_v4 = vcombine.low %v1313_v53, %v1317_v54  ;;  %v1533_v38 = vld [vmem:[#allocation12 + $0x7a0] sm:$0xff] }
  0xd4   :  { %v1521_v47 = vld [vmem:[#allocation12 + $0x740] sm:$0xff] }
  0xd5   :  { %1149 = vmatpush2.bf16.msra.mxu0 %v5373_v60  ;;  %1190 = vmatpush2.bf16.msra.mxu1 %v5375_v61  ;;  %v5569_v60 = vcombine.low %v1449_v49, %v1453_v50  ;;  %v5434_v61 = vcombine.high %v1313_v53, %v1317_v54  ;;  %v1525_v48 = vld [vmem:[#allocation12 + $0x760] sm:$0xff]  ;;  %v5649_v50 = vcombine.low %v1529_v37, %v1533_v38 }
  0xd6   :  { %1150 = vmatprep.subr.bf16.mxu0 %v5366_v62  ;;  %1191 = vmatprep.subr.bf16.mxu1 %v5368_v63  ;;  %v5562_v62 = vcombine.high %v1441_v55, %v1445_v57  ;;  %v1305_v63 = vld [vmem:[#allocation12 + $0x80] sm:$0xff] }
  0xd7   :  { %v5425_v13 = vcombine.low %v1305_v63, %v1309_v0  ;;  %v1513_v53 = vld [vmem:[#allocation12 + $0x700] sm:$0xff] }
  0xd8   :  { %v1517_v54 = vld [vmem:[#allocation12 + $0x720] sm:$0xff] }
  0xd9   :  { %1151 = vmatpush2.bf16.msra.mxu0 %v5365_v5  ;;  %1192 = vmatpush2.bf16.msra.mxu1 %v5367_v7  ;;  %v5561_v5 = vcombine.low %v1441_v55, %v1445_v57  ;;  %v5426_v7 = vcombine.high %v1305_v63, %v1309_v0  ;;  %v5641_v57 = vcombine.low %v1521_v47, %v1525_v48  ;;  %v1505_v63 = vld [vmem:[#allocation12 + $0x6c0] sm:$0xff] }
  0xda   :  { %1152 = vmatprep.subr.bf16.mxu0 %v5358_v8  ;;  %1193 = vmatprep.subr.bf16.mxu1 %v5360_v9  ;;  %v5554_v8 = vcombine.high %v1433_v1, %v1437_v2  ;;  %v1297_v9 = vld [vmem:[#allocation12 + $0x40] sm:$0xff] }
  0xdb   :  { %v5417_v23 = vcombine.low %v1297_v9, %v1301_v10  ;;  %v1509_v0 = vld [vmem:[#allocation12 + $0x6e0] sm:$0xff] }
  0xdd   :  { %1153 = vmatpush2.bf16.msra.mxu0 %v5357_v15  ;;  %1194 = vmatpush2.bf16.msra.mxu1 %v5359_v16  ;;  %v5553_v15 = vcombine.low %v1433_v1, %v1437_v2  ;;  %v5418_v16 = vcombine.high %v1297_v9, %v1301_v10  ;;  %v5633_v2 = vcombine.low %v1513_v53, %v1517_v54  ;;  %v1497_v9 = vld [vmem:[#allocation12 + $0x680] sm:$0xff] }
  0xde   :  { %1154 = vmatprep.subr.bf16.mxu0 %v5350_v17  ;;  %1195 = vmatprep.subr.bf16.mxu1 %v5352_v18  ;;  %v5546_v17 = vcombine.high %v1425_v11, %v1429_v12  ;;  %v1289_v18 = vld [vmem:[#allocation12] sm:$0xff]  ;;  %v5625_v12 = vcombine.low %v1505_v63, %v1509_v0 }
  0xdf   :  { %v5409_v31 = vcombine.low %v1289_v18, %v1293_v19  ;;  %v1501_v10 = vld [vmem:[#allocation12 + $0x6a0] sm:$0xff] }
  0xe1   :  { %1155 = vmatpush2.bf16.msra.mxu0 %v5349_v25  ;;  %1196 = vmatpush2.bf16.msra.mxu1 %v5351_v26  ;;  %v5410_v25 = vcombine.high %v1289_v18, %v1293_v19  ;;  %v5538_v26 = vcombine.high %v1417_v20, %v1421_v22  ;;  %v1489_v18 = vld [vmem:[#allocation12 + $0x640] sm:$0xff]  ;;  %v1802_v20 = vcombine.high %v6212_v6, %v6212_v6 }
  0xe2   :  { %4419 = vmatprep.subr.bf16.mxu0 %v5466_v27  ;;  %4460 = vmatprep.subr.bf16.mxu1 %v5594_v28  ;;  %v1409_v27 = vld [vmem:[#allocation12 + $0x3c0] sm:$0xff] }
  0xe3   :  { %v1413_v28 = vld [vmem:[#allocation12 + $0x3e0] sm:$0xff] }
  0xe4   :  { %1157 = vmatmul.mubr.bf16.vlgmr.msra.gmra.mxu0 %v6206_v21  ;;  %1198 = vmatmul.mubr.bf16.vlgmr.msra.gmra.mxu1 %v6206_v21  ;;  %v5577_v21 = vcombine.low %v1457_v39, %v1461_v40  ;;  %v5529_v39 = vcombine.low %v1409_v27, %v1413_v28  ;;  %v5657_v40 = vcombine.low %v1537_v29, %v1541_v30  ;;  %v1493_v19 = vld [vmem:[#allocation12 + $0x660] sm:$0xff] }
  0xe5   :  { %4420 = vmatpush1.bf16.msra.mxu0 %v5465_v33  ;;  %4461 = vmatpush1.bf16.msra.mxu1 %v5593_v34  ;;  %v5530_v33 = vcombine.high %v1409_v27, %v1413_v28  ;;  %v5658_v34 = vcombine.high %v1537_v29, %v1541_v30  ;;  %v1357_v27 = vld [vmem:[#allocation12 + $0x220] sm:$0xff]  ;;  %v6234_v30 = vrot.slane %v1802_v20, %v6193_v56 }
  0xe6   :  { %4421 = vmatprep.subr.bf16.mxu0 %v5458_v35  ;;  %4462 = vmatprep.subr.bf16.mxu1 %v5586_v36  ;;  %v1401_v35 = vld [vmem:[#allocation12 + $0x380] sm:$0xff]  ;;  %v5609_v6 = vcombine.low %v1489_v18, %v1493_v19 }
  0xe7   :  { %4451 = vmatprep.mubr.bf16.mxu0 %v6221_v32  ;;  %4492 = vmatprep.mubr.bf16.mxu1 %v6226_v41  ;;  %v1405_v36 = vld [vmem:[#allocation12 + $0x3a0] sm:$0xff] }
  0xe8   :  { %v5521_v49 = vcombine.low %v1401_v35, %v1405_v36  ;;  %v1481_v28 = vld [vmem:[#allocation12 + $0x600] sm:$0xff] }
  0xe9   :  { %4422 = vmatpush1.bf16.msra.mxu0 %v5457_v42  ;;  %4463 = vmatpush1.bf16.msra.mxu1 %v5585_v43  ;;  %v5522_v42 = vcombine.high %v1401_v35, %v1405_v36  ;;  %v5650_v43 = vcombine.high %v1529_v37, %v1533_v38  ;;  %v1485_v29 = vld [vmem:[#allocation12 + $0x620] sm:$0xff]  ;;  %v1818_v38 = vcombine.high %v6234_v30, %v6234_v30 }
  0xea   :  { %4423 = vmatprep.subr.bf16.mxu0 %v5450_v44  ;;  %4464 = vmatprep.subr.bf16.mxu1 %v5578_v45  ;;  %v1393_v44 = vld [vmem:[#allocation12 + $0x340] sm:$0xff] }
  0xeb   :  { %v1397_v45 = vld [vmem:[#allocation12 + $0x360] sm:$0xff] }
  0xec   :  { %v5513_v55 = vcombine.low %v1393_v44, %v1397_v45  ;;  %v1605_v35 = vld [vmem:[#allocation12 + $0x9e0] sm:$0xff] }
  0xed   :  { %4424 = vmatpush1.bf16.msra.mxu0 %v5449_v3  ;;  %4465 = vmatpush1.bf16.msra.mxu1 %v5577_v21  ;;  %v5514_v3 = vcombine.high %v1393_v44, %v1397_v45  ;;  %v5642_v21 = vcombine.high %v1521_v47, %v1525_v48  ;;  %v1729_v36 = vld [vmem:[#allocation12 + $0xdc0] sm:$0xff] }
  0xee   :  { %4425 = vmatprep.subr.bf16.mxu0 %v5442_v51  ;;  %4466 = vmatprep.subr.bf16.mxu1 %v5570_v52  ;;  %v1385_v51 = vld [vmem:[#allocation12 + $0x300] sm:$0xff] }
  0xef   :  { %v1389_v52 = vld [vmem:[#allocation12 + $0x320] sm:$0xff] }
  0xf0   :  { %v5505_v1 = vcombine.low %v1385_v51, %v1389_v52  ;;  %v1733_v37 = vld [vmem:[#allocation12 + $0xde0] sm:$0xff] }
  0xf1   :  { %4426 = vmatpush1.bf16.msra.mxu0 %v5441_v58  ;;  %4467 = vmatpush1.bf16.msra.mxu1 %v5569_v60  ;;  %v5506_v58 = vcombine.high %v1385_v51, %v1389_v52  ;;  %v5634_v60 = vcombine.high %v1513_v53, %v1517_v54  ;;  %v5850_v44 = vcombine.high %v1729_v36, %v1733_v37  ;;  %v1593_v45 = vld [vmem:[#allocation12 + $0x980] sm:$0xff] }
  0xf2   :  { %4427 = vmatprep.subr.bf16.mxu0 %v5434_v61  ;;  %4468 = vmatprep.subr.bf16.mxu1 %v5562_v62  ;;  %v1377_v61 = vld [vmem:[#allocation12 + $0x2c0] sm:$0xff] }
  0xf3   :  { %v1381_v62 = vld [vmem:[#allocation12 + $0x2e0] sm:$0xff] }
  0xf4   :  { %v5497_v11 = vcombine.low %v1377_v61, %v1381_v62  ;;  %v1597_v47 = vld [vmem:[#allocation12 + $0x9a0] sm:$0xff] }
  0xf5   :  { %4428 = vmatpush1.bf16.msra.mxu0 %v5433_v4  ;;  %4469 = vmatpush1.bf16.msra.mxu1 %v5561_v5  ;;  %v5498_v4 = vcombine.high %v1377_v61, %v1381_v62  ;;  %v5626_v5 = vcombine.high %v1505_v63, %v1509_v0  ;;  %v1721_v48 = vld [vmem:[#allocation12 + $0xd80] sm:$0xff]  ;;  %v5714_v51 = vcombine.high %v1593_v45, %v1597_v47 }
  0xf6   :  { %4429 = vmatprep.subr.bf16.mxu0 %v5426_v7  ;;  %4470 = vmatprep.subr.bf16.mxu1 %v5554_v8  ;;  %v1369_v7 = vld [vmem:[#allocation12 + $0x280] sm:$0xff] }
  0xf7   :  { %v1373_v8 = vld [vmem:[#allocation12 + $0x2a0] sm:$0xff] }
  0xf8   :  { %v5489_v22 = vcombine.low %v1369_v7, %v1373_v8  ;;  %v1585_v53 = vld [vmem:[#allocation12 + $0x940] sm:$0xff] }
  0xf9   :  { %4430 = vmatpush1.bf16.msra.mxu0 %v5425_v13  ;;  %4471 = vmatpush1.bf16.msra.mxu1 %v5553_v15  ;;  %v5490_v13 = vcombine.high %v1369_v7, %v1373_v8  ;;  %v5618_v15 = vcombine.high %v1497_v9, %v1501_v10  ;;  %v1589_v54 = vld [vmem:[#allocation12 + $0x960] sm:$0xff] }
  0xfa   :  { %4431 = vmatprep.subr.bf16.mxu0 %v5418_v16  ;;  %4472 = vmatprep.subr.bf16.mxu1 %v5546_v17  ;;  %v1361_v16 = vld [vmem:[#allocation12 + $0x240] sm:$0xff]  ;;  %v5706_v62 = vcombine.high %v1585_v53, %v1589_v54 }
  0xfb   :  { %v1365_v17 = vld [vmem:[#allocation12 + $0x260] sm:$0xff] }
  0xfc   :  { %v1577_v0 = vld [vmem:[#allocation12 + $0x900] sm:$0xff] }
  0xfd   :  { %4432 = vmatpush1.bf16.msra.mxu0 %v5417_v23  ;;  %4473 = vmatpush1.bf16.msra.mxu1 %v5545_v24  ;;  %v5617_v23 = vcombine.low %v1497_v9, %v1501_v10  ;;  %v5482_v24 = vcombine.high %v1361_v16, %v1365_v17  ;;  %v1569_v10 = vld [vmem:[#allocation12 + $0x8c0] sm:$0xff] }
  0xfe   :  { %4433 = vmatprep.subr.bf16.mxu0 %v5410_v25  ;;  %4474 = vmatprep.subr.bf16.mxu1 %v5538_v26  ;;  %v5610_v25 = vcombine.high %v1489_v18, %v1493_v19  ;;  %v1353_v26 = vld [vmem:[#allocation12 + $0x200] sm:$0xff] }
  0xff   :  { %v1561_v19 = vld [vmem:[#allocation12 + $0x880] sm:$0xff] }
 0x100   :  { %v1565_v20 = vld [vmem:[#allocation12 + $0x8a0] sm:$0xff] }
 0x101   :  { %4434 = vmatpush1.bf16.msra.mxu0 %v5409_v31  ;;  %4475 = vmatpush1.bf16.msra.mxu1 %v5537_v59  ;;  %v5481_v31 = vcombine.low %v1361_v16, %v1365_v17  ;;  %v5474_v59 = vcombine.high %v1353_v26, %v1357_v27 }
 0x102   :  { %4435 = vmatprep.subr.bf16.mxu0 %v5530_v33  ;;  %4476 = vmatprep.subr.bf16.mxu1 %v5658_v34  ;;  %v5602_v33 = vcombine.high %v1481_v28, %v1485_v29  ;;  %v1601_v34 = vld [vmem:[#allocation12 + $0x9c0] sm:$0xff] }
 0x105   :  { %4436 = vmatpush2.bf16.msra.mxu0 %v5529_v39  ;;  %4477 = vmatpush2.bf16.msra.mxu1 %v5657_v40  ;;  %v5473_v39 = vcombine.low %v1353_v26, %v1357_v27  ;;  %v6240_v40 = vrot.slane %v6216_v14, %v6193_v56  ;;  %v5721_v14 = vcombine.low %v1601_v34, %v1605_v35 }
 0x106   :  { %4437 = vmatprep.subr.bf16.mxu0 %v5522_v42  ;;  %4478 = vmatprep.subr.bf16.mxu1 %v5650_v43  ;;  %v5601_v42 = vcombine.low %v1481_v28, %v1485_v29  ;;  %v5722_v43 = vcombine.high %v1601_v34, %v1605_v35  ;;  %v5682_v26 = vcombine.high %v1561_v19, %v1565_v20  ;;  %v1553_v28 = vld [vmem:[#allocation12 + $0x840] sm:$0xff] }
 0x107   :  { %v1557_v29 = vld [vmem:[#allocation12 + $0x860] sm:$0xff] }
 0x108   :  { %v5674_v34 = vcombine.high %v1553_v28, %v1557_v29 }
 0x109   :  { %4438 = vmatpush2.bf16.msra.mxu0 %v5521_v49  ;;  %4479 = vmatpush2.bf16.msra.mxu1 %v5649_v50  ;;  %v1725_v49 = vld [vmem:[#allocation12 + $0xda0] sm:$0xff]  ;;  %v6243_v50 = vrot.slane %v1818_v38, %v6193_v56 }
 0x10a   :  { %4439 = vmatprep.subr.bf16.mxu0 %v5514_v3  ;;  %4480 = vmatprep.subr.bf16.mxu1 %v5642_v21  ;;  %v6247_v3 = vcombine.high %v6240_v40, %v6240_v40  ;;  %v5849_v21 = vcombine.low %v1729_v36, %v1733_v37  ;;  %v5842_v52 = vcombine.high %v1721_v48, %v1725_v49  ;;  %v1545_v36 = vld [vmem:[#allocation12 + $0x800] sm:$0xff] }
 0x10b   :  { %v5841_v61 = vcombine.low %v1721_v48, %v1725_v49  ;;  %v1549_v37 = vld [vmem:[#allocation12 + $0x820] sm:$0xff] }
 0x10c   :  { %v1673_v38 = vld [vmem:[#allocation12 + $0xc00] sm:$0xff] }
 0x10d   :  { %4440 = vmatpush2.bf16.msra.mxu0 %v5513_v55  ;;  %4481 = vmatpush2.bf16.msra.mxu1 %v5641_v57  ;;  %v1713_v55 = vld [vmem:[#allocation12 + $0xd40] sm:$0xff] }
 0x10e   :  { %4441 = vmatprep.subr.bf16.mxu0 %v5506_v58  ;;  %4482 = vmatprep.subr.bf16.mxu1 %v5634_v60  ;;  %v1717_v57 = vld [vmem:[#allocation12 + $0xd60] sm:$0xff]  ;;  %v6252_v58 = vcombine.high %v6243_v50, %v6243_v50  ;;  %v5713_v60 = vcombine.low %v1593_v45, %v1597_v47 }
 0x10f   :  { %v5834_v63 = vcombine.high %v1713_v55, %v1717_v57  ;;  %v5833_v7 = vcombine.low %v1713_v55, %v1717_v57  ;;  %v1665_v47 = vld [vmem:[#allocation12 + $0xbc0] sm:$0xff] }
 0x110   :  { %v1669_v48 = vld [vmem:[#allocation12 + $0xbe0] sm:$0xff] }
 0x111   :  { %4442 = vmatpush2.bf16.msra.mxu0 %v5505_v1  ;;  %4483 = vmatpush2.bf16.msra.mxu1 %v5633_v2  ;;  %v1581_v1 = vld [vmem:[#allocation12 + $0x920] sm:$0xff] }
 0x112   :  { %4443 = vmatprep.subr.bf16.mxu0 %v5498_v4  ;;  %4484 = vmatprep.subr.bf16.mxu1 %v5626_v5  ;;  %v1705_v2 = vld [vmem:[#allocation12 + $0xd00] sm:$0xff]  ;;  %v5705_v5 = vcombine.low %v1585_v53, %v1589_v54  ;;  %v5698_v8 = vcombine.high %v1577_v0, %v1581_v1 }
 0x113   :  { %v1709_v4 = vld [vmem:[#allocation12 + $0xd20] sm:$0xff] }
 0x114   :  { %v5826_v9 = vcombine.high %v1705_v2, %v1709_v4  ;;  %v5825_v16 = vcombine.low %v1705_v2, %v1709_v4  ;;  %v1793_v49 = vld [vmem:[#allocation12 + $0xfc0] sm:$0xff] }
 0x115   :  { %4444 = vmatpush2.bf16.msra.mxu0 %v5497_v11  ;;  %4485 = vmatpush2.bf16.msra.mxu1 %v5625_v12  ;;  %v1573_v11 = vld [vmem:[#allocation12 + $0x8e0] sm:$0xff] }
 0x116   :  { %4445 = vmatprep.subr.bf16.mxu0 %v5490_v13  ;;  %4486 = vmatprep.subr.bf16.mxu1 %v5618_v15  ;;  %v1697_v12 = vld [vmem:[#allocation12 + $0xcc0] sm:$0xff]  ;;  %v5697_v15 = vcombine.low %v1577_v0, %v1581_v1  ;;  %v5690_v17 = vcombine.high %v1569_v10, %v1573_v11 }
 0x117   :  { %v1701_v13 = vld [vmem:[#allocation12 + $0xce0] sm:$0xff] }
 0x118   :  { %v5818_v18 = vcombine.high %v1697_v12, %v1701_v13  ;;  %v1657_v54 = vld [vmem:[#allocation12 + $0xb80] sm:$0xff] }
 0x119   :  { %4446 = vmatpush2.bf16.msra.mxu0 %v5489_v22  ;;  %4487 = vmatpush2.bf16.msra.mxu1 %v5617_v23  ;;  %v1689_v22 = vld [vmem:[#allocation12 + $0xc80] sm:$0xff] }
 0x11a   :  { %4447 = vmatprep.subr.bf16.mxu0 %v5482_v24  ;;  %4488 = vmatprep.subr.bf16.mxu1 %v5610_v25  ;;  %v1693_v23 = vld [vmem:[#allocation12 + $0xca0] sm:$0xff]  ;;  %v5689_v24 = vcombine.low %v1569_v10, %v1573_v11  ;;  %v5817_v25 = vcombine.low %v1697_v12, %v1701_v13 }
 0x11b   :  { %v5810_v27 = vcombine.high %v1689_v22, %v1693_v23  ;;  %v1661_v55 = vld [vmem:[#allocation12 + $0xba0] sm:$0xff] }
 0x11c   :  { %v1785_v57 = vld [vmem:[#allocation12 + $0xf80] sm:$0xff] }
 0x11d   :  { %4448 = vmatpush2.bf16.msra.mxu0 %v5481_v31  ;;  %4489 = vmatpush2.bf16.msra.mxu1 %v5609_v6  ;;  %v1681_v31 = vld [vmem:[#allocation12 + $0xc40] sm:$0xff] }
 0x11e   :  { %4449 = vmatprep.subr.bf16.mxu0 %v5474_v59  ;;  %4490 = vmatprep.subr.bf16.mxu1 %v5602_v33  ;;  %v1685_v6 = vld [vmem:[#allocation12 + $0xc60] sm:$0xff]  ;;  %v5681_v59 = vcombine.low %v1561_v19, %v1565_v20  ;;  %v5809_v33 = vcombine.low %v1689_v22, %v1693_v23 }
 0x11f   :  { %v5802_v35 = vcombine.high %v1681_v31, %v1685_v6  ;;  %v1649_v1 = vld [vmem:[#allocation12 + $0xb40] sm:$0xff] }
 0x120   :  { %v1653_v2 = vld [vmem:[#allocation12 + $0xb60] sm:$0xff] }
 0x121   :  { %4450 = vmatpush2.bf16.msra.mxu0 %v5473_v39  ;;  %4491 = vmatpush2.bf16.msra.mxu1 %v5601_v42  ;;  %v1677_v39 = vld [vmem:[#allocation12 + $0xc20] sm:$0xff]  ;;  %v5673_v42 = vcombine.low %v1553_v28, %v1557_v29 }
 0x122   :  { %4501 = vmatprep.subr.bf16.mxu0 %v5722_v43  ;;  %4542 = vmatprep.subr.bf16.mxu1 %v5850_v44  ;;  %v5801_v43 = vcombine.low %v1681_v31, %v1685_v6  ;;  %v5666_v44 = vcombine.high %v1545_v36, %v1549_v37  ;;  %v5794_v45 = vcombine.high %v1673_v38, %v1677_v39  ;;  %v1777_v4 = vld [vmem:[#allocation12 + $0xf40] sm:$0xff] }
 0x123   :  { %v1641_v11 = vld [vmem:[#allocation12 + $0xb00] sm:$0xff] }
 0x124   :  { %4452 = vmatmul.mubr.bf16.vlgmr.msra.gmra.mxu0 %v6240_v40  ;;  %4493 = vmatmul.mubr.bf16.vlgmr.msra.gmra.mxu1 %v6247_v3  ;;  %v1645_v12 = vld [vmem:[#allocation12 + $0xb20] sm:$0xff] }
 0x125   :  { %4502 = vmatpush1.bf16.msra.mxu0 %v5721_v14  ;;  %4543 = vmatpush1.bf16.msra.mxu1 %v5849_v21  ;;  %v1797_v14 = vld [vmem:[#allocation12 + $0xfe0] sm:$0xff]  ;;  %v5665_v21 = vcombine.low %v1545_v36, %v1549_v37 }
 0x126   :  { %4503 = vmatprep.subr.bf16.mxu0 %v5714_v51  ;;  %4544 = vmatprep.subr.bf16.mxu1 %v5842_v52  ;;  %v5793_v51 = vcombine.low %v1673_v38, %v1677_v39  ;;  %v5786_v52 = vcombine.high %v1665_v47, %v1669_v48  ;;  %v5914_v53 = vcombine.high %v1793_v49, %v1797_v14  ;;  %v1769_v13 = vld [vmem:[#allocation12 + $0xf00] sm:$0xff] }
 0x127   :  { %4533 = vmatprep.mubr.bf16.mxu0 %v6243_v50  ;;  %4574 = vmatprep.mubr.bf16.mxu1 %v6252_v58  ;;  %v1633_v20 = vld [vmem:[#allocation12 + $0xac0] sm:$0xff] }
 0x128   :  { %v1637_v22 = vld [vmem:[#allocation12 + $0xae0] sm:$0xff] }
 0x129   :  { %4504 = vmatpush1.bf16.msra.mxu0 %v5713_v60  ;;  %4545 = vmatpush1.bf16.msra.mxu1 %v5841_v61  ;;  %v1789_v60 = vld [vmem:[#allocation12 + $0xfa0] sm:$0xff]  ;;  %v5785_v61 = vcombine.low %v1665_v47, %v1669_v48 }
 0x12a   :  { %4505 = vmatprep.subr.bf16.mxu0 %v5706_v62  ;;  %4546 = vmatprep.subr.bf16.mxu1 %v5834_v63  ;;  %v5913_v62 = vcombine.low %v1793_v49, %v1797_v14  ;;  %v5778_v63 = vcombine.high %v1657_v54, %v1661_v55  ;;  %v5906_v0 = vcombine.high %v1785_v57, %v1789_v60  ;;  %v1761_v23 = vld [vmem:[#allocation12 + $0xec0] sm:$0xff] }
 0x12b   :  { %v1625_v29 = vld [vmem:[#allocation12 + $0xa80] sm:$0xff] }
 0x12c   :  { %v1629_v31 = vld [vmem:[#allocation12 + $0xaa0] sm:$0xff] }
 0x12d   :  { %4506 = vmatpush1.bf16.msra.mxu0 %v5705_v5  ;;  %4547 = vmatpush1.bf16.msra.mxu1 %v5833_v7  ;;  %v1781_v5 = vld [vmem:[#allocation12 + $0xf60] sm:$0xff]  ;;  %v5777_v7 = vcombine.low %v1657_v54, %v1661_v55  ;;  %v1346_v55 = vld [vmem:[#allocation12 + $0x1c8] sm:$0xff] }
 0x12e   :  { %4507 = vmatprep.subr.bf16.mxu0 %v5698_v8  ;;  %4548 = vmatprep.subr.bf16.mxu1 %v5826_v9  ;;  %v5905_v8 = vcombine.low %v1785_v57, %v1789_v60  ;;  %v5770_v9 = vcombine.high %v1649_v1, %v1653_v2  ;;  %v5898_v10 = vcombine.high %v1777_v4, %v1781_v5  ;;  %v1753_v6 = vld [vmem:[#allocation12 + $0xe80] sm:$0xff]  ;;  %v1350_v57 = vld [vmem:[#allocation12 + $0x1e8] sm:$0xff] }
 0x12f   :  { %v1617_v37 = vld [vmem:[#allocation12 + $0xa40] sm:$0xff]  ;;  %v1474_v60 = vld [vmem:[#allocation12 + $0x5c8] sm:$0xff] }
 0x130   :  { %v1621_v38 = vld [vmem:[#allocation12 + $0xa60] sm:$0xff] }
 0x131   :  { %4508 = vmatpush1.bf16.msra.mxu0 %v5697_v15  ;;  %4549 = vmatpush1.bf16.msra.mxu1 %v5825_v16  ;;  %v1773_v15 = vld [vmem:[#allocation12 + $0xf20] sm:$0xff]  ;;  %v5769_v16 = vcombine.low %v1649_v1, %v1653_v2  ;;  %v5468_v1 = vcombine.high %v1346_v55, %v1350_v57 }
 0x132   :  { %4509 = vmatprep.subr.bf16.mxu0 %v5690_v17  ;;  %4550 = vmatprep.subr.bf16.mxu1 %v5818_v18  ;;  %v5897_v17 = vcombine.low %v1777_v4, %v1781_v5  ;;  %v5762_v18 = vcombine.high %v1641_v11, %v1645_v12  ;;  %v5890_v19 = vcombine.high %v1769_v13, %v1773_v15  ;;  %v1745_v39 = vld [vmem:[#allocation12 + $0xe40] sm:$0xff]  ;;  %v1338_v4 = vld [vmem:[#allocation12 + $0x188] sm:$0xff] }
 0x133   :  { %v1609_v48 = vld [vmem:[#allocation12 + $0xa00] sm:$0xff]  ;;  %v1342_v5 = vld [vmem:[#allocation12 + $0x1a8] sm:$0xff] }
 0x134   :  { %v1613_v49 = vld [vmem:[#allocation12 + $0xa20] sm:$0xff] }
 0x135   :  { %4510 = vmatpush1.bf16.msra.mxu0 %v5689_v24  ;;  %4551 = vmatpush1.bf16.msra.mxu1 %v5817_v25  ;;  %v1765_v24 = vld [vmem:[#allocation12 + $0xee0] sm:$0xff]  ;;  %v5761_v25 = vcombine.low %v1641_v11, %v1645_v12  ;;  %v1330_v12 = vld [vmem:[#allocation12 + $0x148] sm:$0xff] }
 0x136   :  { %4511 = vmatprep.subr.bf16.mxu0 %v5682_v26  ;;  %4552 = vmatprep.subr.bf16.mxu1 %v5810_v27  ;;  %v5889_v26 = vcombine.low %v1769_v13, %v1773_v15  ;;  %v5754_v27 = vcombine.high %v1633_v20, %v1637_v22  ;;  %v5882_v28 = vcombine.high %v1761_v23, %v1765_v24  ;;  %v1737_v14 = vld [vmem:[#allocation12 + $0xe00] sm:$0xff]  ;;  %v1334_v13 = vld [vmem:[#allocation12 + $0x168] sm:$0xff] }
 0x139   :  { %4512 = vmatpush1.bf16.msra.mxu0 %v5681_v59  ;;  %4553 = vmatpush1.bf16.msra.mxu1 %v5809_v33  ;;  %v1757_v59 = vld [vmem:[#allocation12 + $0xea0] sm:$0xff]  ;;  %v5753_v33 = vcombine.low %v1633_v20, %v1637_v22 }
 0x13a   :  { %4513 = vmatprep.subr.bf16.mxu0 %v5674_v34  ;;  %4554 = vmatprep.subr.bf16.mxu1 %v5802_v35  ;;  %v5881_v34 = vcombine.low %v1761_v23, %v1765_v24  ;;  %v5746_v35 = vcombine.high %v1625_v29, %v1629_v31  ;;  %v5874_v36 = vcombine.high %v1753_v6, %v1757_v59 }
 0x13b   :  { %v5452_v23 = vcombine.high %v1330_v12, %v1334_v13 }
 0x13d   :  { %4514 = vmatpush1.bf16.msra.mxu0 %v5673_v42  ;;  %4555 = vmatpush1.bf16.msra.mxu1 %v5801_v43  ;;  %v1749_v42 = vld [vmem:[#allocation12 + $0xe60] sm:$0xff]  ;;  %v5745_v43 = vcombine.low %v1625_v29, %v1629_v31  ;;  %v1450_v29 = vld [vmem:[#allocation12 + $0x508] sm:$0xff] }
 0x13e   :  { %4515 = vmatprep.subr.bf16.mxu0 %v5666_v44  ;;  %4556 = vmatprep.subr.bf16.mxu1 %v5794_v45  ;;  %v5873_v44 = vcombine.low %v1753_v6, %v1757_v59  ;;  %v5738_v45 = vcombine.high %v1617_v37, %v1621_v38  ;;  %v5866_v47 = vcombine.high %v1745_v39, %v1749_v42  ;;  %v1454_v31 = vld [vmem:[#allocation12 + $0x528] sm:$0xff] }
 0x13f   :  { %v5451_v59 = vcombine.low %v1330_v12, %v1334_v13  ;;  %v1410_v13 = vld [vmem:[#allocation12 + $0x3c8] sm:$0xff] }
 0x141   :  { %4516 = vmatpush1.bf16.msra.mxu0 %v5665_v21  ;;  %4557 = vmatpush1.bf16.msra.mxu1 %v5793_v51  ;;  %v1741_v21 = vld [vmem:[#allocation12 + $0xe20] sm:$0xff]  ;;  %v5737_v51 = vcombine.low %v1617_v37, %v1621_v38  ;;  %v5572_v37 = vcombine.high %v1450_v29, %v1454_v31  ;;  %v1314_v38 = vld [vmem:[#allocation12 + $0xc8] sm:$0xff] }
 0x142   :  { %4517 = vmatprep.subr.bf16.mxu0 %v5786_v52  ;;  %4558 = vmatprep.subr.bf16.mxu1 %v5914_v53  ;;  %v5865_v52 = vcombine.low %v1745_v39, %v1749_v42  ;;  %v5730_v53 = vcombine.high %v1609_v48, %v1613_v49  ;;  %v5858_v54 = vcombine.high %v1737_v14, %v1741_v21  ;;  %v1318_v39 = vld [vmem:[#allocation12 + $0xe8] sm:$0xff] }
 0x143   :  { %v1442_v42 = vld [vmem:[#allocation12 + $0x4c8] sm:$0xff] }
 0x145   :  { %4518 = vmatpush2.bf16.msra.mxu0 %v5785_v61  ;;  %4559 = vmatpush2.bf16.msra.mxu1 %v5913_v62  ;;  %v1478_v61 = vld [vmem:[#allocation12 + $0x5e8] sm:$0xff]  ;;  %v5729_v62 = vcombine.low %v1609_v48, %v1613_v49 }
 0x146   :  { %4519 = vmatprep.subr.bf16.mxu0 %v5778_v63  ;;  %4560 = vmatprep.subr.bf16.mxu1 %v5906_v0  ;;  %v6259_v63 = vrot.slane %v6234_v30, %v6193_v56  ;;  %v5857_v0 = vcombine.low %v1737_v14, %v1741_v21  ;;  %v5596_v2 = vcombine.high %v1474_v60, %v1478_v61  ;;  %v1306_v49 = vld [vmem:[#allocation12 + $0x88] sm:$0xff] }
 0x147   :  { %v5595_v56 = vcombine.low %v1474_v60, %v1478_v61  ;;  %v5460_v30 = vcombine.high %v1338_v4, %v1342_v5  ;;  %v1310_v14 = vld [vmem:[#allocation12 + $0xa8] sm:$0xff] }
 0x148   :  { %v1434_v21 = vld [vmem:[#allocation12 + $0x488] sm:$0xff] }
 0x149   :  { %4520 = vmatpush2.bf16.msra.mxu0 %v5777_v7  ;;  %4561 = vmatpush2.bf16.msra.mxu1 %v5905_v8  ;;  %v1466_v7 = vld [vmem:[#allocation12 + $0x588] sm:$0xff] }
 0x14a   :  { %4521 = vmatprep.subr.bf16.mxu0 %v5770_v9  ;;  %4562 = vmatprep.subr.bf16.mxu1 %v5898_v10  ;;  %v1470_v8 = vld [vmem:[#allocation12 + $0x5a8] sm:$0xff]  ;;  %v6263_v9 = vcombine.high %v6259_v63, %v6259_v63  ;;  %v5467_v10 = vcombine.low %v1346_v55, %v1350_v57 }
 0x14b   :  { %v5588_v11 = vcombine.high %v1466_v7, %v1470_v8  ;;  %v5587_v22 = vcombine.low %v1466_v7, %v1470_v8  ;;  %v1298_v57 = vld [vmem:[#allocation12 + $0x48] sm:$0xff] }
 0x14c   :  { %v1302_v60 = vld [vmem:[#allocation12 + $0x68] sm:$0xff] }
 0x14d   :  { %4522 = vmatpush2.bf16.msra.mxu0 %v5769_v16  ;;  %4563 = vmatpush2.bf16.msra.mxu1 %v5897_v17  ;;  %v1458_v16 = vld [vmem:[#allocation12 + $0x548] sm:$0xff] }
 0x14e   :  { %4523 = vmatprep.subr.bf16.mxu0 %v5762_v18  ;;  %4564 = vmatprep.subr.bf16.mxu1 %v5890_v19  ;;  %v1462_v17 = vld [vmem:[#allocation12 + $0x568] sm:$0xff]  ;;  %v5459_v19 = vcombine.low %v1338_v4, %v1342_v5 }
 0x14f   :  { %v1426_v61 = vld [vmem:[#allocation12 + $0x448] sm:$0xff] }
 0x150   :  { %v1290_v5 = vld [vmem:[#allocation12 + $0x8] sm:$0xff] }
 0x151   :  { %4524 = vmatpush2.bf16.msra.mxu0 %v5761_v25  ;;  %4565 = vmatpush2.bf16.msra.mxu1 %v5889_v26  ;;  %v5580_v25 = vcombine.high %v1458_v16, %v1462_v17  ;;  %v1322_v26 = vld [vmem:[#allocation12 + $0x108] sm:$0xff] }
 0x152   :  { %4525 = vmatprep.subr.bf16.mxu0 %v5754_v27  ;;  %4566 = vmatprep.subr.bf16.mxu1 %v5882_v28  ;;  %v1326_v27 = vld [vmem:[#allocation12 + $0x128] sm:$0xff] }
 0x153   :  { %v1294_v7 = vld [vmem:[#allocation12 + $0x28] sm:$0xff] }
 0x154   :  { %v1418_v8 = vld [vmem:[#allocation12 + $0x408] sm:$0xff] }
 0x155   :  { %4526 = vmatpush2.bf16.msra.mxu0 %v5753_v33  ;;  %4567 = vmatpush2.bf16.msra.mxu1 %v5881_v34  ;;  %v5579_v34 = vcombine.low %v1458_v16, %v1462_v17  ;;  %v1414_v16 = vld [vmem:[#allocation12 + $0x3e8] sm:$0xff] }
 0x156   :  { %4527 = vmatprep.subr.bf16.mxu0 %v5746_v35  ;;  %4568 = vmatprep.subr.bf16.mxu1 %v5874_v36  ;;  %v5444_v35 = vcombine.high %v1322_v26, %v1326_v27  ;;  %v1538_v17 = vld [vmem:[#allocation12 + $0x7c8] sm:$0xff] }
 0x159   :  { %4528 = vmatpush2.bf16.msra.mxu0 %v5745_v43  ;;  %4569 = vmatpush2.bf16.msra.mxu1 %v5873_v44  ;;  %v1446_v43 = vld [vmem:[#allocation12 + $0x4e8] sm:$0xff]  ;;  %v5443_v44 = vcombine.low %v1322_v26, %v1326_v27 }
 0x15a   :  { %4529 = vmatprep.subr.bf16.mxu0 %v5738_v45  ;;  %4570 = vmatprep.subr.bf16.mxu1 %v5866_v47  ;;  %v5571_v45 = vcombine.low %v1450_v29, %v1454_v31  ;;  %v5436_v47 = vcombine.high %v1314_v38, %v1318_v39  ;;  %v5564_v48 = vcombine.high %v1442_v42, %v1446_v43  ;;  %v1402_v27 = vld [vmem:[#allocation12 + $0x388] sm:$0xff] }
 0x15b   :  { %v1530_v29 = vld [vmem:[#allocation12 + $0x788] sm:$0xff] }
 0x15c   :  { %v1534_v31 = vld [vmem:[#allocation12 + $0x7a8] sm:$0xff] }
 0x15d   :  { %4530 = vmatpush2.bf16.msra.mxu0 %v5737_v51  ;;  %4571 = vmatpush2.bf16.msra.mxu1 %v5865_v52  ;;  %v1438_v51 = vld [vmem:[#allocation12 + $0x4a8] sm:$0xff]  ;;  %v5435_v52 = vcombine.low %v1314_v38, %v1318_v39 }
 0x15e   :  { %4531 = vmatprep.subr.bf16.mxu0 %v5730_v53  ;;  %4572 = vmatprep.subr.bf16.mxu1 %v5858_v54  ;;  %v5563_v53 = vcombine.low %v1442_v42, %v1446_v43  ;;  %v5428_v54 = vcombine.high %v1306_v49, %v1310_v14  ;;  %v5556_v55 = vcombine.high %v1434_v21, %v1438_v51  ;;  %v1526_v38 = vld [vmem:[#allocation12 + $0x768] sm:$0xff] }
 0x15f   :  { %v5651_v42 = vcombine.low %v1530_v29, %v1534_v31 }
 0x161   :  { %4532 = vmatpush2.bf16.msra.mxu0 %v5729_v62  ;;  %4573 = vmatpush2.bf16.msra.mxu1 %v5857_v0  ;;  %v1430_v62 = vld [vmem:[#allocation12 + $0x468] sm:$0xff]  ;;  %v5427_v0 = vcombine.low %v1306_v49, %v1310_v14 }
 0x162   :  { %4583 = vmatprep.subr.bf16.mxu0 %v5468_v1  ;;  %4624 = vmatprep.subr.bf16.mxu1 %v5596_v2  ;;  %v5555_v1 = vcombine.low %v1434_v21, %v1438_v51  ;;  %v5420_v2 = vcombine.high %v1298_v57, %v1302_v60  ;;  %v5548_v4 = vcombine.high %v1426_v61, %v1430_v62  ;;  %v1518_v49 = vld [vmem:[#allocation12 + $0x728] sm:$0xff] }
 0x164   :  { %v6265_v15 = vpop.f32.mrf.mxu0  ;;  %4534 = vmatmul.mubr.bf16.vlgmr.msra.gmra.mxu0 %v6259_v63  ;;  %v6268_v18 = vpop.f32.mrf.mxu1  ;;  %4575 = vmatmul.mubr.bf16.vlgmr.msra.gmra.mxu1 %v6263_v9 }
 0x165   :  { %4584 = vmatpush1.bf16.msra.mxu0 %v5467_v10  ;;  %4625 = vmatpush1.bf16.msra.mxu1 %v5595_v56  ;;  %v1422_v10 = vld [vmem:[#allocation12 + $0x428] sm:$0xff]  ;;  %v5419_v56 = vcombine.low %v1298_v57, %v1302_v60  ;;  %v6283_v60 = vld [vmem:[#allocation10] sm:$0xff] }
 0x166   :  { %v6271_v20 = vpop.f32.mrf.mxu0  ;;  %4585 = vmatprep.subr.bf16.mxu0 %v5460_v30  ;;  %v6273_v24 = vpop.f32.mrf.mxu1  ;;  %4626 = vmatprep.subr.bf16.mxu1 %v5588_v11  ;;  %v5547_v30 = vcombine.low %v1426_v61, %v1430_v62  ;;  %v5412_v11 = vcombine.high %v1290_v5, %v1294_v7  ;;  %v5540_v12 = vcombine.high %v1418_v8, %v1422_v10  ;;  %v1382_v57 = vld [vmem:[#allocation12 + $0x2e8] sm:$0xff] }
 0x167   :  { %4615 = vmatprep.mubr.bf16.mxu0 %v6221_v32  ;;  %4656 = vmatprep.mubr.bf16.mxu1 %v6226_v41  ;;  %v1506_v61 = vld [vmem:[#allocation12 + $0x6c8] sm:$0xff] }
 0x168   :  { %v1080_v28 = vpop.f32.mrf.mxu0  ;;  %v1121_v6 = vpop.f32.mrf.mxu1  ;;  %v1510_v62 = vld [vmem:[#allocation12 + $0x6e8] sm:$0xff] }
 0x169   :  { %4586 = vmatpush1.bf16.msra.mxu0 %v5459_v19  ;;  %4627 = vmatpush1.bf16.msra.mxu1 %v5587_v22  ;;  %v1542_v19 = vld [vmem:[#allocation12 + $0x7e8] sm:$0xff]  ;;  %v5411_v22 = vcombine.low %v1290_v5, %v1294_v7  ;;  %v5531_v6 = vcombine.low %v1410_v13, %v1414_v16  ;;  %v6288_v5 = vsub.s32 2, %v6190_v46 }
 0x16a   :  { %v1081_v33 = vpop.f32.mrf.mxu0  ;;  %4587 = vmatprep.subr.bf16.mxu0 %v5452_v23  ;;  %v1122_v36 = vpop.f32.mrf.mxu1  ;;  %4628 = vmatprep.subr.bf16.mxu1 %v5580_v25  ;;  %v5539_v23 = vcombine.low %v1418_v8, %v1422_v10  ;;  %v5532_v25 = vcombine.high %v1410_v13, %v1414_v16  ;;  %v5660_v26 = vcombine.high %v1538_v17, %v1542_v19  ;;  %v1406_v28 = vld [vmem:[#allocation12 + $0x3a8] sm:$0xff] }
 0x16b   :  { %v5524_v33 = vcombine.high %v1402_v27, %v1406_v28  ;;  %v1398_v36 = vld [vmem:[#allocation12 + $0x368] sm:$0xff]  ;;  %v5523_v39 = vcombine.low %v1402_v27, %v1406_v28  ;;  %v5628_v8 = vcombine.high %v1506_v61, %v1510_v62  ;;  %v5627_v16 = vcombine.low %v1506_v61, %v1510_v62 }
 0x16c   :  { %v1370_v10 = vld [vmem:[#allocation12 + $0x288] sm:$0xff] }
 0x16d   :  { %4588 = vmatpush1.bf16.msra.mxu0 %v5451_v59  ;;  %4629 = vmatpush1.bf16.msra.mxu1 %v5579_v34  ;;  %v5659_v59 = vcombine.low %v1538_v17, %v1542_v19  ;;  %v5652_v34 = vcombine.high %v1530_v29, %v1534_v31  ;;  %v6292_v13 = vld [vmem:[#allocation15] sm:$0xff] }
 0x16e   :  { %4589 = vmatprep.subr.bf16.mxu0 %v5444_v35  ;;  %4630 = vmatprep.subr.bf16.mxu1 %v5572_v37  ;;  %v1394_v35 = vld [vmem:[#allocation12 + $0x348] sm:$0xff] }
 0x16f   :  { %v1522_v37 = vld [vmem:[#allocation12 + $0x748] sm:$0xff]  ;;  %v5516_v43 = vcombine.high %v1394_v35, %v1398_v36  ;;  %v5515_v14 = vcombine.low %v1394_v35, %v1398_v36 }
 0x170   :  { %v5643_v21 = vcombine.low %v1522_v37, %v1526_v38  ;;  %v1366_v27 = vld [vmem:[#allocation12 + $0x268] sm:$0xff] }
 0x171   :  { %4590 = vmatpush1.bf16.msra.mxu0 %v5443_v44  ;;  %4631 = vmatpush1.bf16.msra.mxu1 %v5571_v45  ;;  %v5644_v44 = vcombine.high %v1522_v37, %v1526_v38  ;;  %v1386_v45 = vld [vmem:[#allocation12 + $0x308] sm:$0xff] }
 0x172   :  { %4591 = vmatprep.subr.bf16.mxu0 %v5436_v47  ;;  %4632 = vmatprep.subr.bf16.mxu1 %v5564_v48  ;;  %v1390_v47 = vld [vmem:[#allocation12 + $0x328] sm:$0xff] }
 0x173   :  { %v1514_v48 = vld [vmem:[#allocation12 + $0x708] sm:$0xff]  ;;  %v5508_v51 = vcombine.high %v1386_v45, %v1390_v47 }
 0x174   :  { %v1490_v28 = vld [vmem:[#allocation12 + $0x648] sm:$0xff] }
 0x175   :  { %4592 = vmatpush1.bf16.msra.mxu0 %v5435_v52  ;;  %4633 = vmatpush1.bf16.msra.mxu1 %v5563_v53  ;;  %v6278_v52 = vsub.s32 0, %v6190_v46  ;;  %v6281_v53 = vsub.s32 1, %v6190_v46  ;;  %v1494_v29 = vld [vmem:[#allocation12 + $0x668] sm:$0xff] }
 0x176   :  { %4593 = vmatprep.subr.bf16.mxu0 %v5428_v54  ;;  %4634 = vmatprep.subr.bf16.mxu1 %v5556_v55  ;;  %v5636_v54 = vcombine.high %v1514_v48, %v1518_v49  ;;  %v1378_v55 = vld [vmem:[#allocation12 + $0x2c8] sm:$0xff]  ;;  %v5612_v37 = vcombine.high %v1490_v28, %v1494_v29 }
 0x177   :  { %v344_v7 = vrot.slane %v6283_v60, %v6281_v53  ;;  %v1219_v31 = vrot.slane %v6292_v13, %v6278_v52  ;;  %v1354_v38 = vld [vmem:[#allocation12 + $0x208] sm:$0xff] }
 0x178   :  { %v1734_v61 = vld [vmem:[#allocation12 + $0xde8] sm:$0xff] }
 0x179   :  { %4594 = vmatpush1.bf16.msra.mxu0 %v5427_v0  ;;  %4635 = vmatpush1.bf16.msra.mxu1 %v5555_v1  ;;  %v5507_v0 = vcombine.low %v1386_v45, %v1390_v47  ;;  %v5635_v1 = vcombine.low %v1514_v48, %v1518_v49  ;;  %v1227_v47 = vrot.slane %v6292_v13, %v6288_v5 }
 0x17a   :  { %4595 = vmatprep.subr.bf16.mxu0 %v5420_v2  ;;  %4636 = vmatprep.subr.bf16.mxu1 %v5548_v4  ;;  %v5500_v2 = vcombine.high %v1378_v55, %v1382_v57  ;;  %v340_v4 = vrot.slane %v6283_v60, %v6278_v52  ;;  %v5611_v48 = vcombine.low %v1490_v28, %v1494_v29 }
 0x17c   :  { %v1077_v19 = vadd.f32 %v6265_v15, %v340_v4  ;;  %v1223_v15 = vrot.slane %v6292_v13, %v6281_v53  ;;  %v6315_v4 = vsub.s32 6, %v6190_v46 }
 0x17d   :  { %4596 = vmatpush1.bf16.msra.mxu0 %v5419_v56  ;;  %4637 = vmatpush1.bf16.msra.mxu1 %v5547_v30  ;;  %v1374_v56 = vld [vmem:[#allocation12 + $0x2a8] sm:$0xff] }
 0x17e   :  { %4597 = vmatprep.subr.bf16.mxu0 %v5412_v11  ;;  %4638 = vmatprep.subr.bf16.mxu1 %v5540_v12  ;;  %v1498_v30 = vld [vmem:[#allocation12 + $0x688] sm:$0xff]  ;;  %v5499_v12 = vcombine.low %v1378_v55, %v1382_v57  ;;  %v5492_v17 = vcombine.high %v1370_v10, %v1374_v56  ;;  %v364_v29 = vrot.slane %v6283_v60, %v6315_v4 }
 0x17f   :  { %v1502_v11 = vld [vmem:[#allocation12 + $0x6a8] sm:$0xff] }
 0x180   :  { %v1606_v55 = vld [vmem:[#allocation12 + $0x9e8] sm:$0xff] }
 0x181   :  { %4598 = vmatpush1.bf16.msra.mxu0 %v5411_v22  ;;  %4639 = vmatpush1.bf16.msra.mxu1 %v5539_v23  ;;  %v348_v22 = vrot.slane %v6283_v60, %v6288_v5  ;;  %v1079_v23 = vadd.f32 %v6271_v20, %v344_v7  ;;  %v5619_v20 = vcombine.low %v1498_v30, %v1502_v11  ;;  %v1730_v57 = vld [vmem:[#allocation12 + $0xdc8] sm:$0xff] }
 0x182   :  { %4599 = vmatprep.subr.bf16.mxu0 %v5532_v25  ;;  %4640 = vmatprep.subr.bf16.mxu1 %v5660_v26  ;;  %v5620_v25 = vcombine.high %v1498_v30, %v1502_v11  ;;  %v1362_v26 = vld [vmem:[#allocation12 + $0x248] sm:$0xff] }
 0x183   :  { %v1118_v35 = vadd.f32 %v6268_v18, %v348_v22  ;;  %v1207_v36 = vmax.f32 %v1079_v23, 0.0  ;;  %v5483_v45 = vcombine.low %v1362_v26, %v1366_v27  ;;  %v1602_v18 = vld [vmem:[#allocation12 + $0x9c8] sm:$0xff] }
 0x184   :  { %v5724_v7 = vcombine.high %v1602_v18, %v1606_v55  ;;  %v6322_v11 = vld [vmem:[#allocation12 + $0x988] sm:$0xff] }
 0x185   :  { %4600 = vmatpush2.bf16.msra.mxu0 %v5531_v6  ;;  %4641 = vmatpush2.bf16.msra.mxu1 %v5659_v59  ;;  %v6301_v6 = vsub.s32 3, %v6190_v46  ;;  %v5491_v59 = vcombine.low %v1370_v10, %v1374_v56  ;;  %v6331_v22 = vld [vmem:[#allocation12 + $0xda8] sm:$0xff] }
 0x186   :  { %4601 = vmatprep.subr.bf16.mxu0 %v5524_v33  ;;  %4642 = vmatprep.subr.bf16.mxu1 %v5652_v34  ;;  %v5484_v33 = vcombine.high %v1362_v26, %v1366_v27  ;;  %v1206_v34 = vmax.f32 %v1077_v19, 0.0  ;;  %v6329_v19 = vld [vmem:[#allocation12 + $0xd88] sm:$0xff]  ;;  %v5723_v26 = vcombine.low %v1602_v18, %v1606_v55  ;;  %v5851_v27 = vcombine.low %v1730_v57, %v1734_v61 }
 0x189   :  { %4602 = vmatpush2.bf16.msra.mxu0 %v5523_v39  ;;  %4643 = vmatpush2.bf16.msra.mxu1 %v5651_v42  ;;  %v1358_v39 = vld [vmem:[#allocation12 + $0x228] sm:$0xff] }
 0x18a   :  { %4603 = vmatprep.subr.bf16.mxu0 %v5516_v43  ;;  %4644 = vmatprep.subr.bf16.mxu1 %v5644_v44  ;;  %v1482_v42 = vld [vmem:[#allocation12 + $0x608] sm:$0xff]  ;;  %v352_v44 = vrot.slane %v6283_v60, %v6301_v6  ;;  %v5476_v49 = vcombine.high %v1354_v38, %v1358_v39 }
 0x18b   :  { %v1486_v43 = vld [vmem:[#allocation12 + $0x628] sm:$0xff] }
 0x18c   :  { %v1120_v62 = vadd.f32 %v6273_v24, %v352_v44  ;;  %v6320_v24 = vsub.s32 5, %v6190_v46 }
 0x18d   :  { %4604 = vmatpush2.bf16.msra.mxu0 %v5515_v14  ;;  %4645 = vmatpush2.bf16.msra.mxu1 %v5643_v21  ;;  %v1256_v14 = vmul.f32 %v1219_v31, %v1206_v34  ;;  %v1208_v21 = vmax.f32 %v1118_v35, 0.0  ;;  %v1590_v34 = vld [vmem:[#allocation12 + $0x968] sm:$0xff] }
 0x18e   :  { %4605 = vmatprep.subr.bf16.mxu0 %v5508_v51  ;;  %4646 = vmatprep.subr.bf16.mxu1 %v5636_v54  ;;  %v1257_v51 = vmul.f32 %v1223_v15, %v1207_v36  ;;  %v5604_v54 = vcombine.high %v1482_v42, %v1486_v43  ;;  %v1209_v23 = vmax.f32 %v1120_v62, 0.0  ;;  %v360_v15 = vrot.slane %v6283_v60, %v6320_v24  ;;  %v1582_v62 = vld [vmem:[#allocation12 + $0x928] sm:$0xff] }
 0x18f   :  { %v1265_v10 = vsel %vm1264_vm0, %v1256_v14, 0.0  ;;  %v1258_v56 = vmul.f32 %v1227_v47, %v1208_v21 }
 0x190   :  { %v1266_v30 = vsel %vm1264_vm0, %v1257_v51, 0.0 }
 0x191   :  { %4606 = vmatpush2.bf16.msra.mxu0 %v5507_v0  ;;  %4647 = vmatpush2.bf16.msra.mxu1 %v5635_v1  ;;  %v5475_v0 = vcombine.low %v1354_v38, %v1358_v39  ;;  %v6312_v1 = vsub.s32 4, %v6190_v46  ;;  %v1267_v28 = vadd.f32 %v1266_v30, %v1265_v10  ;;  %v5843_v39 = vcombine.low %v6329_v19, %v6331_v22  ;;  %v1706_v10 = vld [vmem:[#allocation12 + $0xd08] sm:$0xff] }
 0x192   :  { %4607 = vmatprep.subr.bf16.mxu0 %v5500_v2  ;;  %4648 = vmatprep.subr.bf16.mxu1 %v5628_v8  ;;  %v5603_v2 = vcombine.low %v1482_v42, %v1486_v43  ;;  %v5852_v8 = vcombine.high %v1730_v57, %v1734_v61  ;;  %v1714_v42 = vld [vmem:[#allocation12 + $0xd48] sm:$0xff] }
 0x193   :  { %v1235_v36 = vrot.slane %v6292_v13, %v6312_v1  ;;  %v1718_v43 = vld [vmem:[#allocation12 + $0xd68] sm:$0xff] }
 0x194   :  { %v5836_v57 = vcombine.high %v1714_v42, %v1718_v43  ;;  %v1578_v61 = vld [vmem:[#allocation12 + $0x908] sm:$0xff] }
 0x195   :  { %4608 = vmatpush2.bf16.msra.mxu0 %v5499_v12  ;;  %4649 = vmatpush2.bf16.msra.mxu1 %v5627_v16  ;;  %v1598_v12 = vld [vmem:[#allocation12 + $0x9a8] sm:$0xff]  ;;  %v1231_v16 = vrot.slane %v6292_v13, %v6301_v6 }
 0x196   :  { %4609 = vmatprep.subr.bf16.mxu0 %v5492_v17  ;;  %4650 = vmatprep.subr.bf16.mxu1 %v5620_v25  ;;  %v6327_v17 = vsub.s32 7, %v6190_v46  ;;  %v356_v25 = vrot.slane %v6283_v60, %v6312_v1  ;;  %v5716_v31 = vcombine.high %v6322_v11, %v1598_v12  ;;  %v5715_v38 = vcombine.low %v6322_v11, %v1598_v12 }
 0x197   :  { %v1259_v44 = vmul.f32 %v1231_v16, %v1209_v23 }
 0x198   :  { %v1247_v30 = vrot.slane %v6292_v13, %v6327_v17 }
 0x199   :  { %4610 = vmatpush2.bf16.msra.mxu0 %v5491_v59  ;;  %4651 = vmatpush2.bf16.msra.mxu1 %v5619_v20  ;;  %v1268_v59 = vsel %vm1264_vm0, %v1258_v56, 0.0  ;;  %v5844_v20 = vcombine.high %v6329_v19, %v6331_v22  ;;  %v1710_v56 = vld [vmem:[#allocation12 + $0xd28] sm:$0xff]  ;;  %v1270_v11 = vsel %vm1264_vm0, %v1259_v44, 0.0  ;;  %v5835_v22 = vcombine.low %v1714_v42, %v1718_v43 }
 0x19a   :  { %4611 = vmatprep.subr.bf16.mxu0 %v5484_v33  ;;  %4652 = vmatprep.subr.bf16.mxu1 %v5612_v37  ;;  %v1586_v33 = vld [vmem:[#allocation12 + $0x948] sm:$0xff]  ;;  %v368_v37 = vrot.slane %v6283_v60, %v6327_v17  ;;  %v5827_v42 = vcombine.low %v1706_v10, %v1710_v56 }
 0x19b   :  { %v5708_v14 = vcombine.high %v1586_v33, %v1590_v34 }
 0x19d   :  { %4612 = vmatpush2.bf16.msra.mxu0 %v5483_v45  ;;  %4653 = vmatpush2.bf16.msra.mxu1 %v5611_v48  ;;  %v1243_v48 = vrot.slane %v6292_v13, %v6315_v4 }
 0x19e   :  { %4613 = vmatprep.subr.bf16.mxu0 %v5476_v49  ;;  %4654 = vmatprep.subr.bf16.mxu1 %v5604_v54  ;;  %v1269_v49 = vadd.f32 %v1268_v59, %v1267_v28  ;;  %v1239_v54 = vrot.slane %v6292_v13, %v6320_v24  ;;  %v5700_v28 = vcombine.high %v1578_v61, %v1582_v62 }
 0x19f   :  { %v5828_v59 = vcombine.high %v1706_v10, %v1710_v56 }
 0x1a0   :  { %v1271_v23 = vadd.f32 %v1270_v11, %v1269_v49  ;;  %v1550_v11 = vld [vmem:[#allocation12 + $0x828] sm:$0xff] }
 0x1a1   :  { %4614 = vmatpush2.bf16.msra.mxu0 %v5475_v0  ;;  %4655 = vmatpush2.bf16.msra.mxu1 %v5603_v2 }
 0x1a2   :  { %4665 = vmatprep.subr.bf16.mxu0 %v5724_v7  ;;  %4706 = vmatprep.subr.bf16.mxu1 %v5852_v8  ;;  %v5707_v8 = vcombine.low %v1586_v33, %v1590_v34  ;;  %v1698_v33 = vld [vmem:[#allocation12 + $0xcc8] sm:$0xff] }
 0x1a3   :  { %v1702_v34 = vld [vmem:[#allocation12 + $0xce8] sm:$0xff] }
 0x1a4   :  { %v1158_v35 = vpop.f32.mrf.mxu0  ;;  %4616 = vmatmul.mubr.bf16.vlgmr.msra.gmra.mxu0 %v6240_v40  ;;  %v1199_v47 = vpop.f32.mrf.mxu1  ;;  %4657 = vmatmul.mubr.bf16.vlgmr.msra.gmra.mxu1 %v6247_v3 }
 0x1a5   :  { %v1159_v45 = vadd.f32 %v1158_v35, %v356_v25  ;;  %4666 = vmatpush1.bf16.msra.mxu0 %v5723_v26  ;;  %v1200_v18 = vadd.f32 %v1199_v47, %v364_v29  ;;  %4707 = vmatpush1.bf16.msra.mxu1 %v5851_v27  ;;  %v1562_v47 = vld [vmem:[#allocation12 + $0x888] sm:$0xff] }
 0x1a6   :  { %v1160_v60 = vpop.f32.mrf.mxu0  ;;  %4667 = vmatprep.subr.bf16.mxu0 %v5716_v31  ;;  %v1201_v55 = vpop.f32.mrf.mxu1  ;;  %4708 = vmatprep.subr.bf16.mxu1 %v5844_v20  ;;  %v1574_v20 = vld [vmem:[#allocation12 + $0x8e8] sm:$0xff] }
 0x1a7   :  { %v1210_v21 = vmax.f32 %v1159_v45, 0.0  ;;  %v1161_v51 = vadd.f32 %v1160_v60, %v360_v15  ;;  %4697 = vmatprep.mubr.bf16.mxu0 %v6243_v50  ;;  %v1212_v0 = vmax.f32 %v1200_v18, 0.0  ;;  %v1202_v2 = vadd.f32 %v1201_v55, %v368_v37  ;;  %4738 = vmatprep.mubr.bf16.mxu1 %v6252_v58  ;;  %v1570_v15 = vld [vmem:[#allocation12 + $0x8c8] sm:$0xff] }
 0x1a8   :  { %v1162_v7 = vpop.f32.mrf.mxu0  ;;  %v1203_v19 = vpop.f32.mrf.mxu1  ;;  %v5692_v43 = vcombine.high %v1570_v15, %v1574_v20  ;;  %v5820_v45 = vcombine.high %v1698_v33, %v1702_v34  ;;  %v1690_v18 = vld [vmem:[#allocation12 + $0xc88] sm:$0xff] }
 0x1a9   :  { %v1260_v12 = vmul.f32 %v1235_v36, %v1210_v21  ;;  %v1211_v16 = vmax.f32 %v1161_v51, 0.0  ;;  %4668 = vmatpush1.bf16.msra.mxu0 %v5715_v38  ;;  %v1262_v25 = vmul.f32 %v1243_v48, %v1212_v0  ;;  %v1213_v26 = vmax.f32 %v1202_v2, 0.0  ;;  %4709 = vmatpush1.bf16.msra.mxu1 %v5843_v39  ;;  %v1566_v48 = vld [vmem:[#allocation12 + $0x8a8] sm:$0xff] }
 0x1aa   :  { %v1163_v27 = vpop.f32.mrf.mxu0  ;;  %4669 = vmatprep.subr.bf16.mxu0 %v5708_v14  ;;  %v1204_v13 = vpop.f32.mrf.mxu1  ;;  %4710 = vmatprep.subr.bf16.mxu1 %v5836_v57  ;;  %v5699_v36 = vcombine.low %v1578_v61, %v1582_v62  ;;  %v1694_v60 = vld [vmem:[#allocation12 + $0xca8] sm:$0xff]  ;;  %v5691_v14 = vcombine.low %v1570_v15, %v1574_v20  ;;  %v5819_v51 = vcombine.low %v1698_v33, %v1702_v34 }
 0x1ab   :  { %v1272_v29 = vsel %vm1264_vm0, %v1260_v12, 0.0  ;;  %v1261_v31 = vmul.f32 %v1239_v54, %v1211_v16  ;;  %v1263_v37 = vmul.f32 %v1247_v30, %v1213_v26  ;;  %v1276_v39 = vsel %vm1264_vm0, %v1262_v25, 0.0  ;;  %v1554_v61 = vld [vmem:[#allocation12 + $0x848] sm:$0xff] }
 0x1ac   :  { %v1273_v35 = vadd.f32 %v1272_v29, %v1271_v23  ;;  %v5684_v55 = vcombine.high %v1562_v47, %v1566_v48  ;;  %v5812_v57 = vcombine.high %v1690_v18, %v1694_v60  ;;  %v1558_v62 = vld [vmem:[#allocation12 + $0x868] sm:$0xff]  ;;  %v5683_v7 = vcombine.low %v1562_v47, %v1566_v48 }
 0x1ad   :  { %4670 = vmatpush1.bf16.msra.mxu0 %v5707_v8  ;;  %v1274_v38 = vsel %vm1264_vm0, %v1261_v31, 0.0  ;;  %4711 = vmatpush1.bf16.msra.mxu1 %v5835_v22  ;;  %v1278_v21 = vsel %vm1264_vm0, %v1263_v37, 0.0  ;;  %v1682_v0 = vld [vmem:[#allocation12 + $0xc48] sm:$0xff]  ;;  %v5811_v8 = vcombine.low %v1690_v18, %v1694_v60  ;;  %v5676_v10 = vcombine.high %v1554_v61, %v1558_v62 }
 0x1ae   :  { %4671 = vmatprep.subr.bf16.mxu0 %v5700_v28  ;;  %v1275_v44 = vadd.f32 %v1274_v38, %v1273_v35  ;;  %4712 = vmatprep.subr.bf16.mxu1 %v5828_v59  ;;  %v1686_v2 = vld [vmem:[#allocation12 + $0xc68] sm:$0xff]  ;;  %v5675_v19 = vcombine.low %v1554_v61, %v1558_v62 }
 0x1af   :  { %v5804_v56 = vcombine.high %v1682_v0, %v1686_v2  ;;  %v1546_v30 = vld [vmem:[#allocation12 + $0x808] sm:$0xff]  ;;  %v5803_v22 = vcombine.low %v1682_v0, %v1686_v2 }
 0x1b0   :  { %v1277_v49 = vadd.f32 %v1276_v39, %v1275_v44  ;;  %v1674_v12 = vld [vmem:[#allocation12 + $0xc08] sm:$0xff]  ;;  %v5668_v23 = vcombine.high %v1546_v30, %v1550_v11  ;;  %v5667_v31 = vcombine.low %v1546_v30, %v1550_v11 }
 0x1b1   :  { %4672 = vmatpush1.bf16.msra.mxu0 %v5699_v36  ;;  %4713 = vmatpush1.bf16.msra.mxu1 %v5827_v42  ;;  %v1678_v16 = vld [vmem:[#allocation12 + $0xc28] sm:$0xff] }
 0x1b2   :  { %4673 = vmatprep.subr.bf16.mxu0 %v5692_v43  ;;  %v1279_v54 = vadd.f32 %v1278_v21, %v1277_v49  ;;  %4714 = vmatprep.subr.bf16.mxu1 %v5820_v45  ;;  %v5796_v25 = vcombine.high %v1674_v12, %v1678_v16  ;;  %v1666_v26 = vld [vmem:[#allocation12 + $0xbc8] sm:$0xff]  ;;  %v5795_v13 = vcombine.low %v1674_v12, %v1678_v16 }
 0x1b3   :  { %v1670_v27 = vld [vmem:[#allocation12 + $0xbe8] sm:$0xff] }
 0x1b4   :  { %1280 = vadd.xlane.f32.xlu0 %v1279_v54  ;;  %v1794_v28 = vld [vmem:[#allocation12 + $0xfc8] sm:$0xff]  ;;  %v5788_v59 = vcombine.high %v1666_v26, %v1670_v27  ;;  %v5787_v36 = vcombine.low %v1666_v26, %v1670_v27 }
 0x1b5   :  { %4674 = vmatpush1.bf16.msra.mxu0 %v5691_v14  ;;  %4715 = vmatpush1.bf16.msra.mxu1 %v5819_v51  ;;  %v1798_v29 = vld [vmem:[#allocation12 + $0xfe8] sm:$0xff] }
 0x1b6   :  { %4675 = vmatprep.subr.bf16.mxu0 %v5684_v55  ;;  %4716 = vmatprep.subr.bf16.mxu1 %v5812_v57  ;;  %v5916_v15 = vcombine.high %v1794_v28, %v1798_v29  ;;  %v1658_v20 = vld [vmem:[#allocation12 + $0xb88] sm:$0xff]  ;;  %v5915_v37 = vcombine.low %v1794_v28, %v1798_v29 }
 0x1b7   :  { %v1662_v33 = vld [vmem:[#allocation12 + $0xba8] sm:$0xff] }
 0x1b8   :  { %v1786_v34 = vld [vmem:[#allocation12 + $0xf88] sm:$0xff]  ;;  %v5780_v38 = vcombine.high %v1658_v20, %v1662_v33  ;;  %v5779_v47 = vcombine.low %v1658_v20, %v1662_v33 }
 0x1b9   :  { %4676 = vmatpush1.bf16.msra.mxu0 %v5683_v7  ;;  %4717 = vmatpush1.bf16.msra.mxu1 %v5811_v8  ;;  %v1790_v35 = vld [vmem:[#allocation12 + $0xfa8] sm:$0xff] }
 0x1ba   :  { %4677 = vmatprep.subr.bf16.mxu0 %v5676_v10  ;;  %4718 = vmatprep.subr.bf16.mxu1 %v5804_v56  ;;  %v5908_v39 = vcombine.high %v1786_v34, %v1790_v35  ;;  %v1650_v42 = vld [vmem:[#allocation12 + $0xb48] sm:$0xff]  ;;  %v5907_v48 = vcombine.low %v1786_v34, %v1790_v35 }
 0x1bb   :  { %v1654_v43 = vld [vmem:[#allocation12 + $0xb68] sm:$0xff] }
 0x1bc   :  { %v1778_v44 = vld [vmem:[#allocation12 + $0xf48] sm:$0xff]  ;;  %v5772_v49 = vcombine.high %v1650_v42, %v1654_v43  ;;  %v5771_v54 = vcombine.low %v1650_v42, %v1654_v43  ;;  %v1347_v43 = vld [vmem:[#allocation12 + $0x1d0] sm:$0xff] }
 0x1bd   :  { %4678 = vmatpush1.bf16.msra.mxu0 %v5675_v19  ;;  %4719 = vmatpush1.bf16.msra.mxu1 %v5803_v22  ;;  %v1782_v45 = vld [vmem:[#allocation12 + $0xf68] sm:$0xff] }
 0x1be   :  { %4679 = vmatprep.subr.bf16.mxu0 %v5668_v23  ;;  %4720 = vmatprep.subr.bf16.mxu1 %v5796_v25  ;;  %v5900_v18 = vcombine.high %v1778_v44, %v1782_v45  ;;  %v1642_v60 = vld [vmem:[#allocation12 + $0xb08] sm:$0xff]  ;;  %v5899_v55 = vcombine.low %v1778_v44, %v1782_v45  ;;  %v1351_v44 = vld [vmem:[#allocation12 + $0x1f0] sm:$0xff] }
 0x1bf   :  { %v1646_v14 = vld [vmem:[#allocation12 + $0xb28] sm:$0xff]  ;;  %v1475_v45 = vld [vmem:[#allocation12 + $0x5d0] sm:$0xff] }
 0x1c0   :  { %v1770_v21 = vld [vmem:[#allocation12 + $0xf08] sm:$0xff]  ;;  %v5764_v57 = vcombine.high %v1642_v60, %v1646_v14  ;;  %v5763_v8 = vcombine.low %v1642_v60, %v1646_v14  ;;  %v1339_v14 = vld [vmem:[#allocation12 + $0x190] sm:$0xff] }
 0x1c1   :  { %4680 = vmatpush1.bf16.msra.mxu0 %v5667_v31  ;;  %4721 = vmatpush1.bf16.msra.mxu1 %v5795_v13  ;;  %v1774_v51 = vld [vmem:[#allocation12 + $0xf28] sm:$0xff] }
 0x1c2   :  { %4681 = vmatprep.subr.bf16.mxu0 %v5788_v59  ;;  %4722 = vmatprep.subr.bf16.mxu1 %v5916_v15  ;;  %v5892_v61 = vcombine.high %v1770_v21, %v1774_v51  ;;  %v1634_v62 = vld [vmem:[#allocation12 + $0xac8] sm:$0xff]  ;;  %v5891_v10 = vcombine.low %v1770_v21, %v1774_v51  ;;  %v1343_v21 = vld [vmem:[#allocation12 + $0x1b0] sm:$0xff] }
 0x1c3   :  { %v1638_v0 = vld [vmem:[#allocation12 + $0xae8] sm:$0xff]  ;;  %v1467_v51 = vld [vmem:[#allocation12 + $0x590] sm:$0xff] }
 0x1c4   :  { %v1762_v2 = vld [vmem:[#allocation12 + $0xec8] sm:$0xff]  ;;  %v5756_v56 = vcombine.high %v1634_v62, %v1638_v0  ;;  %v5755_v22 = vcombine.low %v1634_v62, %v1638_v0  ;;  %v1331_v0 = vld [vmem:[#allocation12 + $0x150] sm:$0xff] }
 0x1c5   :  { %4682 = vmatpush2.bf16.msra.mxu0 %v5787_v36  ;;  %4723 = vmatpush2.bf16.msra.mxu1 %v5915_v37  ;;  %v1766_v7 = vld [vmem:[#allocation12 + $0xee8] sm:$0xff] }
 0x1c6   :  { %4683 = vmatprep.subr.bf16.mxu0 %v5780_v38  ;;  %4724 = vmatprep.subr.bf16.mxu1 %v5908_v39  ;;  %v5884_v30 = vcombine.high %v1762_v2, %v1766_v7  ;;  %v1626_v11 = vld [vmem:[#allocation12 + $0xa88] sm:$0xff]  ;;  %v5883_v23 = vcombine.low %v1762_v2, %v1766_v7  ;;  %v1335_v2 = vld [vmem:[#allocation12 + $0x170] sm:$0xff] }
 0x1c7   :  { %v1630_v12 = vld [vmem:[#allocation12 + $0xaa8] sm:$0xff] }
 0x1c8   :  { %v1754_v16 = vld [vmem:[#allocation12 + $0xe88] sm:$0xff]  ;;  %v5748_v25 = vcombine.high %v1626_v11, %v1630_v12  ;;  %v5747_v13 = vcombine.low %v1626_v11, %v1630_v12 }
 0x1c9   :  { %4684 = vmatpush2.bf16.msra.mxu0 %v5779_v47  ;;  %4725 = vmatpush2.bf16.msra.mxu1 %v5907_v48  ;;  %v1758_v19 = vld [vmem:[#allocation12 + $0xea8] sm:$0xff]  ;;  %v1479_v47 = vld [vmem:[#allocation12 + $0x5f0] sm:$0xff] }
 0x1ca   :  { %4685 = vmatprep.subr.bf16.mxu0 %v5772_v49  ;;  %4726 = vmatprep.subr.bf16.mxu1 %v5900_v18  ;;  %v5876_v26 = vcombine.high %v1754_v16, %v1758_v19  ;;  %v1618_v27 = vld [vmem:[#allocation12 + $0xa48] sm:$0xff]  ;;  %v5875_v59 = vcombine.low %v1754_v16, %v1758_v19  ;;  %v5470_v18 = vcombine.high %v1347_v43, %v1351_v44 }
 0x1cb   :  { %v1622_v28 = vld [vmem:[#allocation12 + $0xa68] sm:$0xff]  ;;  %v5598_v60 = vcombine.high %v1475_v45, %v1479_v47  ;;  %v5454_v19 = vcombine.high %v1331_v0, %v1335_v2 }
 0x1cc   :  { %v1746_v29 = vld [vmem:[#allocation12 + $0xe48] sm:$0xff]  ;;  %v5740_v15 = vcombine.high %v1618_v27, %v1622_v28  ;;  %v5739_v37 = vcombine.low %v1618_v27, %v1622_v28 }
 0x1cd   :  { %4686 = vmatpush2.bf16.msra.mxu0 %v5771_v54  ;;  %4727 = vmatpush2.bf16.msra.mxu1 %v5899_v55  ;;  %v1750_v31 = vld [vmem:[#allocation12 + $0xe68] sm:$0xff]  ;;  %v1471_v54 = vld [vmem:[#allocation12 + $0x5b0] sm:$0xff]  ;;  %v5469_v55 = vcombine.low %v1347_v43, %v1351_v44 }
 0x1ce   :  { %4687 = vmatprep.subr.bf16.mxu0 %v5764_v57  ;;  %4728 = vmatprep.subr.bf16.mxu1 %v5892_v61  ;;  %v5868_v20 = vcombine.high %v1746_v29, %v1750_v31  ;;  %v1610_v33 = vld [vmem:[#allocation12 + $0xa08] sm:$0xff]  ;;  %v5867_v38 = vcombine.low %v1746_v29, %v1750_v31  ;;  %v5597_v57 = vcombine.low %v1475_v45, %v1479_v47  ;;  %v1451_v29 = vld [vmem:[#allocation12 + $0x510] sm:$0xff] }
 0x1cf   :  { %v1614_v34 = vld [vmem:[#allocation12 + $0xa28] sm:$0xff]  ;;  %v5462_v61 = vcombine.high %v1339_v14, %v1343_v21  ;;  %v5590_v62 = vcombine.high %v1467_v51, %v1471_v54  ;;  %v5589_v16 = vcombine.low %v1467_v51, %v1471_v54  ;;  %v1455_v31 = vld [vmem:[#allocation12 + $0x530] sm:$0xff] }
 0x1d0   :  { %v1738_v35 = vld [vmem:[#allocation12 + $0xe08] sm:$0xff]  ;;  %v5732_v39 = vcombine.high %v1610_v33, %v1614_v34  ;;  %v5731_v48 = vcombine.low %v1610_v33, %v1614_v34  ;;  %v5573_v43 = vcombine.low %v1451_v29, %v1455_v31  ;;  %v1307_v47 = vld [vmem:[#allocation12 + $0x90] sm:$0xff] }
 0x1d1   :  { %4688 = vmatpush2.bf16.msra.mxu0 %v5763_v8  ;;  %4729 = vmatpush2.bf16.msra.mxu1 %v5891_v10  ;;  %v1742_v36 = vld [vmem:[#allocation12 + $0xe28] sm:$0xff]  ;;  %v1459_v8 = vld [vmem:[#allocation12 + $0x550] sm:$0xff] }
 0x1d2   :  { %4689 = vmatprep.subr.bf16.mxu0 %v5756_v56  ;;  %4730 = vmatprep.subr.bf16.mxu1 %v5884_v30  ;;  %v5860_v42 = vcombine.high %v1738_v35, %v1742_v36  ;;  %v5859_v49 = vcombine.low %v1738_v35, %v1742_v36  ;;  %v1463_v10 = vld [vmem:[#allocation12 + $0x570] sm:$0xff]  ;;  %v5461_v30 = vcombine.low %v1339_v14, %v1343_v21 }
 0x1d3   :  { %v5574_v35 = vcombine.high %v1451_v29, %v1455_v31  ;;  %v1315_v36 = vld [vmem:[#allocation12 + $0xd0] sm:$0xff] }
 0x1d4   :  { %v1299_v54 = vld [vmem:[#allocation12 + $0x50] sm:$0xff] }
 0x1d5   :  { %4690 = vmatpush2.bf16.msra.mxu0 %v5755_v22  ;;  %4731 = vmatpush2.bf16.msra.mxu1 %v5883_v23  ;;  %v5582_v23 = vcombine.high %v1459_v8, %v1463_v10 }
 0x1d6   :  { %4691 = vmatprep.subr.bf16.mxu0 %v5748_v25  ;;  %4732 = vmatprep.subr.bf16.mxu1 %v5876_v26  ;;  %v1323_v25 = vld [vmem:[#allocation12 + $0x110] sm:$0xff] }
 0x1d7   :  { %v1327_v26 = vld [vmem:[#allocation12 + $0x130] sm:$0xff] }
 0x1d8   :  { %v5446_v33 = vcombine.high %v1323_v25, %v1327_v26 }
 0x1d9   :  { %4692 = vmatpush2.bf16.msra.mxu0 %v5747_v13  ;;  %4733 = vmatpush2.bf16.msra.mxu1 %v5875_v59  ;;  %v5453_v59 = vcombine.low %v1331_v0, %v1335_v2 }
 0x1da   :  { %4693 = vmatprep.subr.bf16.mxu0 %v5740_v15  ;;  %4734 = vmatprep.subr.bf16.mxu1 %v5868_v20  ;;  %v5581_v20 = vcombine.low %v1459_v8, %v1463_v10  ;;  %v1291_v8 = vld [vmem:[#allocation12 + $0x10] sm:$0xff] }
 0x1db   :  { %v1295_v10 = vld [vmem:[#allocation12 + $0x30] sm:$0xff] }
 0x1dc   :  { %v5413_v29 = vcombine.low %v1291_v8, %v1295_v10 }
 0x1dd   :  { %4694 = vmatpush2.bf16.msra.mxu0 %v5739_v37  ;;  %4735 = vmatpush2.bf16.msra.mxu1 %v5867_v38  ;;  %v1319_v37 = vld [vmem:[#allocation12 + $0xf0] sm:$0xff] }
 0x1de   :  { %4695 = vmatprep.subr.bf16.mxu0 %v5732_v39  ;;  %4736 = vmatprep.subr.bf16.mxu1 %v5860_v42  ;;  %v1443_v38 = vld [vmem:[#allocation12 + $0x4d0] sm:$0xff]  ;;  %v5445_v42 = vcombine.low %v1323_v25, %v1327_v26  ;;  %v5438_v44 = vcombine.high %v1315_v36, %v1319_v37 }
 0x1df   :  { %v1447_v39 = vld [vmem:[#allocation12 + $0x4f0] sm:$0xff] }
 0x1e0   :  { %v5566_v45 = vcombine.high %v1443_v38, %v1447_v39  ;;  %v5565_v14 = vcombine.low %v1443_v38, %v1447_v39  ;;  %v1415_v25 = vld [vmem:[#allocation12 + $0x3f0] sm:$0xff] }
 0x1e1   :  { %4696 = vmatpush2.bf16.msra.mxu0 %v5731_v48  ;;  %4737 = vmatpush2.bf16.msra.mxu1 %v5859_v49  ;;  %v1311_v48 = vld [vmem:[#allocation12 + $0xb0] sm:$0xff] }
 0x1e2   :  { %4747 = vmatprep.subr.bf16.mxu0 %v5470_v18  ;;  %4788 = vmatprep.subr.bf16.mxu1 %v5598_v60  ;;  %v1435_v49 = vld [vmem:[#allocation12 + $0x490] sm:$0xff]  ;;  %v5437_v60 = vcombine.low %v1315_v36, %v1319_v37  ;;  %v5430_v21 = vcombine.high %v1307_v47, %v1311_v48 }
 0x1e3   :  { %v1439_v18 = vld [vmem:[#allocation12 + $0x4b0] sm:$0xff] }
 0x1e4   :  { %v4453_v7 = vpop.f32.mrf.mxu0  ;;  %4698 = vmatmul.mubr.bf16.vlgmr.msra.gmra.mxu0 %v6259_v63  ;;  %v4494_v56 = vpop.f32.mrf.mxu1  ;;  %4739 = vmatmul.mubr.bf16.vlgmr.msra.gmra.mxu1 %v6263_v9  ;;  %v5558_v51 = vcombine.high %v1435_v49, %v1439_v18  ;;  %v5557_v0 = vcombine.low %v1435_v49, %v1439_v18  ;;  %v1539_v26 = vld [vmem:[#allocation12 + $0x7d0] sm:$0xff] }
 0x1e5   :  { %4748 = vmatpush1.bf16.msra.mxu0 %v5469_v55  ;;  %v6367_v11 = vadd.f32 %v4494_v56, %v4453_v7  ;;  %4789 = vmatpush1.bf16.msra.mxu1 %v5597_v57  ;;  %v1303_v55 = vld [vmem:[#allocation12 + $0x70] sm:$0xff] }
 0x1e6   :  { %v4455_v12 = vpop.f32.mrf.mxu0  ;;  %4749 = vmatprep.subr.bf16.mxu0 %v5462_v61  ;;  %v4496_v22 = vpop.f32.mrf.mxu1  ;;  %4790 = vmatprep.subr.bf16.mxu1 %v5590_v62  ;;  %v1427_v57 = vld [vmem:[#allocation12 + $0x450] sm:$0xff]  ;;  %v5429_v62 = vcombine.low %v1307_v47, %v1311_v48  ;;  %v5422_v2 = vcombine.high %v1299_v54, %v1303_v55 }
 0x1e7   :  { %4779 = vmatprep.mubr.bf16.mxu0 %v6221_v32  ;;  %v6370_v27 = vadd.f32 %v4496_v22, %v4455_v12  ;;  %4820 = vmatprep.mubr.bf16.mxu1 %v6226_v41  ;;  %v1431_v61 = vld [vmem:[#allocation12 + $0x470] sm:$0xff]  ;;  %v5421_v12 = vcombine.low %v1299_v54, %v1303_v55 }
 0x1e8   :  { %v4457_v28 = vpop.f32.mrf.mxu0  ;;  %v4498_v13 = vpop.f32.mrf.mxu1  ;;  %v5550_v7 = vcombine.high %v1427_v57, %v1431_v61  ;;  %v1419_v56 = vld [vmem:[#allocation12 + $0x410] sm:$0xff] }
 0x1e9   :  { %4750 = vmatpush1.bf16.msra.mxu0 %v5461_v30  ;;  %4791 = vmatpush1.bf16.msra.mxu1 %v5589_v16  ;;  %v1423_v30 = vld [vmem:[#allocation12 + $0x430] sm:$0xff]  ;;  %v5549_v16 = vcombine.low %v1427_v57, %v1431_v61 }
 0x1ea   :  { %v4458_v15 = vpop.f32.mrf.mxu0  ;;  %4751 = vmatprep.subr.bf16.mxu0 %v5454_v19  ;;  %v4499_v34 = vpop.f32.mrf.mxu1  ;;  %4792 = vmatprep.subr.bf16.mxu1 %v5582_v23  ;;  %v5414_v19 = vcombine.high %v1291_v8, %v1295_v10  ;;  %v5542_v22 = vcombine.high %v1419_v56, %v1423_v30  ;;  %v1411_v23 = vld [vmem:[#allocation12 + $0x3d0] sm:$0xff]  ;;  %v5541_v31 = vcombine.low %v1419_v56, %v1423_v30 }
 0x1eb   :  { %v1543_v28 = vld [vmem:[#allocation12 + $0x7f0] sm:$0xff]  ;;  %v5534_v13 = vcombine.high %v1411_v23, %v1415_v25 }
 0x1ec   :  { %v1403_v15 = vld [vmem:[#allocation12 + $0x390] sm:$0xff]  ;;  %v5661_v36 = vcombine.low %v1539_v26, %v1543_v28 }
 0x1ed   :  { %4752 = vmatpush1.bf16.msra.mxu0 %v5453_v59  ;;  %4793 = vmatpush1.bf16.msra.mxu1 %v5581_v20  ;;  %v5662_v59 = vcombine.high %v1539_v26, %v1543_v28  ;;  %v1407_v20 = vld [vmem:[#allocation12 + $0x3b0] sm:$0xff] }
 0x1ee   :  { %4753 = vmatprep.subr.bf16.mxu0 %v5446_v33  ;;  %4794 = vmatprep.subr.bf16.mxu1 %v5574_v35  ;;  %v1531_v33 = vld [vmem:[#allocation12 + $0x790] sm:$0xff]  ;;  %v5533_v35 = vcombine.low %v1411_v23, %v1415_v25  ;;  %v5526_v37 = vcombine.high %v1403_v15, %v1407_v20 }
 0x1ef   :  { %v1535_v34 = vld [vmem:[#allocation12 + $0x7b0] sm:$0xff] }
 0x1f0   :  { %v5654_v38 = vcombine.high %v1531_v33, %v1535_v34  ;;  %v1395_v39 = vld [vmem:[#allocation12 + $0x350] sm:$0xff]  ;;  %v5653_v47 = vcombine.low %v1531_v33, %v1535_v34 }
 0x1f1   :  { %4754 = vmatpush1.bf16.msra.mxu0 %v5445_v42  ;;  %4795 = vmatpush1.bf16.msra.mxu1 %v5573_v43  ;;  %v1399_v42 = vld [vmem:[#allocation12 + $0x370] sm:$0xff] }
 0x1f2   :  { %4755 = vmatprep.subr.bf16.mxu0 %v5438_v44  ;;  %4796 = vmatprep.subr.bf16.mxu1 %v5566_v45  ;;  %v1523_v43 = vld [vmem:[#allocation12 + $0x750] sm:$0xff]  ;;  %v5525_v45 = vcombine.low %v1403_v15, %v1407_v20  ;;  %v5518_v48 = vcombine.high %v1395_v39, %v1399_v42 }
 0x1f3   :  { %v1527_v44 = vld [vmem:[#allocation12 + $0x770] sm:$0xff] }
 0x1f4   :  { %v5646_v49 = vcombine.high %v1523_v43, %v1527_v44  ;;  %v1387_v18 = vld [vmem:[#allocation12 + $0x310] sm:$0xff]  ;;  %v5645_v54 = vcombine.low %v1523_v43, %v1527_v44 }
 0x1f5   :  { %4756 = vmatpush1.bf16.msra.mxu0 %v5437_v60  ;;  %4797 = vmatpush1.bf16.msra.mxu1 %v5565_v14  ;;  %v1391_v60 = vld [vmem:[#allocation12 + $0x330] sm:$0xff] }
 0x1f6   :  { %4757 = vmatprep.subr.bf16.mxu0 %v5430_v21  ;;  %4798 = vmatprep.subr.bf16.mxu1 %v5558_v51  ;;  %v1515_v14 = vld [vmem:[#allocation12 + $0x710] sm:$0xff]  ;;  %v5517_v51 = vcombine.low %v1395_v39, %v1399_v42  ;;  %v5510_v55 = vcombine.high %v1387_v18, %v1391_v60 }
 0x1f7   :  { %v1519_v21 = vld [vmem:[#allocation12 + $0x730] sm:$0xff] }
 0x1f8   :  { %v5638_v57 = vcombine.high %v1515_v14, %v1519_v21  ;;  %v1379_v61 = vld [vmem:[#allocation12 + $0x2d0] sm:$0xff]  ;;  %v5637_v8 = vcombine.low %v1515_v14, %v1519_v21 }
 0x1f9   :  { %4758 = vmatpush1.bf16.msra.mxu0 %v5429_v62  ;;  %4799 = vmatpush1.bf16.msra.mxu1 %v5557_v0  ;;  %v1383_v62 = vld [vmem:[#allocation12 + $0x2f0] sm:$0xff] }
 0x1fa   :  { %4759 = vmatprep.subr.bf16.mxu0 %v5422_v2  ;;  %4800 = vmatprep.subr.bf16.mxu1 %v5550_v7  ;;  %v1507_v0 = vld [vmem:[#allocation12 + $0x6d0] sm:$0xff]  ;;  %v5509_v7 = vcombine.low %v1387_v18, %v1391_v60  ;;  %v5502_v10 = vcombine.high %v1379_v61, %v1383_v62 }
 0x1fb   :  { %v1511_v2 = vld [vmem:[#allocation12 + $0x6f0] sm:$0xff] }
 0x1fc   :  { %v5630_v56 = vcombine.high %v1507_v0, %v1511_v2  ;;  %v1371_v30 = vld [vmem:[#allocation12 + $0x290] sm:$0xff]  ;;  %v5629_v23 = vcombine.low %v1507_v0, %v1511_v2 }
 0x1fd   :  { %4760 = vmatpush1.bf16.msra.mxu0 %v5421_v12  ;;  %4801 = vmatpush1.bf16.msra.mxu1 %v5549_v16  ;;  %v1375_v12 = vld [vmem:[#allocation12 + $0x2b0] sm:$0xff] }
 0x1fe   :  { %4761 = vmatprep.subr.bf16.mxu0 %v5414_v19  ;;  %4802 = vmatprep.subr.bf16.mxu1 %v5542_v22  ;;  %v1499_v16 = vld [vmem:[#allocation12 + $0x690] sm:$0xff]  ;;  %v5501_v22 = vcombine.low %v1379_v61, %v1383_v62  ;;  %v5494_v25 = vcombine.high %v1371_v30, %v1375_v12 }
 0x1ff   :  { %v1503_v19 = vld [vmem:[#allocation12 + $0x6b0] sm:$0xff] }
 0x200   :  { %v5622_v26 = vcombine.high %v1499_v16, %v1503_v19  ;;  %v1363_v28 = vld [vmem:[#allocation12 + $0x250] sm:$0xff]  ;;  %v5621_v15 = vcombine.low %v1499_v16, %v1503_v19 }
 0x201   :  { %4762 = vmatpush1.bf16.msra.mxu0 %v5413_v29  ;;  %4803 = vmatpush1.bf16.msra.mxu1 %v5541_v31  ;;  %v1367_v29 = vld [vmem:[#allocation12 + $0x270] sm:$0xff] }
 0x202   :  { %4763 = vmatprep.subr.bf16.mxu0 %v5534_v13  ;;  %4804 = vmatprep.subr.bf16.mxu1 %v5662_v59  ;;  %v1491_v31 = vld [vmem:[#allocation12 + $0x650] sm:$0xff]  ;;  %v5493_v59 = vcombine.low %v1371_v30, %v1375_v12  ;;  %v5486_v20 = vcombine.high %v1363_v28, %v1367_v29 }
 0x203   :  { %v1495_v13 = vld [vmem:[#allocation12 + $0x670] sm:$0xff] }
 0x204   :  { %v5614_v33 = vcombine.high %v1491_v31, %v1495_v13  ;;  %v1355_v34 = vld [vmem:[#allocation12 + $0x210] sm:$0xff]  ;;  %v5613_v39 = vcombine.low %v1491_v31, %v1495_v13 }
 0x205   :  { %4764 = vmatpush2.bf16.msra.mxu0 %v5533_v35  ;;  %4805 = vmatpush2.bf16.msra.mxu1 %v5661_v36  ;;  %v1359_v35 = vld [vmem:[#allocation12 + $0x230] sm:$0xff] }
 0x206   :  { %4765 = vmatprep.subr.bf16.mxu0 %v5526_v37  ;;  %4806 = vmatprep.subr.bf16.mxu1 %v5654_v38  ;;  %v1483_v36 = vld [vmem:[#allocation12 + $0x610] sm:$0xff]  ;;  %v5485_v38 = vcombine.low %v1363_v28, %v1367_v29  ;;  %v5478_v42 = vcombine.high %v1355_v34, %v1359_v35 }
 0x207   :  { %v1487_v37 = vld [vmem:[#allocation12 + $0x630] sm:$0xff] }
 0x208   :  { %v5606_v43 = vcombine.high %v1483_v36, %v1487_v37  ;;  %v1603_v44 = vld [vmem:[#allocation12 + $0x9d0] sm:$0xff]  ;;  %v5605_v18 = vcombine.low %v1483_v36, %v1487_v37 }
 0x209   :  { %4766 = vmatpush2.bf16.msra.mxu0 %v5525_v45  ;;  %4807 = vmatpush2.bf16.msra.mxu1 %v5653_v47  ;;  %v1607_v45 = vld [vmem:[#allocation12 + $0x9f0] sm:$0xff] }
 0x20a   :  { %4767 = vmatprep.subr.bf16.mxu0 %v5518_v48  ;;  %4808 = vmatprep.subr.bf16.mxu1 %v5646_v49  ;;  %v1731_v47 = vld [vmem:[#allocation12 + $0xdd0] sm:$0xff]  ;;  %v5477_v49 = vcombine.low %v1355_v34, %v1359_v35  ;;  %v5726_v60 = vcombine.high %v1603_v44, %v1607_v45 }
 0x20b   :  { %v1735_v48 = vld [vmem:[#allocation12 + $0xdf0] sm:$0xff] }
 0x20c   :  { %v5854_v14 = vcombine.high %v1731_v47, %v1735_v48  ;;  %v1595_v21 = vld [vmem:[#allocation12 + $0x990] sm:$0xff]  ;;  %v5853_v61 = vcombine.low %v1731_v47, %v1735_v48 }
 0x20d   :  { %4768 = vmatpush2.bf16.msra.mxu0 %v5517_v51  ;;  %4809 = vmatpush2.bf16.msra.mxu1 %v5645_v54  ;;  %v1599_v51 = vld [vmem:[#allocation12 + $0x9b0] sm:$0xff] }
 0x20e   :  { %4769 = vmatprep.subr.bf16.mxu0 %v5510_v55  ;;  %4810 = vmatprep.subr.bf16.mxu1 %v5638_v57  ;;  %v1723_v54 = vld [vmem:[#allocation12 + $0xd90] sm:$0xff]  ;;  %v5725_v57 = vcombine.low %v1603_v44, %v1607_v45  ;;  %v5718_v62 = vcombine.high %v1595_v21, %v1599_v51  ;;  %v5717_v16 = vcombine.low %v1595_v21, %v1599_v51 }
 0x20f   :  { %v1727_v55 = vld [vmem:[#allocation12 + $0xdb0] sm:$0xff] }
 0x210   :  { %v5846_v0 = vcombine.high %v1723_v54, %v1727_v55  ;;  %v1587_v2 = vld [vmem:[#allocation12 + $0x950] sm:$0xff] }
 0x211   :  { %4770 = vmatpush2.bf16.msra.mxu0 %v5509_v7  ;;  %4811 = vmatpush2.bf16.msra.mxu1 %v5637_v8  ;;  %v1591_v7 = vld [vmem:[#allocation12 + $0x970] sm:$0xff] }
 0x212   :  { %4771 = vmatprep.subr.bf16.mxu0 %v5502_v10  ;;  %4812 = vmatprep.subr.bf16.mxu1 %v5630_v56  ;;  %v1715_v10 = vld [vmem:[#allocation12 + $0xd50] sm:$0xff]  ;;  %v5709_v34 = vcombine.low %v1587_v2, %v1591_v7 }
 0x213   :  { %v1719_v56 = vld [vmem:[#allocation12 + $0xd70] sm:$0xff] }
 0x214   :  { %v5838_v29 = vcombine.high %v1715_v10, %v1719_v56  ;;  %v1579_v31 = vld [vmem:[#allocation12 + $0x910] sm:$0xff] }
 0x215   :  { %4772 = vmatpush2.bf16.msra.mxu0 %v5501_v22  ;;  %4813 = vmatpush2.bf16.msra.mxu1 %v5629_v23  ;;  %v5845_v22 = vcombine.low %v1723_v54, %v1727_v55  ;;  %v5710_v23 = vcombine.high %v1587_v2, %v1591_v7  ;;  %v1583_v13 = vld [vmem:[#allocation12 + $0x930] sm:$0xff] }
 0x216   :  { %4773 = vmatprep.subr.bf16.mxu0 %v5494_v25  ;;  %4814 = vmatprep.subr.bf16.mxu1 %v5622_v26  ;;  %v5702_v36 = vcombine.high %v1579_v31, %v1583_v13  ;;  %v1699_v44 = vld [vmem:[#allocation12 + $0xcd0] sm:$0xff]  ;;  %v5701_v47 = vcombine.low %v1579_v31, %v1583_v13 }
 0x217   :  { %v1703_v45 = vld [vmem:[#allocation12 + $0xcf0] sm:$0xff] }
 0x218   :  { %v1691_v21 = vld [vmem:[#allocation12 + $0xc90] sm:$0xff]  ;;  %v5821_v55 = vcombine.low %v1699_v44, %v1703_v45 }
 0x219   :  { %4774 = vmatpush2.bf16.msra.mxu0 %v5493_v59  ;;  %4815 = vmatpush2.bf16.msra.mxu1 %v5621_v15  ;;  %v1707_v59 = vld [vmem:[#allocation12 + $0xd10] sm:$0xff] }
 0x21a   :  { %4775 = vmatprep.subr.bf16.mxu0 %v5486_v20  ;;  %4816 = vmatprep.subr.bf16.mxu1 %v5614_v33  ;;  %v1711_v15 = vld [vmem:[#allocation12 + $0xd30] sm:$0xff] }
 0x21b   :  { %v5829_v48 = vcombine.low %v1707_v59, %v1711_v15  ;;  %v1695_v51 = vld [vmem:[#allocation12 + $0xcb0] sm:$0xff] }
 0x21c   :  { %v1683_v2 = vld [vmem:[#allocation12 + $0xc50] sm:$0xff] }
 0x21d   :  { %4776 = vmatpush2.bf16.msra.mxu0 %v5485_v38  ;;  %4817 = vmatpush2.bf16.msra.mxu1 %v5613_v39  ;;  %v5830_v39 = vcombine.high %v1707_v59, %v1711_v15  ;;  %v1687_v7 = vld [vmem:[#allocation12 + $0xc70] sm:$0xff] }
 0x21e   :  { %4777 = vmatprep.subr.bf16.mxu0 %v5478_v42  ;;  %4818 = vmatprep.subr.bf16.mxu1 %v5606_v43  ;;  %v1571_v42 = vld [vmem:[#allocation12 + $0x8d0] sm:$0xff] }
 0x21f   :  { %v1575_v43 = vld [vmem:[#allocation12 + $0x8f0] sm:$0xff] }
 0x220   :  { %v5693_v54 = vcombine.low %v1571_v42, %v1575_v43  ;;  %v1667_v31 = vld [vmem:[#allocation12 + $0xbd0] sm:$0xff] }
 0x221   :  { %4778 = vmatpush2.bf16.msra.mxu0 %v5477_v49  ;;  %4819 = vmatpush2.bf16.msra.mxu1 %v5605_v18  ;;  %v5694_v49 = vcombine.high %v1571_v42, %v1575_v43  ;;  %v5822_v18 = vcombine.high %v1699_v44, %v1703_v45  ;;  %v1671_v13 = vld [vmem:[#allocation12 + $0xbf0] sm:$0xff] }
 0x222   :  { %4829 = vmatprep.subr.bf16.mxu0 %v5726_v60  ;;  %4870 = vmatprep.subr.bf16.mxu1 %v5854_v14  ;;  %v1563_v60 = vld [vmem:[#allocation12 + $0x890] sm:$0xff]  ;;  %v5789_v43 = vcombine.low %v1667_v31, %v1671_v13 }
 0x223   :  { %v1567_v14 = vld [vmem:[#allocation12 + $0x8b0] sm:$0xff] }
 0x224   :  { %v4535_v8 = vpop.f32.mrf.mxu0  ;;  %4780 = vmatmul.mubr.bf16.vlgmr.msra.gmra.mxu0 %v6240_v40  ;;  %v4576_v12 = vpop.f32.mrf.mxu1  ;;  %4821 = vmatmul.mubr.bf16.vlgmr.msra.gmra.mxu1 %v6247_v3  ;;  %v1799_v59 = vld [vmem:[#allocation12 + $0xff0] sm:$0xff] }
 0x225   :  { %v4536_v30 = vadd.f32 %v4535_v8, %v6367_v11  ;;  %4830 = vmatpush1.bf16.msra.mxu0 %v5725_v57  ;;  %4871 = vmatpush1.bf16.msra.mxu1 %v5853_v61  ;;  %v5686_v57 = vcombine.high %v1563_v60, %v1567_v14  ;;  %v5814_v61 = vcombine.high %v1691_v21, %v1695_v51  ;;  %v1791_v42 = vld [vmem:[#allocation12 + $0xfb0] sm:$0xff] }
 0x226   :  { %v4537_v19 = vpop.f32.mrf.mxu0  ;;  %4831 = vmatprep.subr.bf16.mxu0 %v5718_v62  ;;  %v4578_v28 = vpop.f32.mrf.mxu1  ;;  %4872 = vmatprep.subr.bf16.mxu1 %v5846_v0  ;;  %v1555_v62 = vld [vmem:[#allocation12 + $0x850] sm:$0xff]  ;;  %v5685_v8 = vcombine.low %v1563_v60, %v1567_v14 }
 0x227   :  { %v6376_v25 = vadd.f32 %v4576_v12, %v4536_v30  ;;  %v4538_v26 = vadd.f32 %v4537_v19, %v6370_v27  ;;  %4861 = vmatprep.mubr.bf16.mxu0 %v6243_v50  ;;  %4902 = vmatprep.mubr.bf16.mxu1 %v6252_v58  ;;  %v5837_v27 = vcombine.low %v1715_v10, %v1719_v56  ;;  %v1559_v0 = vld [vmem:[#allocation12 + $0x870] sm:$0xff] }
 0x228   :  { %v4539_v11 = vpop.f32.mrf.mxu0  ;;  %v4580_v33 = vpop.f32.mrf.mxu1  ;;  %v5813_v10 = vcombine.low %v1691_v21, %v1695_v51  ;;  %v5678_v56 = vcombine.high %v1555_v62, %v1559_v0  ;;  %v5806_v30 = vcombine.high %v1683_v2, %v1687_v7  ;;  %v1547_v12 = vld [vmem:[#allocation12 + $0x810] sm:$0xff] }
 0x229   :  { %v6381_v20 = vadd.f32 %v4578_v28, %v4538_v26  ;;  %4832 = vmatpush1.bf16.msra.mxu0 %v5717_v16  ;;  %4873 = vmatpush1.bf16.msra.mxu1 %v5845_v22  ;;  %v1551_v16 = vld [vmem:[#allocation12 + $0x830] sm:$0xff]  ;;  %v5805_v26 = vcombine.low %v1683_v2, %v1687_v7 }
 0x22a   :  { %v4540_v35 = vpop.f32.mrf.mxu0  ;;  %4833 = vmatprep.subr.bf16.mxu0 %v5710_v23  ;;  %v4581_v38 = vpop.f32.mrf.mxu1  ;;  %4874 = vmatprep.subr.bf16.mxu1 %v5838_v29  ;;  %v1675_v19 = vld [vmem:[#allocation12 + $0xc10] sm:$0xff]  ;;  %v5677_v23 = vcombine.low %v1555_v62, %v1559_v0  ;;  %v5670_v28 = vcombine.high %v1547_v12, %v1551_v16  ;;  %v5669_v33 = vcombine.low %v1547_v12, %v1551_v16 }
 0x22b   :  { %v5083_v37 = vcombine.low %v6376_v25, %v6381_v20  ;;  %v1679_v22 = vld [vmem:[#allocation12 + $0xc30] sm:$0xff]  ;;  %v5790_v35 = vcombine.high %v1667_v31, %v1671_v13  ;;  %v1696_v25 = vld [vmem:[#allocation12 + $0xcb8] sm:$0xff] }
 0x22c   :  { %v5798_v29 = vcombine.high %v1675_v19, %v1679_v22  ;;  %v1795_v11 = vld [vmem:[#allocation12 + $0xfd0] sm:$0xff] }
 0x22d   :  { %4834 = vmatpush1.bf16.msra.mxu0 %v5709_v34  ;;  %4875 = vmatpush1.bf16.msra.mxu1 %v5837_v27  ;;  %v5797_v34 = vcombine.low %v1675_v19, %v1679_v22  ;;  %v5918_v27 = vcombine.high %v1795_v11, %v1799_v59  ;;  %v1663_v38 = vld [vmem:[#allocation12 + $0xbb0] sm:$0xff]  ;;  %v5917_v44 = vcombine.low %v1795_v11, %v1799_v59 }
 0x22e   :  { %4835 = vmatprep.subr.bf16.mxu0 %v5702_v36  ;;  %4876 = vmatprep.subr.bf16.mxu1 %v5830_v39  ;;  %v1659_v36 = vld [vmem:[#allocation12 + $0xb90] sm:$0xff] }
 0x22f   :  { %v1787_v39 = vld [vmem:[#allocation12 + $0xf90] sm:$0xff]  ;;  %v5782_v45 = vcombine.high %v1659_v36, %v1663_v38  ;;  %v5781_v14 = vcombine.low %v1659_v36, %v1663_v38 }
 0x230   :  { %v1783_v60 = vld [vmem:[#allocation12 + $0xf70] sm:$0xff]  ;;  %v5909_v21 = vcombine.low %v1787_v39, %v1791_v42 }
 0x231   :  { %4836 = vmatpush1.bf16.msra.mxu0 %v5701_v47  ;;  %4877 = vmatpush1.bf16.msra.mxu1 %v5829_v48  ;;  %v5910_v47 = vcombine.high %v1787_v39, %v1791_v42  ;;  %v1651_v48 = vld [vmem:[#allocation12 + $0xb50] sm:$0xff] }
 0x232   :  { %4837 = vmatprep.subr.bf16.mxu0 %v5694_v49  ;;  %4878 = vmatprep.subr.bf16.mxu1 %v5822_v18  ;;  %v1655_v49 = vld [vmem:[#allocation12 + $0xb70] sm:$0xff] }
 0x233   :  { %v1779_v18 = vld [vmem:[#allocation12 + $0xf50] sm:$0xff]  ;;  %v5774_v51 = vcombine.high %v1651_v48, %v1655_v49  ;;  %v5773_v0 = vcombine.low %v1651_v48, %v1655_v49 }
 0x234   :  { %v1775_v62 = vld [vmem:[#allocation12 + $0xf30] sm:$0xff]  ;;  %v5901_v2 = vcombine.low %v1779_v18, %v1783_v60 }
 0x235   :  { %4838 = vmatpush1.bf16.msra.mxu0 %v5693_v54  ;;  %4879 = vmatpush1.bf16.msra.mxu1 %v5821_v55  ;;  %v5902_v54 = vcombine.high %v1779_v18, %v1783_v60  ;;  %v1643_v55 = vld [vmem:[#allocation12 + $0xb10] sm:$0xff] }
 0x236   :  { %4839 = vmatprep.subr.bf16.mxu0 %v5686_v57  ;;  %4880 = vmatprep.subr.bf16.mxu1 %v5814_v61  ;;  %v1647_v57 = vld [vmem:[#allocation12 + $0xb30] sm:$0xff] }
 0x237   :  { %v1771_v61 = vld [vmem:[#allocation12 + $0xf10] sm:$0xff]  ;;  %v5766_v7 = vcombine.high %v1643_v55, %v1647_v57  ;;  %v5765_v16 = vcombine.low %v1643_v55, %v1647_v57 }
 0x238   :  { %v1767_v12 = vld [vmem:[#allocation12 + $0xef0] sm:$0xff]  ;;  %v5893_v19 = vcombine.low %v1771_v61, %v1775_v62 }
 0x239   :  { %4840 = vmatpush1.bf16.msra.mxu0 %v5685_v8  ;;  %4881 = vmatpush1.bf16.msra.mxu1 %v5813_v10  ;;  %v5894_v8 = vcombine.high %v1771_v61, %v1775_v62  ;;  %v1635_v10 = vld [vmem:[#allocation12 + $0xad0] sm:$0xff] }
 0x23a   :  { %4841 = vmatprep.subr.bf16.mxu0 %v5678_v56  ;;  %4882 = vmatprep.subr.bf16.mxu1 %v5806_v30  ;;  %v1639_v56 = vld [vmem:[#allocation12 + $0xaf0] sm:$0xff] }
 0x23b   :  { %v1763_v30 = vld [vmem:[#allocation12 + $0xed0] sm:$0xff]  ;;  %v5758_v22 = vcombine.high %v1635_v10, %v1639_v56  ;;  %v5757_v13 = vcombine.low %v1635_v10, %v1639_v56 }
 0x23c   :  { %v1759_v31 = vld [vmem:[#allocation12 + $0xeb0] sm:$0xff]  ;;  %v5885_v11 = vcombine.low %v1763_v30, %v1767_v12 }
 0x23d   :  { %4842 = vmatpush1.bf16.msra.mxu0 %v5677_v23  ;;  %v1281_v15 = vpop.xlane.xlu0 %1280  ;;  %4883 = vmatpush1.bf16.msra.mxu1 %v5805_v26  ;;  %v5886_v23 = vcombine.high %v1763_v30, %v1767_v12  ;;  %v1627_v26 = vld [vmem:[#allocation12 + $0xa90] sm:$0xff] }
 0x23e   :  { %1283 = vst.msk [vmem:[#allocation3] sm:$0x3] %vm1282_vm1, %v1281_v15  ;;  %4843 = vmatprep.subr.bf16.mxu0 %v5670_v28  ;;  %4884 = vmatprep.subr.bf16.mxu1 %v5798_v29  ;;  %v1631_v28 = vld [vmem:[#allocation12 + $0xab0] sm:$0xff] }
 0x23f   :  { %v1755_v29 = vld [vmem:[#allocation12 + $0xe90] sm:$0xff]  ;;  %v5750_v59 = vcombine.high %v1627_v26, %v1631_v28  ;;  %v5749_v36 = vcombine.low %v1627_v26, %v1631_v28  ;;  %v1464_v26 = vld [vmem:[#allocation12 + $0x578] sm:$0xff] }
 0x240   :  { %v5878_v15 = vcombine.high %v1755_v29, %v1759_v31  ;;  %v5877_v38 = vcombine.low %v1755_v29, %v1759_v31 }
 0x241   :  { %4844 = vmatpush1.bf16.msra.mxu0 %v5669_v33  ;;  %4885 = vmatpush1.bf16.msra.mxu1 %v5797_v34  ;;  %v1619_v33 = vld [vmem:[#allocation12 + $0xa50] sm:$0xff] }
 0x242   :  { %4845 = vmatprep.subr.bf16.mxu0 %v5790_v35  ;;  %4886 = vmatprep.subr.bf16.mxu1 %v5918_v27  ;;  %v1623_v34 = vld [vmem:[#allocation12 + $0xa70] sm:$0xff] }
 0x243   :  { %v1747_v35 = vld [vmem:[#allocation12 + $0xe50] sm:$0xff]  ;;  %v5742_v39 = vcombine.high %v1619_v33, %v1623_v34  ;;  %v5741_v48 = vcombine.low %v1619_v33, %v1623_v34  ;;  %v1324_v34 = vld [vmem:[#allocation12 + $0x118] sm:$0xff] }
 0x244   :  { %v1751_v27 = vld [vmem:[#allocation12 + $0xe70] sm:$0xff] }
 0x245   :  { %4846 = vmatpush2.bf16.msra.mxu0 %v5789_v43  ;;  %4887 = vmatpush2.bf16.msra.mxu1 %v5917_v44  ;;  %v5870_v42 = vcombine.high %v1747_v35, %v1751_v27  ;;  %v1611_v43 = vld [vmem:[#allocation12 + $0xa10] sm:$0xff]  ;;  %v5869_v49 = vcombine.low %v1747_v35, %v1751_v27  ;;  %v1328_v35 = vld [vmem:[#allocation12 + $0x138] sm:$0xff] }
 0x246   :  { %4847 = vmatprep.subr.bf16.mxu0 %v5782_v45  ;;  %4888 = vmatprep.subr.bf16.mxu1 %v5910_v47  ;;  %v1615_v44 = vld [vmem:[#allocation12 + $0xa30] sm:$0xff] }
 0x247   :  { %v1739_v45 = vld [vmem:[#allocation12 + $0xe10] sm:$0xff]  ;;  %v5734_v18 = vcombine.high %v1611_v43, %v1615_v44  ;;  %v5733_v55 = vcombine.low %v1611_v43, %v1615_v44 }
 0x248   :  { %v1743_v47 = vld [vmem:[#allocation12 + $0xe30] sm:$0xff] }
 0x249   :  { %4848 = vmatpush2.bf16.msra.mxu0 %v5781_v14  ;;  %4889 = vmatpush2.bf16.msra.mxu1 %v5909_v21  ;;  %v5862_v60 = vcombine.high %v1739_v45, %v1743_v47  ;;  %v1348_v14 = vld [vmem:[#allocation12 + $0x1d8] sm:$0xff]  ;;  %v5861_v57 = vcombine.low %v1739_v45, %v1743_v47  ;;  %v5448_v47 = vcombine.high %v1324_v34, %v1328_v35 }
 0x24a   :  { %4849 = vmatprep.subr.bf16.mxu0 %v5774_v51  ;;  %4890 = vmatprep.subr.bf16.mxu1 %v5902_v54  ;;  %v1352_v21 = vld [vmem:[#allocation12 + $0x1f8] sm:$0xff] }
 0x24b   :  { %v1476_v51 = vld [vmem:[#allocation12 + $0x5d8] sm:$0xff]  ;;  %v5472_v61 = vcombine.high %v1348_v14, %v1352_v21  ;;  %v5471_v10 = vcombine.low %v1348_v14, %v1352_v21  ;;  %v5447_v21 = vcombine.low %v1324_v34, %v1328_v35 }
 0x24c   :  { %v1480_v54 = vld [vmem:[#allocation12 + $0x5f8] sm:$0xff] }
 0x24d   :  { %4850 = vmatpush2.bf16.msra.mxu0 %v5773_v0  ;;  %4891 = vmatpush2.bf16.msra.mxu1 %v5901_v2  ;;  %v5600_v62 = vcombine.high %v1476_v51, %v1480_v54  ;;  %v1340_v0 = vld [vmem:[#allocation12 + $0x198] sm:$0xff]  ;;  %v5599_v56 = vcombine.low %v1476_v51, %v1480_v54 }
 0x24e   :  { %4851 = vmatprep.subr.bf16.mxu0 %v5766_v7  ;;  %4892 = vmatprep.subr.bf16.mxu1 %v5894_v8  ;;  %v1344_v2 = vld [vmem:[#allocation12 + $0x1b8] sm:$0xff] }
 0x24f   :  { %v1468_v7 = vld [vmem:[#allocation12 + $0x598] sm:$0xff]  ;;  %v5464_v30 = vcombine.high %v1340_v0, %v1344_v2  ;;  %v5463_v29 = vcombine.low %v1340_v0, %v1344_v2 }
 0x250   :  { %v1472_v8 = vld [vmem:[#allocation12 + $0x5b8] sm:$0xff] }
 0x251   :  { %4852 = vmatpush2.bf16.msra.mxu0 %v5765_v16  ;;  %4893 = vmatpush2.bf16.msra.mxu1 %v5893_v19  ;;  %v5592_v12 = vcombine.high %v1468_v7, %v1472_v8  ;;  %v1332_v16 = vld [vmem:[#allocation12 + $0x158] sm:$0xff] }
 0x252   :  { %4853 = vmatprep.subr.bf16.mxu0 %v5758_v22  ;;  %4894 = vmatprep.subr.bf16.mxu1 %v5886_v23  ;;  %v1336_v19 = vld [vmem:[#allocation12 + $0x178] sm:$0xff] }
 0x253   :  { %v1460_v23 = vld [vmem:[#allocation12 + $0x558] sm:$0xff]  ;;  %v5455_v43 = vcombine.low %v1332_v16, %v1336_v19 }
 0x254   :  { %v5584_v33 = vcombine.high %v1460_v23, %v1464_v26  ;;  %v5583_v45 = vcombine.low %v1460_v23, %v1464_v26  ;;  %v1448_v14 = vld [vmem:[#allocation12 + $0x4f8] sm:$0xff] }
 0x255   :  { %4854 = vmatpush2.bf16.msra.mxu0 %v5757_v13  ;;  %4895 = vmatpush2.bf16.msra.mxu1 %v5885_v11  ;;  %v5591_v11 = vcombine.low %v1468_v7, %v1472_v8  ;;  %v1292_v26 = vld [vmem:[#allocation12 + $0x18] sm:$0xff] }
 0x256   :  { %4855 = vmatprep.subr.bf16.mxu0 %v5750_v59  ;;  %4896 = vmatprep.subr.bf16.mxu1 %v5878_v15  ;;  %v5456_v59 = vcombine.high %v1332_v16, %v1336_v19  ;;  %v1412_v34 = vld [vmem:[#allocation12 + $0x3d8] sm:$0xff] }
 0x257   :  { %v1416_v35 = vld [vmem:[#allocation12 + $0x3f8] sm:$0xff] }
 0x259   :  { %4856 = vmatpush2.bf16.msra.mxu0 %v5749_v36  ;;  %4897 = vmatpush2.bf16.msra.mxu1 %v5877_v38  ;;  %v1452_v38 = vld [vmem:[#allocation12 + $0x518] sm:$0xff] }
 0x25a   :  { %4857 = vmatprep.subr.bf16.mxu0 %v5742_v39  ;;  %4898 = vmatprep.subr.bf16.mxu1 %v5870_v42  ;;  %v1456_v39 = vld [vmem:[#allocation12 + $0x538] sm:$0xff] }
 0x25d   :  { %4858 = vmatpush2.bf16.msra.mxu0 %v5741_v48  ;;  %4899 = vmatpush2.bf16.msra.mxu1 %v5869_v49  ;;  %v5576_v49 = vcombine.high %v1452_v38, %v1456_v39 }
 0x25e   :  { %4859 = vmatprep.subr.bf16.mxu0 %v5734_v18  ;;  %4900 = vmatprep.subr.bf16.mxu1 %v5862_v60  ;;  %v1316_v18 = vld [vmem:[#allocation12 + $0xd8] sm:$0xff] }
 0x25f   :  { %v1444_v60 = vld [vmem:[#allocation12 + $0x4d8] sm:$0xff] }
 0x260   :  { %v5568_v54 = vcombine.high %v1444_v60, %v1448_v14  ;;  %v5567_v2 = vcombine.low %v1444_v60, %v1448_v14 }
 0x261   :  { %4860 = vmatpush2.bf16.msra.mxu0 %v5733_v55  ;;  %4901 = vmatpush2.bf16.msra.mxu1 %v5861_v57  ;;  %v1308_v55 = vld [vmem:[#allocation12 + $0x98] sm:$0xff] }
 0x262   :  { %4911 = vmatprep.subr.bf16.mxu0 %v5472_v61  ;;  %4952 = vmatprep.subr.bf16.mxu1 %v5600_v62  ;;  %v1312_v57 = vld [vmem:[#allocation12 + $0xb8] sm:$0xff] }
 0x263   :  { %v1436_v61 = vld [vmem:[#allocation12 + $0x498] sm:$0xff]  ;;  %v5432_v7 = vcombine.high %v1308_v55, %v1312_v57  ;;  %v5431_v16 = vcombine.low %v1308_v55, %v1312_v57 }
 0x264   :  { %v4617_v22 = vpop.f32.mrf.mxu0  ;;  %4862 = vmatmul.mubr.bf16.vlgmr.msra.gmra.mxu0 %v6259_v63  ;;  %v4658_v28 = vpop.f32.mrf.mxu1  ;;  %4903 = vmatmul.mubr.bf16.vlgmr.msra.gmra.mxu1 %v6263_v9  ;;  %v1440_v62 = vld [vmem:[#allocation12 + $0x4b8] sm:$0xff] }
 0x265   :  { %4912 = vmatpush1.bf16.msra.mxu0 %v5471_v10  ;;  %v6388_v31 = vadd.f32 %v4658_v28, %v4617_v22  ;;  %4953 = vmatpush1.bf16.msra.mxu1 %v5599_v56  ;;  %v5560_v8 = vcombine.high %v1436_v61, %v1440_v62  ;;  %v1300_v10 = vld [vmem:[#allocation12 + $0x58] sm:$0xff]  ;;  %v5559_v19 = vcombine.low %v1436_v61, %v1440_v62 }
 0x266   :  { %v4619_v13 = vpop.f32.mrf.mxu0  ;;  %4913 = vmatprep.subr.bf16.mxu0 %v5464_v30  ;;  %v4660_v15 = vpop.f32.mrf.mxu1  ;;  %4954 = vmatprep.subr.bf16.mxu1 %v5592_v12  ;;  %v1304_v56 = vld [vmem:[#allocation12 + $0x78] sm:$0xff] }
 0x267   :  { %4943 = vmatprep.mubr.bf16.mxu0 %v6221_v32  ;;  %v6391_v27 = vadd.f32 %v4660_v15, %v4619_v13  ;;  %4984 = vmatprep.mubr.bf16.mxu1 %v6226_v41  ;;  %v1320_v32 = vld [vmem:[#allocation12 + $0xf8] sm:$0xff]  ;;  %v5575_v41 = vcombine.low %v1452_v38, %v1456_v39  ;;  %v5424_v22 = vcombine.high %v1300_v10, %v1304_v56 }
 0x268   :  { %v4621_v36 = vpop.f32.mrf.mxu0  ;;  %v4662_v42 = vpop.f32.mrf.mxu1  ;;  %v5440_v51 = vcombine.high %v1316_v18, %v1320_v32  ;;  %v5439_v0 = vcombine.low %v1316_v18, %v1320_v32  ;;  %v1428_v30 = vld [vmem:[#allocation12 + $0x458] sm:$0xff]  ;;  %v5535_v18 = vcombine.low %v1412_v34, %v1416_v35 }
 0x269   :  { %4914 = vmatpush1.bf16.msra.mxu0 %v5463_v29  ;;  %4955 = vmatpush1.bf16.msra.mxu1 %v5591_v11  ;;  %v1432_v12 = vld [vmem:[#allocation12 + $0x478] sm:$0xff]  ;;  %v5423_v11 = vcombine.low %v1300_v10, %v1304_v56 }
 0x26a   :  { %v4622_v44 = vpop.f32.mrf.mxu0  ;;  %4915 = vmatprep.subr.bf16.mxu0 %v5456_v59  ;;  %v4663_v48 = vpop.f32.mrf.mxu1  ;;  %4956 = vmatprep.subr.bf16.mxu1 %v5584_v33  ;;  %v5552_v23 = vcombine.high %v1428_v30, %v1432_v12  ;;  %v1296_v28 = vld [vmem:[#allocation12 + $0x38] sm:$0xff]  ;;  %v5551_v59 = vcombine.low %v1428_v30, %v1432_v12 }
 0x26b   :  { %v1420_v29 = vld [vmem:[#allocation12 + $0x418] sm:$0xff]  ;;  %v5416_v15 = vcombine.high %v1292_v26, %v1296_v28  ;;  %v5415_v39 = vcombine.low %v1292_v26, %v1296_v28 }
 0x26c   :  { %v1424_v13 = vld [vmem:[#allocation12 + $0x438] sm:$0xff] }
 0x26d   :  { %4916 = vmatpush1.bf16.msra.mxu0 %v5455_v43  ;;  %4957 = vmatpush1.bf16.msra.mxu1 %v5583_v45  ;;  %v5544_v33 = vcombine.high %v1420_v29, %v1424_v13  ;;  %v1540_v36 = vld [vmem:[#allocation12 + $0x7d8] sm:$0xff]  ;;  %v5543_v42 = vcombine.low %v1420_v29, %v1424_v13  ;;  %v5536_v43 = vcombine.high %v1412_v34, %v1416_v35 }
 0x26e   :  { %4917 = vmatprep.subr.bf16.mxu0 %v5448_v47  ;;  %4958 = vmatprep.subr.bf16.mxu1 %v5576_v49  ;;  %v1544_v38 = vld [vmem:[#allocation12 + $0x7f8] sm:$0xff] }
 0x26f   :  { %v5664_v44 = vcombine.high %v1540_v36, %v1544_v38  ;;  %v1404_v45 = vld [vmem:[#allocation12 + $0x398] sm:$0xff]  ;;  %v5663_v32 = vcombine.low %v1540_v36, %v1544_v38 }
 0x270   :  { %v1408_v47 = vld [vmem:[#allocation12 + $0x3b8] sm:$0xff] }
 0x271   :  { %4918 = vmatpush1.bf16.msra.mxu0 %v5447_v21  ;;  %4959 = vmatpush1.bf16.msra.mxu1 %v5575_v41  ;;  %v1532_v48 = vld [vmem:[#allocation12 + $0x798] sm:$0xff]  ;;  %v5528_v60 = vcombine.high %v1404_v45, %v1408_v47  ;;  %v5527_v55 = vcombine.low %v1404_v45, %v1408_v47 }
 0x272   :  { %4919 = vmatprep.subr.bf16.mxu0 %v5440_v51  ;;  %4960 = vmatprep.subr.bf16.mxu1 %v5568_v54  ;;  %v1536_v49 = vld [vmem:[#allocation12 + $0x7b8] sm:$0xff] }
 0x273   :  { %v5656_v14 = vcombine.high %v1532_v48, %v1536_v49  ;;  %v1396_v21 = vld [vmem:[#allocation12 + $0x358] sm:$0xff]  ;;  %v5655_v57 = vcombine.low %v1532_v48, %v1536_v49 }
 0x274   :  { %v1400_v41 = vld [vmem:[#allocation12 + $0x378] sm:$0xff] }
 0x275   :  { %4920 = vmatpush1.bf16.msra.mxu0 %v5439_v0  ;;  %4961 = vmatpush1.bf16.msra.mxu1 %v5567_v2  ;;  %v1524_v51 = vld [vmem:[#allocation12 + $0x758] sm:$0xff]  ;;  %v5520_v61 = vcombine.high %v1396_v21, %v1400_v41  ;;  %v5519_v10 = vcombine.low %v1396_v21, %v1400_v41 }
 0x276   :  { %4921 = vmatprep.subr.bf16.mxu0 %v5432_v7  ;;  %4962 = vmatprep.subr.bf16.mxu1 %v5560_v8  ;;  %v1528_v54 = vld [vmem:[#allocation12 + $0x778] sm:$0xff] }
 0x277   :  { %v5648_v62 = vcombine.high %v1524_v51, %v1528_v54  ;;  %v1388_v0 = vld [vmem:[#allocation12 + $0x318] sm:$0xff]  ;;  %v5647_v56 = vcombine.low %v1524_v51, %v1528_v54 }
 0x278   :  { %v1392_v2 = vld [vmem:[#allocation12 + $0x338] sm:$0xff] }
 0x279   :  { %4922 = vmatpush1.bf16.msra.mxu0 %v5431_v16  ;;  %4963 = vmatpush1.bf16.msra.mxu1 %v5559_v19  ;;  %v1516_v7 = vld [vmem:[#allocation12 + $0x718] sm:$0xff]  ;;  %v5512_v30 = vcombine.high %v1388_v0, %v1392_v2  ;;  %v5511_v26 = vcombine.low %v1388_v0, %v1392_v2 }
 0x27a   :  { %4923 = vmatprep.subr.bf16.mxu0 %v5424_v22  ;;  %4964 = vmatprep.subr.bf16.mxu1 %v5552_v23  ;;  %v1520_v8 = vld [vmem:[#allocation12 + $0x738] sm:$0xff] }
 0x27b   :  { %v5640_v12 = vcombine.high %v1516_v7, %v1520_v8  ;;  %v1380_v16 = vld [vmem:[#allocation12 + $0x2d8] sm:$0xff]  ;;  %v5639_v28 = vcombine.low %v1516_v7, %v1520_v8 }
 0x27c   :  { %v1384_v19 = vld [vmem:[#allocation12 + $0x2f8] sm:$0xff] }
 0x27d   :  { %4924 = vmatpush1.bf16.msra.mxu0 %v5423_v11  ;;  %4965 = vmatpush1.bf16.msra.mxu1 %v5551_v59  ;;  %v1508_v22 = vld [vmem:[#allocation12 + $0x6d8] sm:$0xff]  ;;  %v5504_v29 = vcombine.high %v1380_v16, %v1384_v19  ;;  %v5503_v34 = vcombine.low %v1380_v16, %v1384_v19  ;;  %v6115_v16 = vmov 1983009808  }
 0x27e   :  { %4925 = vmatprep.subr.bf16.mxu0 %v5416_v15  ;;  %4966 = vmatprep.subr.bf16.mxu1 %v5544_v33  ;;  %v1512_v23 = vld [vmem:[#allocation12 + $0x6f8] sm:$0xff]  ;;  %v171_v19 = vunpack.c.l.s4 %v6115_v16 }
 0x27f   :  { %v5632_v13 = vcombine.high %v1508_v22, %v1512_v23  ;;  %v1372_v11 = vld [vmem:[#allocation12 + $0x298] sm:$0xff]  ;;  %v5631_v35 = vcombine.low %v1508_v22, %v1512_v23 }
 0x280   :  { %v1376_v59 = vld [vmem:[#allocation12 + $0x2b8] sm:$0xff] }
 0x281   :  { %4926 = vmatpush1.bf16.msra.mxu0 %v5415_v39  ;;  %4967 = vmatpush1.bf16.msra.mxu1 %v5543_v42  ;;  %v1500_v15 = vld [vmem:[#allocation12 + $0x698] sm:$0xff]  ;;  %v5496_v36 = vcombine.high %v1372_v11, %v1376_v59  ;;  %v5495_v45 = vcombine.low %v1372_v11, %v1376_v59 }
 0x282   :  { %4927 = vmatprep.subr.bf16.mxu0 %v5536_v43  ;;  %4968 = vmatprep.subr.bf16.mxu1 %v5664_v44  ;;  %v1504_v33 = vld [vmem:[#allocation12 + $0x6b8] sm:$0xff] }
 0x283   :  { %v5624_v38 = vcombine.high %v1500_v15, %v1504_v33  ;;  %v1364_v39 = vld [vmem:[#allocation12 + $0x258] sm:$0xff]  ;;  %v5623_v47 = vcombine.low %v1500_v15, %v1504_v33  ;;  %v172_v33 = vunpack.c.0.s8 %v171_v19 }
 0x284   :  { %v1368_v42 = vld [vmem:[#allocation12 + $0x278] sm:$0xff] }
 0x285   :  { %4928 = vmatpush2.bf16.msra.mxu0 %v5535_v18  ;;  %4969 = vmatpush2.bf16.msra.mxu1 %v5663_v32  ;;  %v1492_v43 = vld [vmem:[#allocation12 + $0x658] sm:$0xff]  ;;  %v5488_v48 = vcombine.high %v1364_v39, %v1368_v42  ;;  %v5487_v21 = vcombine.low %v1364_v39, %v1368_v42 }
 0x286   :  { %4929 = vmatprep.subr.bf16.mxu0 %v5528_v60  ;;  %4970 = vmatprep.subr.bf16.mxu1 %v5656_v14  ;;  %v1496_v44 = vld [vmem:[#allocation12 + $0x678] sm:$0xff] }
 0x287   :  { %v5616_v49 = vcombine.high %v1492_v43, %v1496_v44  ;;  %v1356_v18 = vld [vmem:[#allocation12 + $0x218] sm:$0xff]  ;;  %v5615_v41 = vcombine.low %v1492_v43, %v1496_v44 }
 0x288   :  { %v1360_v32 = vld [vmem:[#allocation12 + $0x238] sm:$0xff] }
 0x289   :  { %4930 = vmatpush2.bf16.msra.mxu0 %v5527_v55  ;;  %4971 = vmatpush2.bf16.msra.mxu1 %v5655_v57  ;;  %v1484_v60 = vld [vmem:[#allocation12 + $0x618] sm:$0xff]  ;;  %v5480_v51 = vcombine.high %v1356_v18, %v1360_v32  ;;  %v5479_v0 = vcombine.low %v1356_v18, %v1360_v32  ;;  %v6401_v18 = vsub.s32 %v172_v33, %v6190_v46 }
 0x28a   :  { %4931 = vmatprep.subr.bf16.mxu0 %v5520_v61  ;;  %4972 = vmatprep.subr.bf16.mxu1 %v5648_v62  ;;  %v1488_v14 = vld [vmem:[#allocation12 + $0x638] sm:$0xff] }
 0x28b   :  { %v5608_v54 = vcombine.high %v1484_v60, %v1488_v14  ;;  %v1604_v55 = vld [vmem:[#allocation12 + $0x9d8] sm:$0xff]  ;;  %v5607_v2 = vcombine.low %v1484_v60, %v1488_v14  ;;  %v6407_v46 = vrot.slane %v5083_v37, %v6401_v18 }
 0x28c   :  { %v1608_v57 = vld [vmem:[#allocation12 + $0x9f8] sm:$0xff] }
 0x28d   :  { %4932 = vmatpush2.bf16.msra.mxu0 %v5519_v10  ;;  %4973 = vmatpush2.bf16.msra.mxu1 %v5647_v56  ;;  %v1732_v61 = vld [vmem:[#allocation12 + $0xdd8] sm:$0xff]  ;;  %v5728_v7 = vcombine.high %v1604_v55, %v1608_v57  ;;  %v5727_v22 = vcombine.low %v1604_v55, %v1608_v57 }
 0x28e   :  { %4933 = vmatprep.subr.bf16.mxu0 %v5512_v30  ;;  %4974 = vmatprep.subr.bf16.mxu1 %v5640_v12  ;;  %v1736_v62 = vld [vmem:[#allocation12 + $0xdf8] sm:$0xff] }
 0x28f   :  { %v5856_v8 = vcombine.high %v1732_v61, %v1736_v62  ;;  %v1596_v10 = vld [vmem:[#allocation12 + $0x998] sm:$0xff]  ;;  %v5855_v23 = vcombine.low %v1732_v61, %v1736_v62 }
 0x290   :  { %v1600_v56 = vld [vmem:[#allocation12 + $0x9b8] sm:$0xff] }
 0x291   :  { %4934 = vmatpush2.bf16.msra.mxu0 %v5511_v26  ;;  %4975 = vmatpush2.bf16.msra.mxu1 %v5639_v28  ;;  %v1724_v30 = vld [vmem:[#allocation12 + $0xd98] sm:$0xff]  ;;  %v5720_v26 = vcombine.high %v1596_v10, %v1600_v56 }
 0x292   :  { %4935 = vmatprep.subr.bf16.mxu0 %v5504_v29  ;;  %4976 = vmatprep.subr.bf16.mxu1 %v5632_v13  ;;  %v1728_v12 = vld [vmem:[#allocation12 + $0xdb8] sm:$0xff] }
 0x293   :  { %v5848_v28 = vcombine.high %v1724_v30, %v1728_v12  ;;  %v1588_v29 = vld [vmem:[#allocation12 + $0x958] sm:$0xff]  ;;  %v5847_v39 = vcombine.low %v1724_v30, %v1728_v12 }
 0x294   :  { %v1592_v13 = vld [vmem:[#allocation12 + $0x978] sm:$0xff] }
 0x295   :  { %4936 = vmatpush2.bf16.msra.mxu0 %v5503_v34  ;;  %4977 = vmatpush2.bf16.msra.mxu1 %v5631_v35  ;;  %v1716_v59 = vld [vmem:[#allocation12 + $0xd58] sm:$0xff]  ;;  %v5712_v42 = vcombine.high %v1588_v29, %v1592_v13  ;;  %v5711_v14 = vcombine.low %v1588_v29, %v1592_v13 }
 0x296   :  { %4937 = vmatprep.subr.bf16.mxu0 %v5496_v36  ;;  %4978 = vmatprep.subr.bf16.mxu1 %v5624_v38  ;;  %v1720_v15 = vld [vmem:[#allocation12 + $0xd78] sm:$0xff]  ;;  %v5719_v36 = vcombine.low %v1596_v10, %v1600_v56 }
 0x297   :  { %v1572_v55 = vld [vmem:[#allocation12 + $0x8d8] sm:$0xff] }
 0x298   :  { %v1576_v57 = vld [vmem:[#allocation12 + $0x8f8] sm:$0xff] }
 0x299   :  { %4938 = vmatpush2.bf16.msra.mxu0 %v5495_v45  ;;  %4979 = vmatpush2.bf16.msra.mxu1 %v5623_v47  ;;  %v1580_v47 = vld [vmem:[#allocation12 + $0x918] sm:$0xff]  ;;  %v5695_v20 = vcombine.low %v1572_v55, %v1576_v57 }
 0x29a   :  { %4939 = vmatprep.subr.bf16.mxu0 %v5488_v48  ;;  %4980 = vmatprep.subr.bf16.mxu1 %v5616_v49  ;;  %v1584_v48 = vld [vmem:[#allocation12 + $0x938] sm:$0xff] }
 0x29b   :  { %v1708_v49 = vld [vmem:[#allocation12 + $0xd18] sm:$0xff] }
 0x29c   :  { %v1700_v61 = vld [vmem:[#allocation12 + $0xcd8] sm:$0xff] }
 0x29d   :  { %4940 = vmatpush2.bf16.msra.mxu0 %v5487_v21  ;;  %4981 = vmatpush2.bf16.msra.mxu1 %v5615_v41  ;;  %v5839_v21 = vcombine.low %v1716_v59, %v1720_v15  ;;  %v5704_v41 = vcombine.high %v1580_v47, %v1584_v48  ;;  %v1564_v56 = vld [vmem:[#allocation12 + $0x898] sm:$0xff] }
 0x29e   :  { %4941 = vmatprep.subr.bf16.mxu0 %v5480_v51  ;;  %4982 = vmatprep.subr.bf16.mxu1 %v5608_v54  ;;  %v1568_v30 = vld [vmem:[#allocation12 + $0x8b8] sm:$0xff] }
 0x29f   :  { %v1692_v12 = vld [vmem:[#allocation12 + $0xc98] sm:$0xff]  ;;  %v5688_v16 = vcombine.high %v1564_v56, %v1568_v30  ;;  %v5687_v29 = vcombine.low %v1564_v56, %v1568_v30 }
 0x2a0   :  { %v5816_v19 = vcombine.high %v1692_v12, %v1696_v25  ;;  %v5815_v13 = vcombine.low %v1692_v12, %v1696_v25  ;;  %v1552_v33 = vld [vmem:[#allocation12 + $0x838] sm:$0xff] }
 0x2a1   :  { %4942 = vmatpush2.bf16.msra.mxu0 %v5479_v0  ;;  %4983 = vmatpush2.bf16.msra.mxu1 %v5607_v2  ;;  %v5703_v0 = vcombine.low %v1580_v47, %v1584_v48  ;;  %v1772_v56 = vld [vmem:[#allocation12 + $0xf18] sm:$0xff] }
 0x2a2   :  { %4993 = vmatprep.subr.bf16.mxu0 %v5728_v7  ;;  %5034 = vmatprep.subr.bf16.mxu1 %v5856_v8  ;;  %v5696_v7 = vcombine.high %v1572_v55, %v1576_v57  ;;  %v1780_v55 = vld [vmem:[#allocation12 + $0xf58] sm:$0xff] }
 0x2a3   :  { %v1784_v57 = vld [vmem:[#allocation12 + $0xf78] sm:$0xff] }
 0x2a4   :  { %v4699_v11 = vpop.f32.mrf.mxu0  ;;  %4944 = vmatmul.mubr.bf16.vlgmr.msra.gmra.mxu0 %v6240_v40  ;;  %v4740_v35 = vpop.f32.mrf.mxu1  ;;  %4985 = vmatmul.mubr.bf16.vlgmr.msra.gmra.mxu1 %v6247_v3  ;;  %v5840_v40 = vcombine.high %v1716_v59, %v1720_v15  ;;  %v1712_v3 = vld [vmem:[#allocation12 + $0xd38] sm:$0xff]  ;;  %v5903_v25 = vcombine.low %v1780_v55, %v1784_v57 }
 0x2a5   :  { %v4700_v34 = vadd.f32 %v4699_v11, %v6388_v31  ;;  %4994 = vmatpush1.bf16.msra.mxu0 %v5727_v22  ;;  %5035 = vmatpush1.bf16.msra.mxu1 %v5855_v23  ;;  %v5831_v2 = vcombine.low %v1708_v49, %v1712_v3  ;;  %v1556_v22 = vld [vmem:[#allocation12 + $0x858] sm:$0xff] }
 0x2a6   :  { %v4701_v38 = vpop.f32.mrf.mxu0  ;;  %4995 = vmatprep.subr.bf16.mxu0 %v5720_v26  ;;  %v4742_v45 = vpop.f32.mrf.mxu1  ;;  %5036 = vmatprep.subr.bf16.mxu1 %v5848_v28  ;;  %v1560_v23 = vld [vmem:[#allocation12 + $0x878] sm:$0xff] }
 0x2a7   :  { %v4741_v43 = vadd.f32 %v4740_v35, %v4700_v34  ;;  %v4702_v44 = vadd.f32 %v4701_v38, %v6391_v27  ;;  %5025 = vmatprep.mubr.bf16.mxu0 %v6243_v50  ;;  %5066 = vmatprep.mubr.bf16.mxu1 %v6252_v58  ;;  %v5832_v50 = vcombine.high %v1708_v49, %v1712_v3  ;;  %v1704_v58 = vld [vmem:[#allocation12 + $0xcf8] sm:$0xff] }
 0x2a8   :  { %v4703_v31 = vpop.f32.mrf.mxu0  ;;  %v4744_v60 = vpop.f32.mrf.mxu1  ;;  %v5824_v10 = vcombine.high %v1700_v61, %v1704_v58  ;;  %v5823_v37 = vcombine.low %v1700_v61, %v1704_v58  ;;  %v1684_v26 = vld [vmem:[#allocation12 + $0xc58] sm:$0xff]  ;;  %v5680_v11 = vcombine.high %v1556_v22, %v1560_v23 }
 0x2a9   :  { %v4743_v32 = vadd.f32 %v4742_v45, %v4702_v44  ;;  %4996 = vmatpush1.bf16.msra.mxu0 %v5719_v36  ;;  %5037 = vmatpush1.bf16.msra.mxu1 %v5847_v39  ;;  %v1688_v28 = vld [vmem:[#allocation12 + $0xc78] sm:$0xff]  ;;  %v5679_v36 = vcombine.low %v1556_v22, %v1560_v23 }
 0x2aa   :  { %v4704_v27 = vpop.f32.mrf.mxu0  ;;  %4997 = vmatprep.subr.bf16.mxu0 %v5712_v42  ;;  %v4745_v54 = vpop.f32.mrf.mxu1  ;;  %5038 = vmatprep.subr.bf16.mxu1 %v5840_v40  ;;  %v5808_v59 = vcombine.high %v1684_v26, %v1688_v28  ;;  %v1548_v15 = vld [vmem:[#allocation12 + $0x818] sm:$0xff]  ;;  %v5807_v38 = vcombine.low %v1684_v26, %v1688_v28 }
 0x2ab   :  { %v5084_v51 = vcombine.low %v4741_v43, %v4743_v32  ;;  %v1676_v34 = vld [vmem:[#allocation12 + $0xc18] sm:$0xff]  ;;  %v5672_v39 = vcombine.high %v1548_v15, %v1552_v33  ;;  %v5671_v47 = vcombine.low %v1548_v15, %v1552_v33 }
 0x2ac   :  { %v1680_v35 = vld [vmem:[#allocation12 + $0xc38] sm:$0xff] }
 0x2ad   :  { %v6410_v62 = vrot.slane %v5084_v51, %v6401_v18  ;;  %4998 = vmatpush1.bf16.msra.mxu0 %v5711_v14  ;;  %5039 = vmatpush1.bf16.msra.mxu1 %v5839_v21  ;;  %v5800_v42 = vcombine.high %v1676_v34, %v1680_v35  ;;  %v1668_v43 = vld [vmem:[#allocation12 + $0xbd8] sm:$0xff]  ;;  %v5799_v48 = vcombine.low %v1676_v34, %v1680_v35 }
 0x2ae   :  { %4999 = vmatprep.subr.bf16.mxu0 %v5704_v41  ;;  %5040 = vmatprep.subr.bf16.mxu1 %v5832_v50  ;;  %v1672_v44 = vld [vmem:[#allocation12 + $0xbf8] sm:$0xff] }
 0x2af   :  { %v5099_v8 = vcombine.low %v6407_v46, %v6410_v62  ;;  %v1796_v45 = vld [vmem:[#allocation12 + $0xfd8] sm:$0xff]  ;;  %v5792_v31 = vcombine.high %v1668_v43, %v1672_v44  ;;  %v5791_v27 = vcombine.low %v1668_v43, %v1672_v44 }
 0x2b0   :  { %v1800_v40 = vld [vmem:[#allocation12 + $0xff8] sm:$0xff] }
 0x2b1   :  { %5000 = vmatpush1.bf16.msra.mxu0 %v5703_v0  ;;  %5041 = vmatpush1.bf16.msra.mxu1 %v5831_v2  ;;  %v5920_v49 = vcombine.high %v1796_v45, %v1800_v40  ;;  %v1660_v3 = vld [vmem:[#allocation12 + $0xb98] sm:$0xff]  ;;  %v5919_v21 = vcombine.low %v1796_v45, %v1800_v40  ;;  %v5904_v2 = vcombine.high %v1780_v55, %v1784_v57 }
 0x2b2   :  { %5001 = vmatprep.subr.bf16.mxu0 %v5696_v7  ;;  %5042 = vmatprep.subr.bf16.mxu1 %v5824_v10  ;;  %v1664_v32 = vld [vmem:[#allocation12 + $0xbb8] sm:$0xff] }
 0x2b3   :  { %v1788_v60 = vld [vmem:[#allocation12 + $0xf98] sm:$0xff]  ;;  %v5784_v41 = vcombine.high %v1660_v3, %v1664_v32  ;;  %v5783_v61 = vcombine.low %v1660_v3, %v1664_v32 }
 0x2b4   :  { %v1792_v14 = vld [vmem:[#allocation12 + $0xfb8] sm:$0xff] }
 0x2b5   :  { %5002 = vmatpush1.bf16.msra.mxu0 %v5695_v20  ;;  %5043 = vmatpush1.bf16.msra.mxu1 %v5823_v37  ;;  %v5912_v51 = vcombine.high %v1788_v60, %v1792_v14  ;;  %v1652_v54 = vld [vmem:[#allocation12 + $0xb58] sm:$0xff]  ;;  %v5911_v58 = vcombine.low %v1788_v60, %v1792_v14 }
 0x2b6   :  { %5003 = vmatprep.subr.bf16.mxu0 %v5688_v16  ;;  %5044 = vmatprep.subr.bf16.mxu1 %v5816_v19  ;;  %v1656_v50 = vld [vmem:[#allocation12 + $0xb78] sm:$0xff] }
 0x2b7   :  { %v5776_v0 = vcombine.high %v1652_v54, %v1656_v50  ;;  %v1644_v7 = vld [vmem:[#allocation12 + $0xb18] sm:$0xff]  ;;  %v5775_v12 = vcombine.low %v1652_v54, %v1656_v50 }
 0x2b8   :  { %v1648_v10 = vld [vmem:[#allocation12 + $0xb38] sm:$0xff] }
 0x2b9   :  { %5004 = vmatpush1.bf16.msra.mxu0 %v5687_v29  ;;  %5045 = vmatpush1.bf16.msra.mxu1 %v5815_v13  ;;  %v1776_v30 = vld [vmem:[#allocation12 + $0xf38] sm:$0xff]  ;;  %v5768_v20 = vcombine.high %v1644_v7, %v1648_v10  ;;  %v5767_v26 = vcombine.low %v1644_v7, %v1648_v10 }
 0x2ba   :  { %5005 = vmatprep.subr.bf16.mxu0 %v5680_v11  ;;  %5046 = vmatprep.subr.bf16.mxu1 %v5808_v59  ;;  %v5896_v37 = vcombine.high %v1772_v56, %v1776_v30  ;;  %v1636_v16 = vld [vmem:[#allocation12 + $0xad8] sm:$0xff]  ;;  %v5895_v28 = vcombine.low %v1772_v56, %v1776_v30 }
 0x2bb   :  { %v1640_v19 = vld [vmem:[#allocation12 + $0xaf8] sm:$0xff] }
 0x2bc   :  { %v1764_v22 = vld [vmem:[#allocation12 + $0xed8] sm:$0xff]  ;;  %v5760_v29 = vcombine.high %v1636_v16, %v1640_v19  ;;  %v5759_v34 = vcombine.low %v1636_v16, %v1640_v19 }
 0x2bd   :  { %5006 = vmatpush1.bf16.msra.mxu0 %v5679_v36  ;;  %5047 = vmatpush1.bf16.msra.mxu1 %v5807_v38  ;;  %v1768_v23 = vld [vmem:[#allocation12 + $0xef8] sm:$0xff] }
 0x2be   :  { %5007 = vmatprep.subr.bf16.mxu0 %v5672_v39  ;;  %5048 = vmatprep.subr.bf16.mxu1 %v5800_v42  ;;  %v5888_v13 = vcombine.high %v1764_v22, %v1768_v23  ;;  %v1628_v11 = vld [vmem:[#allocation12 + $0xa98] sm:$0xff]  ;;  %v5887_v35 = vcombine.low %v1764_v22, %v1768_v23 }
 0x2bf   :  { %v1632_v59 = vld [vmem:[#allocation12 + $0xab8] sm:$0xff] }
 0x2c0   :  { %v1756_v15 = vld [vmem:[#allocation12 + $0xe98] sm:$0xff]  ;;  %v5752_v36 = vcombine.high %v1628_v11, %v1632_v59  ;;  %v5751_v45 = vcombine.low %v1628_v11, %v1632_v59 }
 0x2c1   :  { %5008 = vmatpush1.bf16.msra.mxu0 %v5671_v47  ;;  %5049 = vmatpush1.bf16.msra.mxu1 %v5799_v48  ;;  %v1760_v33 = vld [vmem:[#allocation12 + $0xeb8] sm:$0xff] }
 0x2c2   :  { %5009 = vmatprep.subr.bf16.mxu0 %v5792_v31  ;;  %5050 = vmatprep.subr.bf16.mxu1 %v5920_v49  ;;  %v5880_v38 = vcombine.high %v1756_v15, %v1760_v33  ;;  %v1620_v39 = vld [vmem:[#allocation12 + $0xa58] sm:$0xff]  ;;  %v5879_v40 = vcombine.low %v1756_v15, %v1760_v33 }
 0x2c3   :  { %v1624_v42 = vld [vmem:[#allocation12 + $0xa78] sm:$0xff] }
 0x2c4   :  { %v1748_v43 = vld [vmem:[#allocation12 + $0xe58] sm:$0xff]  ;;  %v5744_v47 = vcombine.high %v1620_v39, %v1624_v42  ;;  %v5743_v60 = vcombine.low %v1620_v39, %v1624_v42 }
 0x2c5   :  { %5010 = vmatpush2.bf16.msra.mxu0 %v5791_v27  ;;  %5051 = vmatpush2.bf16.msra.mxu1 %v5919_v21  ;;  %v1752_v44 = vld [vmem:[#allocation12 + $0xe78] sm:$0xff] }
 0x2c6   :  { %5011 = vmatprep.subr.bf16.mxu0 %v5784_v41  ;;  %5052 = vmatprep.subr.bf16.mxu1 %v5912_v51  ;;  %v5872_v48 = vcombine.high %v1748_v43, %v1752_v44  ;;  %v1612_v31 = vld [vmem:[#allocation12 + $0xa18] sm:$0xff]  ;;  %v5871_v14 = vcombine.low %v1748_v43, %v1752_v44  ;;  %v5130_v43 = vld [vmem:[#allocation16] sm:$0xff] }
 0x2c7   :  { %v1616_v49 = vld [vmem:[#allocation12 + $0xa38] sm:$0xff] }
 0x2c8   :  { %v1740_v3 = vld [vmem:[#allocation12 + $0xe18] sm:$0xff]  ;;  %v5736_v27 = vcombine.high %v1612_v31, %v1616_v49  ;;  %v5735_v41 = vcombine.low %v1612_v31, %v1616_v49  ;;  %v5147_v31 = vrot.slane %v5130_v43, %v6301_v6 }
 0x2c9   :  { %5012 = vmatpush2.bf16.msra.mxu0 %v5783_v61  ;;  %5053 = vmatpush2.bf16.msra.mxu1 %v5911_v58  ;;  %v1744_v32 = vld [vmem:[#allocation12 + $0xe38] sm:$0xff] }
 0x2ca   :  { %5013 = vmatprep.subr.bf16.mxu0 %v5776_v0  ;;  %5054 = vmatprep.subr.bf16.mxu1 %v5904_v2  ;;  %v5864_v21 = vcombine.high %v1740_v3, %v1744_v32  ;;  %v5863_v51 = vcombine.low %v1740_v3, %v1744_v32 }
 0x2cd   :  { %5014 = vmatpush2.bf16.msra.mxu0 %v5775_v12  ;;  %5055 = vmatpush2.bf16.msra.mxu1 %v5903_v25 }
 0x2ce   :  { %5015 = vmatprep.subr.bf16.mxu0 %v5768_v20  ;;  %5056 = vmatprep.subr.bf16.mxu1 %v5896_v37 }
 0x2d1   :  { %5016 = vmatpush2.bf16.msra.mxu0 %v5767_v26  ;;  %5057 = vmatpush2.bf16.msra.mxu1 %v5895_v28 }
 0x2d2   :  { %5017 = vmatprep.subr.bf16.mxu0 %v5760_v29  ;;  %5058 = vmatprep.subr.bf16.mxu1 %v5888_v13 }
 0x2d5   :  { %5018 = vmatpush2.bf16.msra.mxu0 %v5759_v34  ;;  %5059 = vmatpush2.bf16.msra.mxu1 %v5887_v35  ;;  %v134_v35 = vld [vmem:[#allocation13] sm:$0xff] }
 0x2d6   :  { %5019 = vmatprep.subr.bf16.mxu0 %v5752_v36  ;;  %5060 = vmatprep.subr.bf16.mxu1 %v5880_v38  ;;  %v139_v36 = vrot.slane %v134_v35, %v6278_v52  ;;  %v143_v38 = vrot.slane %v134_v35, %v6281_v53  ;;  %v147_v39 = vrot.slane %v134_v35, %v6288_v5 }
 0x2d7   :  { %v151_v42 = vrot.slane %v134_v35, %v6301_v6  ;;  %v155_v6 = vrot.slane %v134_v35, %v6312_v1 }
 0x2d8   :  { %v168_v44 = vcombine.low %v139_v36, %v143_v38 }
 0x2d9   :  { %5020 = vmatpush2.bf16.msra.mxu0 %v5751_v45  ;;  %5061 = vmatpush2.bf16.msra.mxu1 %v5879_v40  ;;  %v169_v45 = vcombine.low %v147_v39, %v151_v42  ;;  %v5135_v40 = vrot.slane %v5130_v43, %v6278_v52 }
 0x2da   :  { %5021 = vmatprep.subr.bf16.mxu0 %v5744_v47  ;;  %5062 = vmatprep.subr.bf16.mxu1 %v5872_v48  ;;  %v5143_v47 = vrot.slane %v5130_v43, %v6288_v5  ;;  %v5139_v48 = vrot.slane %v5130_v43, %v6281_v53  ;;  %v176_v49 = vrot.slane %v168_v44, %v6401_v18 }
 0x2db   :  { %v183_v3 = vrot.slane %v169_v45, %v6401_v18 }
 0x2dd   :  { %5022 = vmatpush2.bf16.msra.mxu0 %v5743_v60  ;;  %5063 = vmatpush2.bf16.msra.mxu1 %v5871_v14  ;;  %v184_v32 = vcombine.low %v176_v49, %v183_v3  ;;  %v5164_v60 = vcombine.low %v5135_v40, %v5139_v48  ;;  %v5165_v14 = vcombine.low %v5143_v47, %v5147_v31 }
 0x2de   :  { %5023 = vmatprep.subr.bf16.mxu0 %v5736_v27  ;;  %5064 = vmatprep.subr.bf16.mxu1 %v5864_v21 }
 0x2df   :  { %v5119_v27 = vadd.f32 %v5099_v8, %v184_v32  ;;  %v5172_v21 = vrot.slane %v5164_v60, %v6401_v18  ;;  %v5179_v52 = vrot.slane %v5165_v14, %v6401_v18 }
 0x2e1   :  { %5024 = vmatpush2.bf16.msra.mxu0 %v5735_v41  ;;  %5065 = vmatpush2.bf16.msra.mxu1 %v5863_v51  ;;  %v5128_v5 = vmax.f32 %v5119_v27, 0.0  ;;  %v5180_v41 = vcombine.low %v5172_v21, %v5179_v52  ;;  %v159_v51 = vrot.slane %v134_v35, %v6320_v24 }
 0x2e3   :  { %v5200_v53 = vmul.f32 %v5180_v41, %v5128_v5  ;;  %v185_v62 = vcombine.low %v155_v6, %v159_v51  ;;  %v5264_v51 = vld [vmem:[#allocation3] sm:$0x3] }
 0x2e4   :  { %v4781_v54 = vpop.f32.mrf.mxu0  ;;  %5026 = vmatmul.mubr.bf16.vlgmr.msra.gmra.mxu0 %v6259_v63  ;;  %v4822_v50 = vpop.f32.mrf.mxu1  ;;  %5067 = vmatmul.mubr.bf16.vlgmr.msra.gmra.mxu1 %v6263_v9 }
 0x2e5   :  { %v4823_v55 = vadd.f32 %v4822_v50, %v4781_v54  ;;  %v163_v54 = vrot.slane %v134_v35, %v6315_v4  ;;  %v167_v50 = vrot.slane %v134_v35, %v6327_v17 }
 0x2e6   :  { %v4783_v57 = vpop.f32.mrf.mxu0  ;;  %v4824_v61 = vpop.f32.mrf.mxu1 }
 0x2e7   :  { %v4825_v58 = vadd.f32 %v4824_v61, %v4783_v57  ;;  %v186_v8 = vcombine.low %v163_v54, %v167_v50  ;;  %v5151_v61 = vrot.slane %v5130_v43, %v6312_v1 }
 0x2e8   :  { %v4785_v0 = vpop.f32.mrf.mxu0  ;;  %v4826_v2 = vpop.f32.mrf.mxu1 }
 0x2ea   :  { %v4786_v7 = vpop.f32.mrf.mxu0  ;;  %v4827_v10 = vpop.f32.mrf.mxu1 }
 0x2eb   :  { %v5159_v10 = vrot.slane %v5130_v43, %v6315_v4 }
 0x324   :  { %v4863_v56 = vpop.f32.mrf.mxu0  ;;  %v4904_v12 = vpop.f32.mrf.mxu1 }
 0x325   :  { %v4864_v30 = vadd.f32 %v4863_v56, %v4823_v55  ;;  %v5211_v55 = vrot.slane %v5200_v53, %v6401_v18  ;;  %v5163_v56 = vrot.slane %v5130_v43, %v6327_v17 }
 0x326   :  { %v4865_v25 = vpop.f32.mrf.mxu0  ;;  %v4906_v16 = vpop.f32.mrf.mxu1 }
 0x327   :  { %v6416_v20 = vadd.f32 %v4904_v12, %v4864_v30  ;;  %v4866_v37 = vadd.f32 %v4865_v25, %v4825_v58  ;;  %v5155_v58 = vrot.slane %v5130_v43, %v6320_v24  ;;  %v5247_v39 = vsel %vm1264_vm0, %v5211_v55, 0.0 }
 0x328   :  { %v4867_v63 = vpop.f32.mrf.mxu0  ;;  %v4908_v9 = vpop.f32.mrf.mxu1 }
 0x329   :  { %v6418_v19 = vadd.f32 %v4906_v16, %v4866_v37  ;;  %v5219_v37 = vcombine.high %v5211_v55, %v5211_v55  ;;  %v193_v16 = vrot.slane %v185_v62, %v6401_v18  ;;  %v200_v63 = vrot.slane %v186_v8, %v6401_v18 }
 0x32a   :  { %v4868_v22 = vpop.f32.mrf.mxu0  ;;  %v4909_v26 = vpop.f32.mrf.mxu1  ;;  %v5181_v24 = vcombine.low %v5151_v61, %v5155_v58 }
 0x32b   :  { %v5100_v23 = vcombine.low %v6416_v20, %v6418_v19 }
 0x32d   :  { %v5108_v17 = vrot.slane %v5100_v23, %v6401_v18 }
 0x364   :  { %v4945_v28 = vpop.f32.mrf.mxu0  ;;  %v4986_v29 = vpop.f32.mrf.mxu1 }
 0x365   :  { %v4987_v57 = vadd.f32 %v4986_v29, %v4945_v28  ;;  %v5182_v28 = vcombine.low %v5159_v10, %v5163_v56 }
 0x366   :  { %v4947_v13 = vpop.f32.mrf.mxu0  ;;  %v4988_v11 = vpop.f32.mrf.mxu1 }
 0x367   :  { %v4989_v0 = vadd.f32 %v4988_v11, %v4947_v13  ;;  %v5204_v13 = vcombine.high %v5200_v53, %v5200_v53  ;;  %v5196_v35 = vrot.slane %v5182_v28, %v6401_v18 }
 0x368   :  { %v4949_v59 = vpop.f32.mrf.mxu0  ;;  %v4990_v15 = vpop.f32.mrf.mxu1 }
 0x369   :  { %v5248_v59 = vsel %vm1264_vm0, %v5219_v37, 0.0  ;;  %v201_v15 = vcombine.low %v193_v16, %v200_v63  ;;  %v5218_v38 = vrot.slane %v5204_v13, %v6401_v18 }
 0x36a   :  { %v4950_v33 = vpop.f32.mrf.mxu0  ;;  %v4991_v34 = vpop.f32.mrf.mxu1  ;;  %v5249_v42 = vadd.f32 %v5248_v59, %v5247_v39 }
 0x36b   :  { %v5189_v34 = vrot.slane %v5181_v24, %v6401_v18  ;;  %v5220_v20 = vcombine.high %v5218_v38, %v5218_v38  ;;  %v5250_v19 = vsel %vm1264_vm0, %v5218_v38, 0.0 }
 0x36c   :  { %v5251_v23 = vadd.f32 %v5250_v19, %v5249_v42 }
 0x36d   :  { %v5197_v44 = vcombine.low %v5189_v34, %v5196_v35  ;;  %v5252_v31 = vsel %vm1264_vm0, %v5220_v20, 0.0 }
 0x36e   :  { %v5253_v49 = vadd.f32 %v5252_v31, %v5251_v23 }
 0x3a4   :  { %v5027_v46 = vpop.f32.mrf.mxu0  ;;  %v5068_v7 = vpop.f32.mrf.mxu1 }
 0x3a5   :  { %v5028_v2 = vadd.f32 %v5027_v46, %v4987_v57 }
 0x3a6   :  { %v5029_v30 = vpop.f32.mrf.mxu0  ;;  %v5070_v25 = vpop.f32.mrf.mxu1 }
 0x3a7   :  { %v5030_v12 = vadd.f32 %v5029_v30, %v4989_v0  ;;  %v5069_v22 = vadd.f32 %v5068_v7, %v5028_v2 }
 0x3a8   :  { %v5031_v9 = vpop.f32.mrf.mxu0  ;;  %v5072_v26 = vpop.f32.mrf.mxu1 }
 0x3a9   :  { %v5071_v1 = vadd.f32 %v5070_v25, %v5030_v12 }
 0x3aa   :  { %v5032_v29 = vpop.f32.mrf.mxu0  ;;  %v5073_v4 = vpop.f32.mrf.mxu1 }
 0x3ab   :  { %v5101_v11 = vcombine.low %v5069_v22, %v5071_v1 }
 0x3ad   :  { %v5115_v33 = vrot.slane %v5101_v11, %v6401_v18 }
 0x3af   :  { %v5116_v36 = vcombine.low %v5108_v17, %v5115_v33 }
 0x3b1   :  { %v5120_v43 = vadd.f32 %v5116_v36, %v201_v15 }
 0x3b3   :  { %v5129_v45 = vmax.f32 %v5120_v43, 0.0 }
 0x3b5   :  { %v5201_v40 = vmul.f32 %v5197_v44, %v5129_v45 }
 0x3b7   :  { %v5221_v47 = vcombine.high %v5201_v40, %v5201_v40  ;;  %v5228_v48 = vrot.slane %v5201_v40, %v6401_v18 }
 0x3b9   :  { %v5235_v3 = vrot.slane %v5221_v47, %v6401_v18  ;;  %v5236_v32 = vcombine.high %v5228_v48, %v5228_v48  ;;  %v5254_v60 = vsel %vm1264_vm0, %v5228_v48, 0.0  ;;  %v5267_v18 = vstv %s6481_s8 }
 0x3ba   :  { %v5255_v14 = vadd.f32 %v5254_v60, %v5253_v49 }
 0x3bb   :  { %v5237_v27 = vcombine.high %v5235_v3, %v5235_v3  ;;  %v5256_v21 = vsel %vm1264_vm0, %v5236_v32, 0.0  ;;  %v5258_v5 = vsel %vm1264_vm0, %v5235_v3, 0.0 }
 0x3bc   :  { %v5257_v52 = vadd.f32 %v5256_v21, %v5255_v14 }
 0x3bd   :  { %v5260_v53 = vsel %vm1264_vm0, %v5237_v27, 0.0 }
 0x3be   :  { %v5259_v41 = vadd.f32 %v5258_v5, %v5257_v52 }
 0x3c0   :  { %v5261_v6 = vadd.f32 %v5260_v53, %v5259_v41 }
 0x3c2   :  { %5262 = vadd.xlane.f32.xlu0 %v5261_v6 }
 0x44b   :  { %v5263_v54 = vpop.xlane.xlu0 %5262 }
 0x44c   :  { %v5265_v50 = vadd.f32 %v5264_v51, %v5263_v54 }
 0x44e   :  { %v5268_v55 = vadd.f32 %v5267_v18, %v5265_v50 }
 0x450   :  { %5270 = vst.msk [vmem:[%s6482_s9] sm:$0x3] %vm1282_vm1, %v5268_v55 }
 0x451   :  { %5275 = vsyncpa [#allocation6], 1 }
 0x452   :  { %5276 = vsyncpa [#allocation8], 1 }
 0x453   :  { %5277 = vsyncpa [#allocation11], 1 }
 0x454   :  { %5278 = vsyncpa [#allocation14], 1 }
 0x455   :  { %5279 = vsyncpa [#allocation17], 1 }

</bundles_post_ra>
